<compile_context>
chip_gen: v5e
topology: v5e:2x2
jax: 0.10.0
libtpu: 0.0.40
codegen_flags: <defaults>
</compile_context>

<pallas_src>
import jax
import jax.numpy as jnp
from jax.experimental import pallas as pl
from jax.experimental.pallas import tpu as pltpu


def bottleneck_kernel(x_ref, w1_ref, b1_ref, w2_ref, b2_ref, w3_ref, b3_ref,
                      o_ref):
    nb, H, W, Cin = x_ref.shape
    width = w1_ref.shape[1]
    Cout = w3_ref.shape[1]
    M = nb * H * W
    R = nb * H

    x_bf = x_ref[...]                                  # (nb, H, W, Cin) bf16
    x2d = x_bf.reshape(M, Cin)

    # --- conv1 (1x1, BN scale folded into w1) + shift + relu ---------------
    h1 = jnp.dot(x2d, w1_ref[...], preferred_element_type=jnp.float32)
    h1 = jnp.maximum(h1 + b1_ref[...], 0.0)            # (M, width) f32

    # --- conv2 (3x3, pad=1, stride=1, BN scale folded) + shift + relu ------
    # dx shifts: XLU sublane rolls (f32) + left/right boundary masks.
    # dy shifts: leading-axis slice+concat (free tile moves) + top/bottom
    #            masks; masks also cover image boundaries inside the batch.
    h3d = h1.reshape(R, W, width)

    wi = jax.lax.broadcasted_iota(jnp.int32, (R, W, width), 1)
    left_edge = wi == 0
    right_edge = wi == W - 1
    ri = jax.lax.broadcasted_iota(jnp.int32, (R, W, width), 0)
    hh = jax.lax.rem(ri, H)
    top_edge = hh == 0
    bot_edge = hh == H - 1

    cols = (
        jnp.where(left_edge, 0.0,
                  pltpu.roll(h3d, 1, axis=1)).astype(jnp.bfloat16),      # dx=0
        h3d.astype(jnp.bfloat16),                                        # dx=1
        jnp.where(right_edge, 0.0,
                  pltpu.roll(h3d, W - 1, axis=1)).astype(jnp.bfloat16),  # dx=2
    )

    def shift_down(a):   # row r <- row r-1 (wrapped rows masked by top_edge)
        return jnp.concatenate([a[R - 1:R], a[0:R - 1]], axis=0)

    def shift_up(a):     # row r <- row r+1 (wrapped rows masked by bot_edge)
        return jnp.concatenate([a[1:R], a[0:1]], axis=0)

    acc = jnp.zeros((M, width), jnp.float32)
    for dx in range(3):
        c = cols[dx]
        taps = (
            jnp.where(top_edge, 0.0, shift_down(c)),   # dy=0 -> input row y-1
            c,                                         # dy=1 -> input row y
            jnp.where(bot_edge, 0.0, shift_up(c)),     # dy=2 -> input row y+1
        )
        for dy in range(3):
            acc = acc + jnp.dot(taps[dy].reshape(M, width), w2_ref[dy, dx],
                                preferred_element_type=jnp.float32)
    h2 = jnp.maximum(acc + b2_ref[...], 0.0)            # (M, width) f32

    # --- conv3 (1x1, BN scale folded into w3) + shift -----------------------
    h3 = jnp.dot(h2.astype(jnp.bfloat16), w3_ref[...],
                 preferred_element_type=jnp.float32) + b3_ref[...]

    # --- residual add (identity: downsample=None -> Cin == Cout) + relu -----
    out = jnp.maximum(h3 + x2d.astype(jnp.float32), 0.0)
    o_ref[...] = out.reshape(nb, H, W, Cout)


def _pick_nb(N, H, W, Cin, Cout, width, budget_bytes=8 * 1024 * 1024):
    """Images per grid step: fill a modest VMEM budget, keep >=2 grid steps."""
    per_img = (2 * (H * W * Cin * 2)          # bf16 input block, double-buffered
               + 2 * (H * W * Cout * 4)       # f32 output block, double-buffered
               + H * W * width * 18)          # conv2 working set (h1/acc + taps)
    nb = max(1, budget_bytes // max(per_img, 1))
    nb = int(min(nb, N))
    while nb > 1 and (N // nb) < 2:           # >=2 grid points for megacore
        nb -= 1
    while N % nb:
        nb -= 1
    return nb


def bottleneck_forward(x_nhwc, params, nb=None):
    (w1, b1, w2, b2, w3, b3) = params
    N, H, W, Cin = x_nhwc.shape
    width = w1.shape[1]
    Cout = w3.shape[1]
    assert Cin == Cout, "identity residual requires inplanes == planes*expansion"

    if nb is None:
        nb = _pick_nb(N, H, W, Cin, Cout, width)
    assert N % nb == 0

    def rep(shape):
        r = len(shape)
        return pl.BlockSpec(shape, lambda n, _r=r: (0,) * _r)

    return pl.pallas_call(
        bottleneck_kernel,
        out_shape=jax.ShapeDtypeStruct((N, H, W, Cout), jnp.float32),
        grid=(N // nb,),
        in_specs=[
            pl.BlockSpec((nb, H, W, Cin), lambda n: (n, 0, 0, 0)),
            rep(w1.shape), rep(b1.shape),
            rep(w2.shape), rep(b2.shape),
            rep(w3.shape), rep(b3.shape),
        ],
        out_specs=pl.BlockSpec((nb, H, W, Cout), lambda n: (n, 0, 0, 0)),
        compiler_params=pltpu.CompilerParams(
            dimension_semantics=("parallel",),
            vmem_limit_bytes=32 * 1024 * 1024),
    )(x_nhwc, w1, b1, w2, b2, w3, b3)


def make_params(key, inplanes, planes, base_width=64, eps=1e-5):
    """Synthetic params in PyTorch shapes, converted + BN-scale-folded."""
    expansion = 4
    width = int(planes * (base_width / 64.0))
    outplanes = planes * expansion
    ks = jax.random.split(key, 15)

    # PyTorch conv weights are OIHW.
    w1_oihw = jax.random.normal(ks[0], (width, inplanes, 1, 1), jnp.float32) * 0.1
    w2_oihw = jax.random.normal(ks[1], (width, width, 3, 3), jnp.float32) * 0.1
    w3_oihw = jax.random.normal(ks[2], (outplanes, width, 1, 1), jnp.float32) * 0.1

    def bn_fold(kg, kb, km, kv, c):
        gamma = 1.0 + 0.1 * jax.random.normal(kg, (c,), jnp.float32)
        beta = 0.1 * jax.random.normal(kb, (c,), jnp.float32)
        rmean = 0.1 * jax.random.normal(km, (c,), jnp.float32)
        rvar = jax.random.uniform(kv, (c,), jnp.float32, 0.5, 1.5)
        scale = gamma / jnp.sqrt(rvar + eps)
        shift = beta - rmean * scale
        return scale, shift

    s1, b1 = bn_fold(ks[3], ks[4], ks[5], ks[6], width)
    s2, b2 = bn_fold(ks[7], ks[8], ks[9], ks[10], width)
    s3, b3 = bn_fold(ks[11], ks[12], ks[13], ks[14], outplanes)

    # Convert: 1x1 OIHW -> (Cin, Cout); 3x3 OIHW -> HWIO.  Fold BN scale into
    # the conv weights (inference form): conv->BN == conv(w*scale) + shift.
    w1 = w1_oihw[:, :, 0, 0].T * s1[None, :]
    w2 = jnp.transpose(w2_oihw, (2, 3, 1, 0)) * s2[None, None, None, :]
    w3 = w3_oihw[:, :, 0, 0].T * s3[None, :]
    return (w1, b1.reshape(1, width), w2, b2.reshape(1, width),
            w3, b3.reshape(1, outplanes))


def reference_forward(x_nhwc, params):
    """Plain-JAX reference (same NHWC layout, f32 math) for correctness."""
    (w1, b1, w2, b2, w3, b3) = params

    def conv(x, w, padding):
        return jax.lax.conv_general_dilated(
            x, w, window_strides=(1, 1), padding=padding,
            dimension_numbers=('NHWC', 'HWIO', 'NHWC'))

    h = jnp.maximum(conv(x_nhwc, w1[None, None], 'VALID') + b1, 0.0)
    h = jnp.maximum(conv(h, w2, [(1, 1), (1, 1)]) + b2, 0.0)
    h = conv(h, w3[None, None], 'VALID') + b3
    return jnp.maximum(h + x_nhwc, 0.0)


if __name__ == "__main__":
    key = jax.random.PRNGKey(0)
    planes = 4
    inplanes = planes * 4          # = planes * expansion so the residual is valid
    N, H, W = 2, 16, 16

    kx, kp = jax.random.split(key)
    # PyTorch-style NCHW input, then move to NHWC for the kernel.
    x_nchw = jax.random.normal(kx, (N, inplanes, H, W), jnp.float32)
    x_nhwc = jnp.transpose(x_nchw, (0, 2, 3, 1))

    (w1, b1, w2, b2, w3, b3) = make_params(kp, inplanes, planes)

    # bf16 MXU operands (x + scale-folded conv weights); shifts stay f32.
    bf = jnp.bfloat16
    x_bf = x_nhwc.astype(bf)
    params_bf = (w1.astype(bf), b1, w2.astype(bf), b2, w3.astype(bf), b3)

    out = jax.block_until_ready(bottleneck_forward(x_bf, params_bf))

    # Reference uses the same bf16-rounded operands, upcast to f32.
    f32 = jnp.float32
    params_ref = (w1.astype(bf).astype(f32), b1,
                  w2.astype(bf).astype(f32), b2,
                  w3.astype(bf).astype(f32), b3)
    ref = jax.block_until_ready(
        reference_forward(x_bf.astype(f32), params_ref))

    assert out.shape == (N, H, W, planes * 4)
    assert jnp.allclose(out, ref, atol=5e-3, rtol=5e-3), "mismatch vs reference"

    print("KERNEL_OK")
</pallas_src>

<mosaic_0001>
module attributes {stable_mosaic.version = 11 : i64} {
  func.func @bottleneck_kernel(%arg0: i32, %arg1: memref<1x16x16x16xbf16, #tpu.memory_space<vmem>>, %arg2: memref<16x4xbf16, #tpu.memory_space<vmem>>, %arg3: memref<1x4xf32, #tpu.memory_space<vmem>>, %arg4: memref<3x3x4x4xbf16, #tpu.memory_space<vmem>>, %arg5: memref<1x4xf32, #tpu.memory_space<vmem>>, %arg6: memref<4x16xbf16, #tpu.memory_space<vmem>>, %arg7: memref<1x16xf32, #tpu.memory_space<vmem>>, %arg8: memref<1x16x16x16xf32, #tpu.memory_space<vmem>>) attributes {dimension_semantics = [#tpu.dimension_semantics<parallel>], iteration_bounds = array<i64: 2>, scalar_prefetch = 0 : i64, scratch_operands = 0 : i64, tpu.core_type = #tpu.core_type<tc>, window_params = [{transform_indices = @transform_0, window_bounds = array<i64: 1, 16, 16, 16>}, {pipeline_mode = #tpu.pipeline_mode<synchronous>, transform_indices = @transform_1, window_bounds = array<i64: 16, 4>}, {pipeline_mode = #tpu.pipeline_mode<synchronous>, transform_indices = @transform_2, window_bounds = array<i64: 1, 4>}, {pipeline_mode = #tpu.pipeline_mode<synchronous>, transform_indices = @transform_3, window_bounds = array<i64: 3, 3, 4, 4>}, {pipeline_mode = #tpu.pipeline_mode<synchronous>, transform_indices = @transform_4, window_bounds = array<i64: 1, 4>}, {pipeline_mode = #tpu.pipeline_mode<synchronous>, transform_indices = @transform_5, window_bounds = array<i64: 4, 16>}, {pipeline_mode = #tpu.pipeline_mode<synchronous>, transform_indices = @transform_6, window_bounds = array<i64: 1, 16>}, {transform_indices = @transform_7, window_bounds = array<i64: 1, 16, 16, 16>}]} {
    %c0 = arith.constant 0 : index
    %c0_0 = arith.constant 0 : index
    %c0_1 = arith.constant 0 : index
    %c0_2 = arith.constant 0 : index
    %0 = vector.load %arg1[%c0, %c0_0, %c0_1, %c0_2] : memref<1x16x16x16xbf16, #tpu.memory_space<vmem>>, vector<1x16x16x16xbf16>
    %1 = vector.shape_cast %0 : vector<1x16x16x16xbf16> to vector<256x16xbf16>
    %c0_3 = arith.constant 0 : index
    %c0_4 = arith.constant 0 : index
    %2 = vector.load %arg2[%c0_3, %c0_4] : memref<16x4xbf16, #tpu.memory_space<vmem>>, vector<16x4xbf16>
    %cst = arith.constant dense<0.000000e+00> : vector<256x4xf32>
    %3 = tpu.matmul %1, %2, %cst {dimension_numbers = #tpu.dot_dimension_numbers<[1], [0], [0], [1], [0, 0, 1, 1], [], []>} : vector<256x16xbf16>, vector<16x4xbf16>, vector<256x4xf32> -> vector<256x4xf32>
    %c0_5 = arith.constant 0 : index
    %c0_6 = arith.constant 0 : index
    %4 = vector.load %arg3[%c0_5, %c0_6] : memref<1x4xf32, #tpu.memory_space<vmem>>, vector<1x4xf32>
    %5 = vector.broadcast %4 : vector<1x4xf32> to vector<256x4xf32>
    %6 = arith.addf %3, %5 : vector<256x4xf32>
    %cst_7 = arith.constant 0.000000e+00 : f32
    %7 = vector.broadcast %cst_7 : f32 to vector<256x4xf32>
    %8 = arith.maximumf %6, %7 : vector<256x4xf32>
    %9 = vector.shape_cast %8 : vector<256x4xf32> to vector<16x16x4xf32>
    %10 = tpu.iota {dimensions = array<i32: 1>} : vector<16x16x4xi32>
    %c0_i32 = arith.constant 0 : i32
    %11 = vector.broadcast %c0_i32 : i32 to vector<16x16x4xi32>
    %12 = arith.cmpi eq, %10, %11 : vector<16x16x4xi32>
    %c15_i32 = arith.constant 15 : i32
    %13 = vector.broadcast %c15_i32 : i32 to vector<16x16x4xi32>
    %14 = arith.cmpi eq, %10, %13 : vector<16x16x4xi32>
    %15 = tpu.iota {dimensions = array<i32: 0>} : vector<16x16x4xi32>
    %c16_i32 = arith.constant 16 : i32
    %16 = vector.broadcast %c16_i32 : i32 to vector<16x16x4xi32>
    %17 = arith.remsi %15, %16 : vector<16x16x4xi32>
    %c0_i32_8 = arith.constant 0 : i32
    %18 = vector.broadcast %c0_i32_8 : i32 to vector<16x16x4xi32>
    %19 = arith.cmpi eq, %17, %18 : vector<16x16x4xi32>
    %c15_i32_9 = arith.constant 15 : i32
    %20 = vector.broadcast %c15_i32_9 : i32 to vector<16x16x4xi32>
    %21 = arith.cmpi eq, %17, %20 : vector<16x16x4xi32>
    %c1_i32 = arith.constant 1 : i32
    %22 = tpu.dynamic_rotate %9 by %c1_i32 dim 1 : vector<16x16x4xf32>, i32 -> vector<16x16x4xf32>
    %cst_10 = arith.constant 0.000000e+00 : f32
    %23 = vector.broadcast %cst_10 : f32 to vector<16x16x4xf32>
    %24 = arith.select %12, %23, %22 : vector<16x16x4xi1>, vector<16x16x4xf32>
    %25 = arith.truncf %24 : vector<16x16x4xf32> to vector<16x16x4xbf16>
    %26 = arith.truncf %9 : vector<16x16x4xf32> to vector<16x16x4xbf16>
    %c15_i32_11 = arith.constant 15 : i32
    %27 = tpu.dynamic_rotate %9 by %c15_i32_11 dim 1 : vector<16x16x4xf32>, i32 -> vector<16x16x4xf32>
    %cst_12 = arith.constant 0.000000e+00 : f32
    %28 = vector.broadcast %cst_12 : f32 to vector<16x16x4xf32>
    %29 = arith.select %14, %28, %27 : vector<16x16x4xi1>, vector<16x16x4xf32>
    %30 = arith.truncf %29 : vector<16x16x4xf32> to vector<16x16x4xbf16>
    %cst_13 = arith.constant 0.000000e+00 : f32
    %31 = vector.broadcast %cst_13 : f32 to vector<256x4xf32>
    %32 = vector.extract_strided_slice %25 {offsets = [15, 0, 0], sizes = [1, 16, 4], strides = [1, 1, 1]} : vector<16x16x4xbf16> to vector<1x16x4xbf16>
    %33 = vector.extract_strided_slice %25 {offsets = [0, 0, 0], sizes = [15, 16, 4], strides = [1, 1, 1]} : vector<16x16x4xbf16> to vector<15x16x4xbf16>
    %34 = tpu.concatenate %32, %33 in 0 : vector<1x16x4xbf16>, vector<15x16x4xbf16> -> vector<16x16x4xbf16>
    %cst_14 = arith.constant 0.000000e+00 : f32
    %35 = arith.truncf %cst_14 : f32 to bf16
    %36 = vector.broadcast %35 : bf16 to vector<16x16x4xbf16>
    %37 = arith.select %19, %36, %34 : vector<16x16x4xi1>, vector<16x16x4xbf16>
    %38 = vector.extract_strided_slice %25 {offsets = [1, 0, 0], sizes = [15, 16, 4], strides = [1, 1, 1]} : vector<16x16x4xbf16> to vector<15x16x4xbf16>
    %39 = vector.extract_strided_slice %25 {offsets = [0, 0, 0], sizes = [1, 16, 4], strides = [1, 1, 1]} : vector<16x16x4xbf16> to vector<1x16x4xbf16>
    %40 = tpu.concatenate %38, %39 in 0 : vector<15x16x4xbf16>, vector<1x16x4xbf16> -> vector<16x16x4xbf16>
    %cst_15 = arith.constant 0.000000e+00 : f32
    %41 = arith.truncf %cst_15 : f32 to bf16
    %42 = vector.broadcast %41 : bf16 to vector<16x16x4xbf16>
    %43 = arith.select %21, %42, %40 : vector<16x16x4xi1>, vector<16x16x4xbf16>
    %44 = vector.shape_cast %37 : vector<16x16x4xbf16> to vector<256x4xbf16>
    %c0_16 = arith.constant 0 : index
    %c0_17 = arith.constant 0 : index
    %c0_18 = arith.constant 0 : index
    %c0_19 = arith.constant 0 : index
    %45 = vector.load %arg4[%c0_16, %c0_17, %c0_18, %c0_19] : memref<3x3x4x4xbf16, #tpu.memory_space<vmem>>, vector<1x1x4x4xbf16>
    %46 = vector.shape_cast %45 : vector<1x1x4x4xbf16> to vector<4x4xbf16>
    %cst_20 = arith.constant dense<0.000000e+00> : vector<256x4xf32>
    %47 = tpu.matmul %44, %46, %cst_20 {dimension_numbers = #tpu.dot_dimension_numbers<[1], [0], [0], [1], [0, 0, 1, 1], [], []>} : vector<256x4xbf16>, vector<4x4xbf16>, vector<256x4xf32> -> vector<256x4xf32>
    %48 = arith.addf %31, %47 : vector<256x4xf32>
    %49 = vector.shape_cast %25 : vector<16x16x4xbf16> to vector<256x4xbf16>
    %c1 = arith.constant 1 : index
    %c0_21 = arith.constant 0 : index
    %c0_22 = arith.constant 0 : index
    %c0_23 = arith.constant 0 : index
    %50 = vector.load %arg4[%c1, %c0_21, %c0_22, %c0_23] : memref<3x3x4x4xbf16, #tpu.memory_space<vmem>>, vector<1x1x4x4xbf16>
    %51 = vector.shape_cast %50 : vector<1x1x4x4xbf16> to vector<4x4xbf16>
    %cst_24 = arith.constant dense<0.000000e+00> : vector<256x4xf32>
    %52 = tpu.matmul %49, %51, %cst_24 {dimension_numbers = #tpu.dot_dimension_numbers<[1], [0], [0], [1], [0, 0, 1, 1], [], []>} : vector<256x4xbf16>, vector<4x4xbf16>, vector<256x4xf32> -> vector<256x4xf32>
    %53 = arith.addf %48, %52 : vector<256x4xf32>
    %54 = vector.shape_cast %43 : vector<16x16x4xbf16> to vector<256x4xbf16>
    %c2 = arith.constant 2 : index
    %c0_25 = arith.constant 0 : index
    %c0_26 = arith.constant 0 : index
    %c0_27 = arith.constant 0 : index
    %55 = vector.load %arg4[%c2, %c0_25, %c0_26, %c0_27] : memref<3x3x4x4xbf16, #tpu.memory_space<vmem>>, vector<1x1x4x4xbf16>
    %56 = vector.shape_cast %55 : vector<1x1x4x4xbf16> to vector<4x4xbf16>
    %cst_28 = arith.constant dense<0.000000e+00> : vector<256x4xf32>
    %57 = tpu.matmul %54, %56, %cst_28 {dimension_numbers = #tpu.dot_dimension_numbers<[1], [0], [0], [1], [0, 0, 1, 1], [], []>} : vector<256x4xbf16>, vector<4x4xbf16>, vector<256x4xf32> -> vector<256x4xf32>
    %58 = arith.addf %53, %57 : vector<256x4xf32>
    %59 = vector.extract_strided_slice %26 {offsets = [15, 0, 0], sizes = [1, 16, 4], strides = [1, 1, 1]} : vector<16x16x4xbf16> to vector<1x16x4xbf16>
    %60 = vector.extract_strided_slice %26 {offsets = [0, 0, 0], sizes = [15, 16, 4], strides = [1, 1, 1]} : vector<16x16x4xbf16> to vector<15x16x4xbf16>
    %61 = tpu.concatenate %59, %60 in 0 : vector<1x16x4xbf16>, vector<15x16x4xbf16> -> vector<16x16x4xbf16>
    %cst_29 = arith.constant 0.000000e+00 : f32
    %62 = arith.truncf %cst_29 : f32 to bf16
    %63 = vector.broadcast %62 : bf16 to vector<16x16x4xbf16>
    %64 = arith.select %19, %63, %61 : vector<16x16x4xi1>, vector<16x16x4xbf16>
    %65 = vector.extract_strided_slice %26 {offsets = [1, 0, 0], sizes = [15, 16, 4], strides = [1, 1, 1]} : vector<16x16x4xbf16> to vector<15x16x4xbf16>
    %66 = vector.extract_strided_slice %26 {offsets = [0, 0, 0], sizes = [1, 16, 4], strides = [1, 1, 1]} : vector<16x16x4xbf16> to vector<1x16x4xbf16>
    %67 = tpu.concatenate %65, %66 in 0 : vector<15x16x4xbf16>, vector<1x16x4xbf16> -> vector<16x16x4xbf16>
    %cst_30 = arith.constant 0.000000e+00 : f32
    %68 = arith.truncf %cst_30 : f32 to bf16
    %69 = vector.broadcast %68 : bf16 to vector<16x16x4xbf16>
    %70 = arith.select %21, %69, %67 : vector<16x16x4xi1>, vector<16x16x4xbf16>
    %71 = vector.shape_cast %64 : vector<16x16x4xbf16> to vector<256x4xbf16>
    %c0_31 = arith.constant 0 : index
    %c1_32 = arith.constant 1 : index
    %c0_33 = arith.constant 0 : index
    %c0_34 = arith.constant 0 : index
    %72 = vector.load %arg4[%c0_31, %c1_32, %c0_33, %c0_34] : memref<3x3x4x4xbf16, #tpu.memory_space<vmem>>, vector<1x1x4x4xbf16>
    %73 = vector.shape_cast %72 : vector<1x1x4x4xbf16> to vector<4x4xbf16>
    %cst_35 = arith.constant dense<0.000000e+00> : vector<256x4xf32>
    %74 = tpu.matmul %71, %73, %cst_35 {dimension_numbers = #tpu.dot_dimension_numbers<[1], [0], [0], [1], [0, 0, 1, 1], [], []>} : vector<256x4xbf16>, vector<4x4xbf16>, vector<256x4xf32> -> vector<256x4xf32>
    %75 = arith.addf %58, %74 : vector<256x4xf32>
    %76 = vector.shape_cast %26 : vector<16x16x4xbf16> to vector<256x4xbf16>
    %c1_36 = arith.constant 1 : index
    %c1_37 = arith.constant 1 : index
    %c0_38 = arith.constant 0 : index
    %c0_39 = arith.constant 0 : index
    %77 = vector.load %arg4[%c1_36, %c1_37, %c0_38, %c0_39] : memref<3x3x4x4xbf16, #tpu.memory_space<vmem>>, vector<1x1x4x4xbf16>
    %78 = vector.shape_cast %77 : vector<1x1x4x4xbf16> to vector<4x4xbf16>
    %cst_40 = arith.constant dense<0.000000e+00> : vector<256x4xf32>
    %79 = tpu.matmul %76, %78, %cst_40 {dimension_numbers = #tpu.dot_dimension_numbers<[1], [0], [0], [1], [0, 0, 1, 1], [], []>} : vector<256x4xbf16>, vector<4x4xbf16>, vector<256x4xf32> -> vector<256x4xf32>
    %80 = arith.addf %75, %79 : vector<256x4xf32>
    %81 = vector.shape_cast %70 : vector<16x16x4xbf16> to vector<256x4xbf16>
    %c2_41 = arith.constant 2 : index
    %c1_42 = arith.constant 1 : index
    %c0_43 = arith.constant 0 : index
    %c0_44 = arith.constant 0 : index
    %82 = vector.load %arg4[%c2_41, %c1_42, %c0_43, %c0_44] : memref<3x3x4x4xbf16, #tpu.memory_space<vmem>>, vector<1x1x4x4xbf16>
    %83 = vector.shape_cast %82 : vector<1x1x4x4xbf16> to vector<4x4xbf16>
    %cst_45 = arith.constant dense<0.000000e+00> : vector<256x4xf32>
    %84 = tpu.matmul %81, %83, %cst_45 {dimension_numbers = #tpu.dot_dimension_numbers<[1], [0], [0], [1], [0, 0, 1, 1], [], []>} : vector<256x4xbf16>, vector<4x4xbf16>, vector<256x4xf32> -> vector<256x4xf32>
    %85 = arith.addf %80, %84 : vector<256x4xf32>
    %86 = vector.extract_strided_slice %30 {offsets = [15, 0, 0], sizes = [1, 16, 4], strides = [1, 1, 1]} : vector<16x16x4xbf16> to vector<1x16x4xbf16>
    %87 = vector.extract_strided_slice %30 {offsets = [0, 0, 0], sizes = [15, 16, 4], strides = [1, 1, 1]} : vector<16x16x4xbf16> to vector<15x16x4xbf16>
    %88 = tpu.concatenate %86, %87 in 0 : vector<1x16x4xbf16>, vector<15x16x4xbf16> -> vector<16x16x4xbf16>
    %cst_46 = arith.constant 0.000000e+00 : f32
    %89 = arith.truncf %cst_46 : f32 to bf16
    %90 = vector.broadcast %89 : bf16 to vector<16x16x4xbf16>
    %91 = arith.select %19, %90, %88 : vector<16x16x4xi1>, vector<16x16x4xbf16>
    %92 = vector.extract_strided_slice %30 {offsets = [1, 0, 0], sizes = [15, 16, 4], strides = [1, 1, 1]} : vector<16x16x4xbf16> to vector<15x16x4xbf16>
    %93 = vector.extract_strided_slice %30 {offsets = [0, 0, 0], sizes = [1, 16, 4], strides = [1, 1, 1]} : vector<16x16x4xbf16> to vector<1x16x4xbf16>
    %94 = tpu.concatenate %92, %93 in 0 : vector<15x16x4xbf16>, vector<1x16x4xbf16> -> vector<16x16x4xbf16>
    %cst_47 = arith.constant 0.000000e+00 : f32
    %95 = arith.truncf %cst_47 : f32 to bf16
    %96 = vector.broadcast %95 : bf16 to vector<16x16x4xbf16>
    %97 = arith.select %21, %96, %94 : vector<16x16x4xi1>, vector<16x16x4xbf16>
    %98 = vector.shape_cast %91 : vector<16x16x4xbf16> to vector<256x4xbf16>
    %c0_48 = arith.constant 0 : index
    %c2_49 = arith.constant 2 : index
    %c0_50 = arith.constant 0 : index
    %c0_51 = arith.constant 0 : index
    %99 = vector.load %arg4[%c0_48, %c2_49, %c0_50, %c0_51] : memref<3x3x4x4xbf16, #tpu.memory_space<vmem>>, vector<1x1x4x4xbf16>
    %100 = vector.shape_cast %99 : vector<1x1x4x4xbf16> to vector<4x4xbf16>
    %cst_52 = arith.constant dense<0.000000e+00> : vector<256x4xf32>
    %101 = tpu.matmul %98, %100, %cst_52 {dimension_numbers = #tpu.dot_dimension_numbers<[1], [0], [0], [1], [0, 0, 1, 1], [], []>} : vector<256x4xbf16>, vector<4x4xbf16>, vector<256x4xf32> -> vector<256x4xf32>
    %102 = arith.addf %85, %101 : vector<256x4xf32>
    %103 = vector.shape_cast %30 : vector<16x16x4xbf16> to vector<256x4xbf16>
    %c1_53 = arith.constant 1 : index
    %c2_54 = arith.constant 2 : index
    %c0_55 = arith.constant 0 : index
    %c0_56 = arith.constant 0 : index
    %104 = vector.load %arg4[%c1_53, %c2_54, %c0_55, %c0_56] : memref<3x3x4x4xbf16, #tpu.memory_space<vmem>>, vector<1x1x4x4xbf16>
    %105 = vector.shape_cast %104 : vector<1x1x4x4xbf16> to vector<4x4xbf16>
    %cst_57 = arith.constant dense<0.000000e+00> : vector<256x4xf32>
    %106 = tpu.matmul %103, %105, %cst_57 {dimension_numbers = #tpu.dot_dimension_numbers<[1], [0], [0], [1], [0, 0, 1, 1], [], []>} : vector<256x4xbf16>, vector<4x4xbf16>, vector<256x4xf32> -> vector<256x4xf32>
    %107 = arith.addf %102, %106 : vector<256x4xf32>
    %108 = vector.shape_cast %97 : vector<16x16x4xbf16> to vector<256x4xbf16>
    %c2_58 = arith.constant 2 : index
    %c2_59 = arith.constant 2 : index
    %c0_60 = arith.constant 0 : index
    %c0_61 = arith.constant 0 : index
    %109 = vector.load %arg4[%c2_58, %c2_59, %c0_60, %c0_61] : memref<3x3x4x4xbf16, #tpu.memory_space<vmem>>, vector<1x1x4x4xbf16>
    %110 = vector.shape_cast %109 : vector<1x1x4x4xbf16> to vector<4x4xbf16>
    %cst_62 = arith.constant dense<0.000000e+00> : vector<256x4xf32>
    %111 = tpu.matmul %108, %110, %cst_62 {dimension_numbers = #tpu.dot_dimension_numbers<[1], [0], [0], [1], [0, 0, 1, 1], [], []>} : vector<256x4xbf16>, vector<4x4xbf16>, vector<256x4xf32> -> vector<256x4xf32>
    %112 = arith.addf %107, %111 : vector<256x4xf32>
    %c0_63 = arith.constant 0 : index
    %c0_64 = arith.constant 0 : index
    %113 = vector.load %arg5[%c0_63, %c0_64] : memref<1x4xf32, #tpu.memory_space<vmem>>, vector<1x4xf32>
    %114 = vector.broadcast %113 : vector<1x4xf32> to vector<256x4xf32>
    %115 = arith.addf %112, %114 : vector<256x4xf32>
    %cst_65 = arith.constant 0.000000e+00 : f32
    %116 = vector.broadcast %cst_65 : f32 to vector<256x4xf32>
    %117 = arith.maximumf %115, %116 : vector<256x4xf32>
    %118 = arith.truncf %117 : vector<256x4xf32> to vector<256x4xbf16>
    %c0_66 = arith.constant 0 : index
    %c0_67 = arith.constant 0 : index
    %119 = vector.load %arg6[%c0_66, %c0_67] : memref<4x16xbf16, #tpu.memory_space<vmem>>, vector<4x16xbf16>
    %cst_68 = arith.constant dense<0.000000e+00> : vector<256x16xf32>
    %120 = tpu.matmul %118, %119, %cst_68 {dimension_numbers = #tpu.dot_dimension_numbers<[1], [0], [0], [1], [0, 0, 1, 1], [], []>} : vector<256x4xbf16>, vector<4x16xbf16>, vector<256x16xf32> -> vector<256x16xf32>
    %c0_69 = arith.constant 0 : index
    %c0_70 = arith.constant 0 : index
    %121 = vector.load %arg7[%c0_69, %c0_70] : memref<1x16xf32, #tpu.memory_space<vmem>>, vector<1x16xf32>
    %122 = vector.broadcast %121 : vector<1x16xf32> to vector<256x16xf32>
    %123 = arith.addf %120, %122 : vector<256x16xf32>
    %124 = arith.extf %1 : vector<256x16xbf16> to vector<256x16xf32>
    %125 = arith.addf %123, %124 : vector<256x16xf32>
    %cst_71 = arith.constant 0.000000e+00 : f32
    %126 = vector.broadcast %cst_71 : f32 to vector<256x16xf32>
    %127 = arith.maximumf %125, %126 : vector<256x16xf32>
    %128 = vector.shape_cast %127 : vector<256x16xf32> to vector<1x16x16x16xf32>
    %c0_72 = arith.constant 0 : index
    %c0_73 = arith.constant 0 : index
    %c0_74 = arith.constant 0 : index
    %c0_75 = arith.constant 0 : index
    %129 = vector.load %arg8[%c0_72, %c0_73, %c0_74, %c0_75] : memref<1x16x16x16xf32, #tpu.memory_space<vmem>>, vector<1x16x16x16xf32>
    tpu.vector_store %arg8[%c0_72, %c0_73, %c0_74, %c0_75], %128 {strides = array<i32>} : memref<1x16x16x16xf32, #tpu.memory_space<vmem>>, vector<1x16x16x16xf32>,
    return
  }
  func.func @transform_0(%arg0: i32) -> (i32, i32, i32, i32) {
    %c0_i32 = arith.constant 0 : i32
    %c0_i32_0 = arith.constant 0 : i32
    %c0_i32_1 = arith.constant 0 : i32
    %c0_i32_2 = arith.constant 0 : i32
    return %arg0, %c0_i32, %c0_i32_0, %c0_i32_1 : i32, i32, i32, i32
  }
  func.func @transform_1(%arg0: i32) -> (i32, i32) {
    %c0_i32 = arith.constant 0 : i32
    %c0_i32_0 = arith.constant 0 : i32
    %c0_i32_1 = arith.constant 0 : i32
    return %c0_i32, %c0_i32_0 : i32, i32
  }
  func.func @transform_2(%arg0: i32) -> (i32, i32) {
    %c0_i32 = arith.constant 0 : i32
    %c0_i32_0 = arith.constant 0 : i32
    %c0_i32_1 = arith.constant 0 : i32
    return %c0_i32, %c0_i32_0 : i32, i32
  }
  func.func @transform_3(%arg0: i32) -> (i32, i32, i32, i32) {
    %c0_i32 = arith.constant 0 : i32
    %c0_i32_0 = arith.constant 0 : i32
    %c0_i32_1 = arith.constant 0 : i32
    %c0_i32_2 = arith.constant 0 : i32
    %c0_i32_3 = arith.constant 0 : i32
    return %c0_i32, %c0_i32_0, %c0_i32_1, %c0_i32_2 : i32, i32, i32, i32
  }
  func.func @transform_4(%arg0: i32) -> (i32, i32) {
    %c0_i32 = arith.constant 0 : i32
    %c0_i32_0 = arith.constant 0 : i32
    %c0_i32_1 = arith.constant 0 : i32
    return %c0_i32, %c0_i32_0 : i32, i32
  }
  func.func @transform_5(%arg0: i32) -> (i32, i32) {
    %c0_i32 = arith.constant 0 : i32
    %c0_i32_0 = arith.constant 0 : i32
    %c0_i32_1 = arith.constant 0 : i32
    return %c0_i32, %c0_i32_0 : i32, i32
  }
  func.func @transform_6(%arg0: i32) -> (i32, i32) {
    %c0_i32 = arith.constant 0 : i32
    %c0_i32_0 = arith.constant 0 : i32
    %c0_i32_1 = arith.constant 0 : i32
    return %c0_i32, %c0_i32_0 : i32, i32
  }
  func.func @transform_7(%arg0: i32) -> (i32, i32, i32, i32) {
    %c0_i32 = arith.constant 0 : i32
    %c0_i32_0 = arith.constant 0 : i32
    %c0_i32_1 = arith.constant 0 : i32
    %c0_i32_2 = arith.constant 0 : i32
    return %arg0, %c0_i32, %c0_i32_0, %c0_i32_1 : i32, i32, i32, i32
  }
}

</mosaic_0001>

<bundles_post_ra>
// kernel: tpu_custom_call.1
= control target key start
LH: loop header
LB: loop body
LE: loop exit
PB: predicated region body
PF: predicated region fallthrough
CT: control target
= control target key end

     0   :  { %s5327_s0 = inlined_call_operand.hbm [shape: bf16[2,16,16,16], index: 0, kind: input, shape index: {}]   ;;  %s5328_s1 = inlined_call_operand.vmem [shape: bf16[16,4], index: 1, kind: input, shape index: {}]   ;;  %s5329_s2 = inlined_call_operand.vmem [shape: f32[1,4], index: 2, kind: input, shape index: {}]   ;;  %s5330_s3 = inlined_call_operand.hbm [shape: bf16[3,3,4,4], index: 3, kind: input, shape index: {}]   ;;  %s5331_s4 = inlined_call_operand.vmem [shape: f32[1,4], index: 4, kind: input, shape index: {}]   ;;  %s5332_s5 = inlined_call_operand.vmem [shape: bf16[4,16], index: 5, kind: input, shape index: {}]   ;;  %s5333_s6 = inlined_call_operand.vmem [shape: f32[1,16], index: 6, kind: input, shape index: {}]   ;;  %s5334_s7 = inlined_call_operand.hbm [shape: f32[2,16,16,16], index: 7, kind: output, shape index: {}]  }
   0x1   :  { %5350 = sst [smem:[#allocation62_spill]] %s5330_s3 }
   0x2   :  { %12 = vsyncpa [#allocation3], 0 }
   0x3   :  { %14 = vsyncpa [#allocation3 + $0x1], 0 }
   0x4   :  { %15 = vsyncpa [#allocation6], 0 }
   0x5   :  { %16 = vsyncpa [#allocation4], 0 }
   0x6   :  { %18 = vsyncpa [#allocation4 + $0x1], 0  ;;  %s3889_s24 = smov 0   ;;  %s3891_s25 = smov 0  }
   0x7   :  { %s3893_s26 = smov 0   ;;  %s3895_s27 = smov 0  }
   0x8 LB: > { %s3910_s28 = sadd.s32 4294967295, %s3839_s27   ;;  %s3359_s29 = sadd.s32 4294967294, %s3839_s27   ;;  %s3839_s27 = sphi %s3895_s27, %s5505_s27   ;;  %s3835_s26 = sphi %s3893_s26, %s5504_s26   ;;  %s3831_s25 = sphi %s3891_s25, %s5503_s25   ;;  %s3827_s24 = sphi %s3889_s24, %s5502_s24  }
   0x9   : > { %p44_p0 = scmp.ne.s32.totalorder %s3831_s25, %s3827_s24  ;;  %p45_p1 = scmp.eq.s32.totalorder %s3910_s28, 0 }
   0xa   : > { %p194_p2 = scmp.eq.s32.totalorder %s3910_s28, 1  ;;  %p200_p3 = scmp.eq.s32.totalorder %s3359_s29, 1 }
   0xb   : > { %p3919_p4 = por %p45_p1, %p44_p0  ;;  %p3360_p5 = scmp.ge.s32.totalorder %s3839_s27, 1 }
   0xc   : > { %p3924_p6 = por %p200_p3, %p44_p0  ;;  %p207_p7 = scmp.lt.s32.totalorder %s3839_s27, 3 }
   0xd   : > { %s5353_s3 = sld [smem:[#allocation62_spill]]  ;;  %s3841_s13 = smov [#allocation5]  }
   0xe   : > { %p3932_p8 = pnand %p3360_p5, %p207_p7  ;;  %s226_s14 = sshll.u32 %s3841_s13, 4  ;;  %s227_s14 = int_to_ptr.vmem [resolvable:$true] %s226_s14 }
   0xf   : > { %s3942_s15 = sadd.s32 1, %s3839_s27   ;;  %s3842_s16 = smov 32  }
  0x10   : > { %p3649_p9 = pneg %p3932_p8  ;;  %s3843_s17 = smov 2  }
  0x11   : > { %s28_s18 = ssub.s32 %s3839_s27, %s3942_s15  ;;  %s31_s19 = sadd.s32 1, %s3835_s26 }
  0x12   : > { %p3650_p10 = pnand %p3649_p9, %p45_p1  ;;  %p29_p12 = scmp.eq.s32.totalorder %s28_s18, 0 }
  0x13   : > { %s224_s11 = sshll.u32 %s5353_s3, 4  ;;  %p38_p13 = scmp.ne.s32.totalorder %s3835_s26, %s3831_s25  ;;  %s225_s11 = int_to_ptr.hbm [resolvable:$true] %s224_s11 }
  0x14   : > { %3652 = dma.hbm_to_vmem [thread:$0]  (!%p3650_p10), %s225_s11, 288, %s227_s14, [#allocation6], %s3842_s16, %s3842_s16, %s3843_s17  }
  0x15   : > { %p39_p0 = scmp.eq.s32.totalorder %s3839_s27, 0  ;;  %p3662_p3 = scmp.lt.s32.totalorder %s3839_s27, 2 }
  0x16   : > { %s3952_s20 = scalar_select %p29_p12, %s3835_s26, %s31_s19  }
  0x17   : > { %p40_p5 = por %p39_p0, %p38_p13  ;;  %p3956_p7 = por %p194_p2, %p38_p13 }
  0x18   : > { %s249_s22 = sand.u32 1, %s3835_s26   ;;  %s3619_s23 = sshll.u32 %s3839_s27, 7 }
  0x19   : > { %s3363_s29 = sshll.u32 %s249_s22, 7  ;;  %s258_s11 = scalar_lea.hbm %s5327_s0, %s3619_s23 }
  0x1a   : > { %s259_s13 = sshll.u32 %s258_s11, 4  ;;  %s253_s14 = scalar_lea.vmem [#allocation2], %s3363_s29  ;;  %s260_s13 = int_to_ptr.hbm [resolvable:$true] %s259_s13 }
  0x1b   : > { %s261_s16 = sshll.u32 %s253_s14, 4  ;;  %p3967_p9 = pnand %p3662_p3, %p40_p5  ;;  %s262_s16 = int_to_ptr.vmem [resolvable:$true] %s261_s16 }
  0x1c   : > { %s250_s18 = scalar_lea.sflag [#allocation3], %s249_s22  ;;  %s3739_s19 = sshra.s32 %s260_s13, 4  ;;  %s3740_s19 = int_to_ptr.hbm [resolvable:$true] %s3739_s19 }
  0x1d   : > { %s3741_s3 = scalar_lea.hbm %s3740_s19, 128  ;;  %p3743_p10 = pneg %p3967_p9 }
  0x1e   : > { %p3742_p2 = scmp.ne.s32.totalorder %s3740_s19, %s3741_s3  ;;  %s3746_s9 = scalar_lea.hbm %s5327_s0, 256 }
  0x1f   : > { %p3747_p0 = scmp.lt.s32.totalorder %s3740_s19, %s5327_s0  ;;  %p3748_p3 = scmp.lt.s32.totalorder %s3746_s9, %s3741_s3 }
  0x20   : > { %p3744_p12 = pnand %p3743_p10, %p3742_p2 }
  0x21   : > { %p3749_p5 = por %p3748_p3, %p3747_p0 }
  0x22   : > { %p3745_p13 = pneg %p3744_p12 }
  0x24   : > { %p3750_p11 = pnand %p3749_p5, %p3745_p13 }
  0x26   : > { %3753 = shalt.err (!%p3750_p11)
}
  0x27   : > { %s3844_s22 = smov 64   ;;  %s3845_s14 = smov 4  }
  0x28   : > { %3656 = dma.hbm_to_vmem [thread:$0]  (!%p3967_p9), %s260_s13, 2048, %s262_s16, %s250_s18, %s3844_s22, %s3844_s22, %s3845_s14  }
  0x29   : > { %273 = sbr.rel (%p3932_p8) target bundleno = 1242 (0x4da), region = 48 }
  0x2e   : > { %s3984_s23 = sand.u32 1, %s3831_s25  }
  0x2f   : > { %s3367_s29 = sshll.u32 %s3984_s23, 7  ;;  %s276_s19 = scalar_lea.sflag [#allocation3], %s3984_s23 }
  0x30   : > { %s3988_s3 = scalar_lea.vmem [#allocation2], %s3367_s29 }
  0x31   : > { %3814 = dma.done.wait (%p3919_p4), %s276_s19, 2048  }
  0x32   : > { %3816 = vsyncadd (%p3919_p4), %s276_s19, 4294965248 }
  0x33   : > { %3818 = dma.done.wait (%p45_p1), [#allocation6], 288  }
  0x34   : > { %3820 = vsyncadd (%p45_p1), [#allocation6], 4294967008  ;;  %v3636_v0 = vld [vmem:[%s5328_s1] sm:$0xff]  ;;  %vm441_vm0 = vcmask 130048   ;;  %v3621_v2 = vld [vmem:[%s3988_s3 + $0x8] sm:$0xff]  ;;  %vm1076_vm1 = vcmask 1041408   ;;  %v611_v23 = vlaneseq }
  0x35   : > { %v3620_v1 = vld [vmem:[%s3988_s3] sm:$0xff]  ;;  %497 = vmatpush.bf16.msra.mxu0 %v3636_v0  ;;  %3638 = vmatpush.bf16.msra.mxu3 %v3636_v0  ;;  %v3622_v3 = vld [vmem:[%s3988_s3 + $0x10] sm:$0xff]  ;;  %v3623_v4 = vld [vmem:[%s3988_s3 + $0x18] sm:$0xff]  ;;  %v3846_v13 = vmov 0   ;;  %vm1027_vm2 = vcmask 31744   ;;  %s3369_s19 = sshll.u32 %s3984_s23, 8 }
  0x36   : > { %v3632_v5 = vld [vmem:[%s3988_s3 + $0x60] sm:$0xff]  ;;  %v3633_v7 = vld [vmem:[%s3988_s3 + $0x68] sm:$0xff]  ;;  %v3634_v9 = vld [vmem:[%s3988_s3 + $0x70] sm:$0xff]  ;;  %v1201_v14 = vunpack.c.l.b16 %v3846_v13  ;;  %v4039_v25 = vshrl.u32 %v611_v23, 7  ;;  %s5144_s12 = scalar_lea.vmem [#allocation7], %s3369_s19  ;;  %s3637_s13 = sshll.u32 %s3910_s28, 8 }
  0x37   : > { %v3624_v6 = vld [vmem:[%s3988_s3 + $0x20] sm:$0xff]  ;;  %v3625_v8 = vld [vmem:[%s3988_s3 + $0x28] sm:$0xff]  ;;  %v3626_v10 = vld [vmem:[%s3988_s3 + $0x30] sm:$0xff]  ;;  %s3272_s17 = scalar_lea.hbm %s5334_s7, %s3637_s13  ;;  %s3261_s28 = scalar_lea.sflag [#allocation4], %s3984_s23 }
  0x38   : > { %3438 = vmatmul.msk.bf16.vlgmr.msra.gmra.mxu0 %vm441_vm0, %v3620_v1  ;;  %3450 = vmatmul.msk.bf16.vlgmr.msra.gmra.mxu3 %vm441_vm0, %v3632_v5  ;;  %v944_v11 = vld [vmem:[#allocation5] sm:$0x3]  ;;  %v4022_v15 = vpack.c.b16 %v1201_v14, %v1201_v14  ;;  %v3635_v16 = vld [vmem:[%s3988_s3 + $0x78] sm:$0xff]  ;;  %v946_v18 = vld [vmem:[#allocation5 + $0x6] sm:$0x3]  ;;  %v4042_v28 = vadd.s32 8, %v4039_v25 }
  0x39   : > { %v1298_v12 = vsel %vm1076_vm1, %v944_v11, 0  ;;  %v3627_v17 = vld [vmem:[%s3988_s3 + $0x38] sm:$0xff]  ;;  %v1078_v19 = vsel %vm1076_vm1, %v946_v18, 0  ;;  %v4034_v20 = vld [vmem:[%s5329_s2] ss:$0 sm:$0xff]  ;;  %vm650_vm4 = vcmp.lt.s32.totalorder %v4039_v25, 1 }
  0x3a   : > { %1307 = vmatpush.bf16.msra.mxu2 %v1298_v12  ;;  %5357 = vst [vmem:[#allocation11_spill] sm:$0xff] %v4022_v15  ;;  %1087 = vmatpush.bf16.msra.mxu1 %v1078_v19  ;;  %v3628_v21 = vld [vmem:[%s3988_s3 + $0x40] sm:$0xff]  ;;  %vm617_vm3 = vcmp.eq.s32.totalorder %v4042_v28, 15  ;;  %vm811_vm5 = vcmp.lt.s32.totalorder %v4039_v25, 7  ;;  %vm614_vm6 = vcmp.eq.s32.totalorder %v4039_v25, 0  ;;  %v3629_v41 = vld [vmem:[%s3988_s3 + $0x48] sm:$0xff] }
  0x3b   : > { %3639 = vmatpush.bf16.msrb.mxu3 %v1078_v19  ;;  %s3275_s18 = sshll.u32 %s3272_s17, 4  ;;  %s3789_s14 = scalar_lea.hbm %s5334_s7, 512  ;;  %s3276_s18 = int_to_ptr.hbm [resolvable:$true] %s3275_s18 }
  0x3c   : > { %s3783_s9 = sshra.s32 %s3276_s18, 4  ;;  %s3784_s9 = int_to_ptr.hbm [resolvable:$true] %s3783_s9 }
  0x3d   : > { %3470 = vmatmul.msk.bf16.vlgmr.msra.gmra.mxu2 %vm1027_vm2, %v4022_v15  ;;  %s3785_s10 = scalar_lea.hbm %s3784_s9, 256  ;;  %p3790_p11 = scmp.lt.s32.totalorder %s3784_s9, %s5334_s7 }
  0x3e   : > { %p3786_p1 = scmp.ne.s32.totalorder %s3784_s9, %s3785_s10  ;;  %p3791_p9 = scmp.lt.s32.totalorder %s3789_s14, %s3785_s10 }
  0x3f   : > { %3640 = vmatpush.bf16.msra.mxu3 %v1298_v12 }
  0x40   : > { %p3787_p4 = pnand %p3786_p1, %p3956_p7  ;;  %p3792_p2 = por %p3791_p9, %p3790_p11 }
  0x42   : > { %p3788_p8 = pneg %p3787_p4 }
  0x44   : > { %p3793_p10 = pnand %p3792_p2, %p3788_p8 }
  0x48   : > { %3439 = vmatmul.msk.bf16.gmra.mxu0 %vm441_vm0, %v3621_v2  ;;  %3451 = vmatmul.msk.bf16.gmra.mxu3 %vm441_vm0, %v3633_v7  ;;  %v3630_v7 = vld [vmem:[%s3988_s3 + $0x50] sm:$0xff] }
  0x58   : > { %3440 = vmatmul.msk.bf16.gmra.mxu0 %vm441_vm0, %v3622_v3  ;;  %3452 = vmatmul.msk.bf16.gmra.mxu3 %vm441_vm0, %v3634_v9 }
  0x68   : > { %3441 = vmatmul.msk.bf16.gmra.mxu0 %vm441_vm0, %v3623_v4  ;;  %3453 = vmatmul.msk.bf16.gmra.mxu3 %vm441_vm0, %v3635_v16 }
  0x78   : > { %3442 = vmatmul.msk.bf16.gmra.mxu0 %vm441_vm0, %v3624_v6 }
  0x88   : > { %3443 = vmatmul.msk.bf16.gmra.mxu0 %vm441_vm0, %v3625_v8 }
  0x98   : > { %3444 = vmatmul.msk.bf16.gmra.mxu0 %vm441_vm0, %v3626_v10  ;;  %v1568_v10 = vld [vmem:[#allocation5 + $0x2] sm:$0x3] }
  0x99   : > { %v1698_v16 = vsel %vm1076_vm1, %v1568_v10, 0 }
  0x9a   : > { %1707 = vmatpush.bf16.msrb.mxu0 %v1698_v16 }
  0xa8   : > { %3445 = vmatmul.msk.bf16.gmra.mxu0 %vm441_vm0, %v3627_v17 }
  0xb5   : > { %v499_v22 = vpop.f32.mrf.mxu0 }
  0xb6   : > { %v500_v24 = vadd.f32 %v4034_v20, %v499_v22 }
  0xb8   : > { %3446 = vmatmul.msk.bf16.gmra.mxu0 %vm441_vm0, %v3628_v21  ;;  %v579_v26 = vmax.f32 %v500_v24, 0.0 }
  0xba   : > { %v747_v30 = vpack.c.bf16 %v579_v26, %v579_v26  ;;  %v618_v32 = vrot.slane %v579_v26, 7  ;;  %v779_v33 = vrot.slane %v579_v26, 1 }
  0xbc   : > { %v1603_v37 = vunpack.c.l.b16 %v747_v30 }
  0xbd   : > { %v501_v27 = vpop.f32.mrf.mxu0 }
  0xbe   : > { %v502_v29 = vadd.f32 %v4034_v20, %v501_v27 }
  0xc0   : > { %v580_v31 = vmax.f32 %v502_v29, 0.0 }
  0xc2   : > { %v634_v34 = vrot.slane %v580_v31, 7  ;;  %v748_v35 = vpack.c.bf16 %v580_v31, %v580_v31  ;;  %v795_v36 = vrot.slane %v580_v31, 1 }
  0xc4   : > { %v812_v38 = vsel %vm811_vm5, %v779_v33, %v795_v36  ;;  %v828_v39 = vsel %vm811_vm5, %v795_v36, %v779_v33  ;;  %v1604_v40 = vunpack.c.l.b16 %v748_v35  ;;  %v651_v42 = vsel %vm650_vm4, %v618_v32, %v634_v34 }
  0xc5   : > { %v845_v43 = vsel %vm617_vm3, 0.0, %v828_v39  ;;  %v876_v44 = vpack.c.bf16 %v812_v38, %v812_v38  ;;  %v504_v45 = vpop.f32.mrf.mxu0  ;;  %v667_v46 = vsel %vm650_vm4, %v634_v34, %v618_v32  ;;  %v716_v47 = vpack.c.bf16 %v651_v42, %v651_v42 }
  0xc6   : > { %v877_v48 = vpack.c.bf16 %v845_v43, %v845_v43  ;;  %v683_v49 = vsel %vm614_vm6, 0.0, %v667_v46  ;;  %v4062_v50 = vpack.c.b16 %v1604_v40, %v1603_v37  ;;  %v505_v52 = vadd.f32 %v4034_v20, %v504_v45  ;;  %v3631_v45 = vld [vmem:[%s3988_s3 + $0x58] sm:$0xff] }
  0xc7   : > { %v2289_v51 = vunpack.c.l.b16 %v876_v44  ;;  %v715_v53 = vpack.c.bf16 %v683_v49, %v683_v49  ;;  %v980_v54 = vunpack.c.l.b16 %v716_v47 }
  0xc8   : > { %v2290_v55 = vunpack.c.l.b16 %v877_v48  ;;  %3447 = vmatmul.msk.bf16.gmra.mxu0 %vm441_vm0, %v3629_v41  ;;  %v581_v58 = vmax.f32 %v505_v52, 0.0 }
  0xc9   : > { %v979_v56 = vunpack.c.l.b16 %v715_v53 }
  0xca   : > { %v4066_v57 = vpack.c.b16 %v2290_v55, %v2289_v51  ;;  %v749_v62 = vpack.c.bf16 %v581_v58, %v581_v58  ;;  %v619_v0 = vrot.slane %v581_v58, 7  ;;  %v780_v1 = vrot.slane %v581_v58, 1 }
  0xcb   : > { %v1011_v59 = vpack.c.b16 %v980_v54, %v979_v56 }
  0xcc   : > { %5358 = vst [vmem:[#allocation12_spill] sm:$0xff] %v4066_v57  ;;  %v1605_v5 = vunpack.c.l.b16 %v749_v62 }
  0xcd   : > { %3454 = vmatmul.msk.bf16.vlgmr.msra.gmra.mxu1 %vm1027_vm2, %v1011_v59  ;;  %3471 = vmatmul.msk.bf16.gmra.mxu2 %vm1027_vm2, %v1011_v59  ;;  %v506_v60 = vpop.f32.mrf.mxu0 }
  0xce   : > { %v507_v61 = vadd.f32 %v4034_v20, %v506_v60 }
  0xd0   : > { %v582_v63 = vmax.f32 %v507_v61, 0.0 }
  0xd2   : > { %v635_v2 = vrot.slane %v582_v63, 7  ;;  %v750_v3 = vpack.c.bf16 %v582_v63, %v582_v63  ;;  %v796_v4 = vrot.slane %v582_v63, 1 }
  0xd4   : > { %v1606_v6 = vunpack.c.l.b16 %v750_v3  ;;  %v652_v8 = vsel %vm650_vm4, %v619_v0, %v635_v2  ;;  %v668_v9 = vsel %vm650_vm4, %v635_v2, %v619_v0  ;;  %v813_v11 = vsel %vm811_vm5, %v780_v1, %v796_v4 }
  0xd5   : > { %v509_v12 = vpop.f32.mrf.mxu0  ;;  %v685_v13 = vsel %vm614_vm6, 0.0, %v668_v9  ;;  %v718_v14 = vpack.c.bf16 %v652_v8, %v652_v8  ;;  %v829_v17 = vsel %vm811_vm5, %v796_v4, %v780_v1  ;;  %v878_v24 = vpack.c.bf16 %v813_v11, %v813_v11  ;;  %v1822_v4 = vld [vmem:[#allocation5 + $0x8] sm:$0x3] }
  0xd6   : > { %v717_v18 = vpack.c.bf16 %v685_v13, %v685_v13  ;;  %v4083_v19 = vpack.c.b16 %v1606_v6, %v1605_v5  ;;  %v847_v21 = vsel %vm617_vm3, 0.0, %v829_v17  ;;  %v510_v22 = vadd.f32 %v4034_v20, %v509_v12 }
  0xd7   : > { %v982_v23 = vunpack.c.l.b16 %v718_v14  ;;  %v879_v26 = vpack.c.bf16 %v847_v21, %v847_v21  ;;  %v2291_v29 = vunpack.c.l.b16 %v878_v24  ;;  %v1952_v6 = vsel %vm1076_vm1, %v1822_v4, 0 }
  0xd8   : > { %3448 = vmatmul.msk.bf16.gmra.mxu0 %vm441_vm0, %v3630_v7  ;;  %v981_v27 = vunpack.c.l.b16 %v717_v18  ;;  %v583_v32 = vmax.f32 %v510_v22, 0.0  ;;  %1961 = vmatpush.bf16.msrb.mxu1 %v1952_v6  ;;  %v559_v22 = vpop.f32.mrf.mxu3 }
  0xd9   : > { %v2292_v30 = vunpack.c.l.b16 %v879_v26 }
  0xda   : > { %v4089_v31 = vpack.c.b16 %v982_v23, %v981_v27  ;;  %v751_v36 = vpack.c.bf16 %v583_v32, %v583_v32  ;;  %v620_v38 = vrot.slane %v583_v32, 7  ;;  %v781_v39 = vrot.slane %v583_v32, 1 }
  0xdb   : > { %v4091_v33 = vpack.c.b16 %v2292_v30, %v2291_v29 }
  0xdc   : > { %v1607_v43 = vunpack.c.l.b16 %v751_v36 }
  0xdd   : > { %3455 = vmatmul.msk.bf16.gmra.mxu1 %vm1027_vm2, %v4089_v31  ;;  %3472 = vmatmul.msk.bf16.gmra.mxu2 %vm1027_vm2, %v4089_v31  ;;  %v511_v34 = vpop.f32.mrf.mxu0 }
  0xde   : > { %v512_v35 = vadd.f32 %v4034_v20, %v511_v34 }
  0xe0   : > { %v584_v37 = vmax.f32 %v512_v35, 0.0 }
  0xe2   : > { %v636_v40 = vrot.slane %v584_v37, 7  ;;  %v752_v41 = vpack.c.bf16 %v584_v37, %v584_v37  ;;  %v797_v42 = vrot.slane %v584_v37, 1 }
  0xe4   : > { %v1608_v44 = vunpack.c.l.b16 %v752_v41  ;;  %v653_v46 = vsel %vm650_vm4, %v620_v38, %v636_v40  ;;  %v669_v47 = vsel %vm650_vm4, %v636_v40, %v620_v38  ;;  %v814_v48 = vsel %vm811_vm5, %v781_v39, %v797_v42 }
  0xe5   : > { %v514_v49 = vpop.f32.mrf.mxu0  ;;  %v687_v51 = vsel %vm614_vm6, 0.0, %v669_v47  ;;  %v720_v52 = vpack.c.bf16 %v653_v46, %v653_v46  ;;  %v830_v53 = vsel %vm811_vm5, %v797_v42, %v781_v39  ;;  %v880_v54 = vpack.c.bf16 %v814_v48, %v814_v48 }
  0xe6   : > { %v719_v55 = vpack.c.bf16 %v687_v51, %v687_v51  ;;  %v4109_v56 = vpack.c.b16 %v1608_v44, %v1607_v43  ;;  %v849_v58 = vsel %vm617_vm3, 0.0, %v830_v53  ;;  %v515_v59 = vadd.f32 %v4034_v20, %v514_v49 }
  0xe7   : > { %v984_v60 = vunpack.c.l.b16 %v720_v52  ;;  %v881_v61 = vpack.c.bf16 %v849_v58, %v849_v58  ;;  %v2293_v62 = vunpack.c.l.b16 %v880_v54  ;;  %v560_v39 = vadd.f32 %v4034_v20, %v559_v22 }
  0xe8   : > { %3449 = vmatmul.msk.bf16.gmra.mxu0 %vm441_vm0, %v3631_v45  ;;  %v983_v63 = vunpack.c.l.b16 %v719_v55  ;;  %v585_v2 = vmax.f32 %v515_v59, 0.0  ;;  %v561_v45 = vpop.f32.mrf.mxu3 }
  0xe9   : > { %v2294_v0 = vunpack.c.l.b16 %v881_v61  ;;  %v4145_v44 = vmax.f32 %v560_v39, 0.0  ;;  %v562_v48 = vadd.f32 %v4034_v20, %v561_v45 }
  0xea   : > { %v4115_v1 = vpack.c.b16 %v984_v60, %v983_v63  ;;  %v753_v8 = vpack.c.bf16 %v585_v2, %v585_v2  ;;  %v621_v10 = vrot.slane %v585_v2, 7  ;;  %v782_v11 = vrot.slane %v585_v2, 1 }
  0xeb   : > { %v4117_v3 = vpack.c.b16 %v2294_v0, %v2293_v62  ;;  %v4155_v52 = vmax.f32 %v562_v48, 0.0  ;;  %v630_v54 = vrot.slane %v4145_v44, 7  ;;  %v771_v63 = vpack.c.bf16 %v4145_v44, %v4145_v44 }
  0xec   : > { %v1609_v16 = vunpack.c.l.b16 %v753_v8 }
  0xed   : > { %3456 = vmatmul.msk.bf16.gmra.mxu1 %vm1027_vm2, %v4115_v1  ;;  %3473 = vmatmul.msk.bf16.gmra.mxu2 %vm1027_vm2, %v4115_v1  ;;  %v516_v5 = vpop.f32.mrf.mxu0  ;;  %v646_v58 = vrot.slane %v4155_v52, 7 }
  0xee   : > { %v517_v7 = vadd.f32 %v4034_v20, %v516_v5 }
  0xef   : > { %v679_v6 = vsel %vm650_vm4, %v646_v58, %v630_v54 }
  0xf0   : > { %v586_v9 = vmax.f32 %v517_v7, 0.0  ;;  %v564_v5 = vpop.f32.mrf.mxu3 }
  0xf2   : > { %v637_v12 = vrot.slane %v586_v9, 7  ;;  %v754_v13 = vpack.c.bf16 %v586_v9, %v586_v9  ;;  %v798_v14 = vrot.slane %v586_v9, 1 }
  0xf4   : > { %v1610_v17 = vunpack.c.l.b16 %v754_v13  ;;  %v654_v18 = vsel %vm650_vm4, %v621_v10, %v637_v12  ;;  %v670_v21 = vsel %vm650_vm4, %v637_v12, %v621_v10  ;;  %v815_v23 = vsel %vm811_vm5, %v782_v11, %v798_v14 }
  0xf5   : > { %v519_v24 = vpop.f32.mrf.mxu0  ;;  %v689_v26 = vsel %vm614_vm6, 0.0, %v670_v21  ;;  %v722_v27 = vpack.c.bf16 %v654_v18, %v654_v18  ;;  %v831_v29 = vsel %vm811_vm5, %v798_v14, %v782_v11  ;;  %v882_v36 = vpack.c.bf16 %v815_v23, %v815_v23 }
  0xf6   : > { %v721_v30 = vpack.c.bf16 %v689_v26, %v689_v26  ;;  %v4135_v32 = vpack.c.b16 %v1610_v17, %v1609_v16  ;;  %v851_v34 = vsel %vm617_vm3, 0.0, %v831_v29  ;;  %v520_v40 = vadd.f32 %v4034_v20, %v519_v24 }
  0xf7   : > { %v986_v35 = vunpack.c.l.b16 %v722_v27  ;;  %v883_v37 = vpack.c.bf16 %v851_v34, %v851_v34  ;;  %v2295_v41 = vunpack.c.l.b16 %v882_v36  ;;  %v663_v11 = vsel %vm650_vm4, %v630_v54, %v646_v58 }
  0xf8   : > { %3502 = vmatmul.msk.bf16.vlgmr.msrb.gmra.mxu0 %vm1027_vm2, %v4022_v15  ;;  %v985_v38 = vunpack.c.l.b16 %v721_v30  ;;  %v587_v46 = vmax.f32 %v520_v40, 0.0  ;;  %v707_v14 = vsel %vm614_vm6, 0.0, %v679_v6  ;;  %v740_v16 = vpack.c.bf16 %v663_v11, %v663_v11 }
  0xf9   : > { %v2296_v43 = vunpack.c.l.b16 %v883_v37  ;;  %v772_v18 = vpack.c.bf16 %v4155_v52, %v4155_v52  ;;  %v739_v21 = vpack.c.bf16 %v707_v14, %v707_v14  ;;  %v565_v24 = vadd.f32 %v4034_v20, %v564_v5 }
  0xfa   : > { %v4143_v42 = vpack.c.b16 %v986_v35, %v985_v38  ;;  %v755_v55 = vpack.c.bf16 %v587_v46, %v587_v46  ;;  %v622_v59 = vrot.slane %v587_v46, 7  ;;  %v783_v12 = vrot.slane %v587_v46, 1 }
  0xfb   : > { %v4152_v49 = vpack.c.b16 %v2296_v43, %v2295_v41  ;;  %v1004_v26 = vunpack.c.l.b16 %v740_v16  ;;  %v1003_v30 = vunpack.c.l.b16 %v739_v21  ;;  %v1627_v35 = vunpack.c.l.b16 %v771_v63  ;;  %v566_v41 = vpop.f32.mrf.mxu3 }
  0xfc   : > { %v1611_v7 = vunpack.c.l.b16 %v755_v55  ;;  %v1628_v36 = vunpack.c.l.b16 %v772_v18  ;;  %v4189_v40 = vmax.f32 %v565_v24, 0.0  ;;  %v791_v54 = vrot.slane %v4145_v44, 1 }
  0xfd   : > { %3457 = vmatmul.msk.bf16.gmra.mxu1 %vm1027_vm2, %v4143_v42  ;;  %3474 = vmatmul.msk.bf16.gmra.mxu2 %vm1027_vm2, %v4143_v42  ;;  %v521_v47 = vpop.f32.mrf.mxu0  ;;  %v4185_v37 = vpack.c.b16 %v1004_v26, %v1003_v30  ;;  %v807_v55 = vrot.slane %v4155_v52, 1 }
  0xfe   : > { %v522_v51 = vadd.f32 %v4034_v20, %v521_v47  ;;  %v567_v47 = vadd.f32 %v4034_v20, %v566_v41 }
  0xff   : > { %3466 = vmatmul.msk.bf16.vlgmr.msrb.gmra.mxu3 %vm1027_vm2, %v4185_v37  ;;  %v840_v52 = vsel %vm811_vm5, %v807_v55, %v791_v54 }
 0x100   : > { %v588_v53 = vmax.f32 %v522_v51, 0.0  ;;  %v4203_v58 = vmax.f32 %v567_v47, 0.0  ;;  %v869_v47 = vsel %vm617_vm3, 0.0, %v840_v52 }
 0x102   : > { %v638_v60 = vrot.slane %v588_v53, 7  ;;  %v756_v61 = vpack.c.bf16 %v588_v53, %v588_v53  ;;  %v799_v62 = vrot.slane %v588_v53, 1  ;;  %v774_v30 = vpack.c.bf16 %v4203_v58, %v4203_v58 }
 0x104   : > { %v1612_v0 = vunpack.c.l.b16 %v756_v61  ;;  %v655_v2 = vsel %vm650_vm4, %v622_v59, %v638_v60  ;;  %v671_v4 = vsel %vm650_vm4, %v638_v60, %v622_v59  ;;  %v816_v27 = vsel %vm811_vm5, %v783_v12, %v799_v62 }
 0x105   : > { %v524_v8 = vpop.f32.mrf.mxu0  ;;  %v691_v9 = vsel %vm614_vm6, 0.0, %v671_v4  ;;  %v724_v10 = vpack.c.bf16 %v655_v2, %v655_v2  ;;  %v832_v38 = vsel %vm811_vm5, %v799_v62, %v783_v12  ;;  %v884_v39 = vpack.c.bf16 %v816_v27, %v816_v27  ;;  %v569_v12 = vpop.f32.mrf.mxu3 }
 0x106   : > { %v723_v13 = vpack.c.bf16 %v691_v9, %v691_v9  ;;  %v4175_v22 = vpack.c.b16 %v1612_v0, %v1611_v7  ;;  %v525_v29 = vadd.f32 %v4034_v20, %v524_v8  ;;  %v853_v43 = vsel %vm617_vm3, 0.0, %v832_v38 }
 0x107   : > { %v988_v17 = vunpack.c.l.b16 %v724_v10  ;;  %v885_v48 = vpack.c.bf16 %v853_v43, %v853_v43  ;;  %v2297_v51 = vunpack.c.l.b16 %v884_v39  ;;  %v4205_v59 = vpack.c.b16 %v1628_v36, %v1627_v35 }
 0x108   : > { %3503 = vmatmul.msk.bf16.gmra.mxu0 %vm1027_vm2, %v4062_v50  ;;  %v987_v23 = vunpack.c.l.b16 %v723_v13  ;;  %v589_v45 = vmax.f32 %v525_v29, 0.0  ;;  %v631_v62 = vrot.slane %v4189_v40, 7  ;;  %v647_v0 = vrot.slane %v4203_v58, 7 }
 0x109   : > { %v2298_v60 = vunpack.c.l.b16 %v885_v48  ;;  %v773_v7 = vpack.c.bf16 %v4189_v40, %v4189_v40  ;;  %v824_v8 = vsel %vm811_vm5, %v791_v54, %v807_v55  ;;  %v570_v39 = vadd.f32 %v4034_v20, %v569_v12 }
 0x10a   : > { %v4183_v34 = vpack.c.b16 %v988_v17, %v987_v23  ;;  %v757_v63 = vpack.c.bf16 %v589_v45, %v589_v45  ;;  %v623_v4 = vrot.slane %v589_v45, 7  ;;  %v680_v13 = vsel %vm650_vm4, %v647_v0, %v631_v62 }
 0x10b   : > { %v4209_v2 = vpack.c.b16 %v2298_v60, %v2297_v51  ;;  %v664_v21 = vsel %vm650_vm4, %v631_v62, %v647_v0  ;;  %v784_v23 = vrot.slane %v589_v45, 1  ;;  %v709_v26 = vsel %vm614_vm6, 0.0, %v680_v13 }
 0x10c   : > { %v1613_v14 = vunpack.c.l.b16 %v757_v63  ;;  %v742_v27 = vpack.c.bf16 %v664_v21, %v664_v21  ;;  %v741_v35 = vpack.c.bf16 %v709_v26, %v709_v26  ;;  %v792_v51 = vrot.slane %v4189_v40, 1 }
 0x10d   : > { %3458 = vmatmul.msk.bf16.gmra.mxu1 %vm1027_vm2, %v4183_v34  ;;  %3475 = vmatmul.msk.bf16.gmra.mxu2 %vm1027_vm2, %v4183_v34  ;;  %v526_v46 = vpop.f32.mrf.mxu0  ;;  %5359 = vst [vmem:[#allocation13_spill] sm:$0xff] %v4209_v2  ;;  %v1630_v54 = vunpack.c.l.b16 %v774_v30  ;;  %v4248_v62 = vmax.f32 %v570_v39, 0.0  ;;  %v571_v63 = vpop.f32.mrf.mxu3 }
 0x10e   : > { %v527_v53 = vadd.f32 %v4034_v20, %v526_v46  ;;  %v1006_v41 = vunpack.c.l.b16 %v742_v27  ;;  %v1005_v46 = vunpack.c.l.b16 %v741_v35  ;;  %v572_v52 = vadd.f32 %v4034_v20, %v571_v63 }
 0x110   : > { %v590_v61 = vmax.f32 %v527_v53, 0.0  ;;  %v1629_v53 = vunpack.c.l.b16 %v773_v7  ;;  %v4244_v55 = vpack.c.b16 %v1006_v41, %v1005_v46  ;;  %v4261_v12 = vmax.f32 %v572_v52, 0.0 }
 0x112   : > { %v639_v44 = vrot.slane %v590_v61, 7  ;;  %v758_v5 = vpack.c.bf16 %v590_v61, %v590_v61  ;;  %v800_v6 = vrot.slane %v590_v61, 1  ;;  %3467 = vmatmul.msk.bf16.gmra.mxu3 %vm1027_vm2, %v4244_v55  ;;  %v4263_v13 = vpack.c.b16 %v1630_v54, %v1629_v53 }
 0x114   : > { %v1614_v9 = vunpack.c.l.b16 %v758_v5  ;;  %v656_v10 = vsel %vm650_vm4, %v623_v4, %v639_v44  ;;  %v672_v11 = vsel %vm650_vm4, %v639_v44, %v623_v4  ;;  %v817_v43 = vsel %vm811_vm5, %v784_v23, %v800_v6 }
 0x115   : > { %v529_v16 = vpop.f32.mrf.mxu0  ;;  %v693_v17 = vsel %vm614_vm6, 0.0, %v672_v11  ;;  %v726_v18 = vpack.c.bf16 %v656_v10, %v656_v10  ;;  %v833_v60 = vsel %vm811_vm5, %v800_v6, %v784_v23  ;;  %v886_v61 = vpack.c.bf16 %v817_v43, %v817_v43  ;;  %v574_v46 = vpop.f32.mrf.mxu3 }
 0x116   : > { %v725_v24 = vpack.c.bf16 %v693_v17, %v693_v17  ;;  %v4231_v36 = vpack.c.b16 %v1614_v9, %v1613_v14  ;;  %v530_v45 = vadd.f32 %v4034_v20, %v529_v16  ;;  %v855_v0 = vsel %vm617_vm3, 0.0, %v833_v60 }
 0x117   : > { %v990_v29 = vunpack.c.l.b16 %v726_v18  ;;  %v900_v4 = vpack.c.bf16 %v824_v8, %v824_v8  ;;  %v901_v44 = vpack.c.bf16 %v869_v47, %v869_v47  ;;  %v887_v6 = vpack.c.bf16 %v855_v0, %v855_v0 }
 0x118   : > { %3504 = vmatmul.msk.bf16.gmra.mxu0 %vm1027_vm2, %v4083_v19  ;;  %v989_v38 = vunpack.c.l.b16 %v725_v24  ;;  %v591_v5 = vmax.f32 %v530_v45, 0.0  ;;  %v2299_v7 = vunpack.c.l.b16 %v886_v61  ;;  %v808_v10 = vrot.slane %v4203_v58, 1 }
 0x119   : > { %v2313_v8 = vunpack.c.l.b16 %v900_v4  ;;  %v2314_v11 = vunpack.c.l.b16 %v901_v44  ;;  %v2300_v14 = vunpack.c.l.b16 %v887_v6  ;;  %v632_v17 = vrot.slane %v4248_v62, 7 }
 0x11a   : > { %v4241_v48 = vpack.c.b16 %v990_v29, %v989_v38  ;;  %v759_v21 = vpack.c.bf16 %v591_v5, %v591_v5  ;;  %v648_v23 = vrot.slane %v4261_v12, 7  ;;  %v624_v58 = vrot.slane %v591_v5, 7 }
 0x11b   : > { %v4266_v18 = vpack.c.b16 %v2314_v11, %v2313_v8  ;;  %v4269_v24 = vpack.c.b16 %v2300_v14, %v2299_v7  ;;  %v841_v29 = vsel %vm811_vm5, %v808_v10, %v792_v51  ;;  %v785_v30 = vrot.slane %v591_v5, 1 }
 0x11c   : > { %v775_v38 = vpack.c.bf16 %v4248_v62, %v4248_v62  ;;  %v825_v39 = vsel %vm811_vm5, %v792_v51, %v808_v10  ;;  %v681_v47 = vsel %vm650_vm4, %v648_v23, %v632_v17  ;;  %v1615_v53 = vunpack.c.l.b16 %v759_v21 }
 0x11d   : > { %3459 = vmatmul.msk.bf16.gmra.mxu1 %vm1027_vm2, %v4241_v48  ;;  %3476 = vmatmul.msk.bf16.gmra.mxu2 %vm1027_vm2, %v4241_v48  ;;  %v531_v40 = vpop.f32.mrf.mxu0  ;;  %5360 = vst [vmem:[#allocation14_spill] sm:$0xff] %v4266_v18  ;;  %v665_v51 = vsel %vm650_vm4, %v632_v17, %v648_v23  ;;  %v776_v0 = vpack.c.bf16 %v4261_v12, %v4261_v12  ;;  %v711_v4 = vsel %vm614_vm6, 0.0, %v681_v47  ;;  %v871_v14 = vsel %vm617_vm3, 0.0, %v841_v29 }
 0x11e   : > { %v532_v9 = vadd.f32 %v4034_v20, %v531_v40  ;;  %v744_v44 = vpack.c.bf16 %v665_v51, %v665_v51  ;;  %v743_v52 = vpack.c.bf16 %v711_v4, %v711_v4  ;;  %v1631_v17 = vunpack.c.l.b16 %v775_v38 }
 0x11f   : > { %v1632_v21 = vunpack.c.l.b16 %v776_v0  ;;  %v903_v47 = vpack.c.bf16 %v871_v14, %v871_v14  ;;  %v793_v38 = vrot.slane %v4248_v62, 1 }
 0x120   : > { %v592_v16 = vmax.f32 %v532_v9, 0.0  ;;  %v575_v9 = vadd.f32 %v4034_v20, %v574_v46  ;;  %v1008_v10 = vunpack.c.l.b16 %v744_v44  ;;  %v1007_v11 = vunpack.c.l.b16 %v743_v52 }
 0x121   : > { %v902_v46 = vpack.c.bf16 %v825_v39, %v825_v39  ;;  %v4323_v0 = vpack.c.b16 %v1632_v21, %v1631_v17 }
 0x122   : > { %v640_v26 = vrot.slane %v592_v16, 7  ;;  %v760_v27 = vpack.c.bf16 %v592_v16, %v592_v16  ;;  %v801_v35 = vrot.slane %v592_v16, 1 }
 0x123   : > { %v2315_v39 = vunpack.c.l.b16 %v902_v46 }
 0x124   : > { %v1616_v41 = vunpack.c.l.b16 %v760_v27  ;;  %v657_v43 = vsel %vm650_vm4, %v624_v58, %v640_v26  ;;  %v673_v45 = vsel %vm650_vm4, %v640_v26, %v624_v58  ;;  %v818_v8 = vsel %vm811_vm5, %v785_v30, %v801_v35 }
 0x125   : > { %v534_v54 = vpop.f32.mrf.mxu0  ;;  %v695_v60 = vsel %vm614_vm6, 0.0, %v673_v45  ;;  %v728_v61 = vpack.c.bf16 %v657_v43, %v657_v43  ;;  %v4303_v58 = vpack.c.b16 %v1008_v10, %v1007_v11  ;;  %v834_v26 = vsel %vm811_vm5, %v801_v35, %v785_v30  ;;  %v576_v43 = vpop.f32.mrf.mxu3 }
 0x126   : > { %v727_v63 = vpack.c.bf16 %v695_v60, %v695_v60  ;;  %v535_v5 = vadd.f32 %v4034_v20, %v534_v54  ;;  %v4292_v6 = vpack.c.b16 %v1616_v41, %v1615_v53  ;;  %v888_v27 = vpack.c.bf16 %v818_v8, %v818_v8 }
 0x127   : > { %v992_v40 = vunpack.c.l.b16 %v728_v61  ;;  %v4307_v41 = vmax.f32 %v575_v9, 0.0  ;;  %v857_v45 = vsel %vm617_vm3, 0.0, %v834_v26  ;;  %v577_v30 = vadd.f32 %v4034_v20, %v576_v43  ;;  %3468 = vmatmul.msk.bf16.gmra.mxu3 %vm1027_vm2, %v4303_v58 }
 0x128   : > { %3505 = vmatmul.msk.bf16.gmra.mxu0 %vm1027_vm2, %v4109_v56  ;;  %v991_v7 = vunpack.c.l.b16 %v727_v63  ;;  %v593_v23 = vmax.f32 %v535_v5, 0.0  ;;  %v889_v35 = vpack.c.bf16 %v857_v45, %v857_v45  ;;  %v2301_v53 = vunpack.c.l.b16 %v888_v27 }
 0x129   : > { %v809_v60 = vrot.slane %v4261_v12, 1  ;;  %v2316_v61 = vunpack.c.l.b16 %v903_v47  ;;  %v4321_v63 = vmax.f32 %v577_v30, 0.0  ;;  %v633_v44 = vrot.slane %v4307_v41, 7 }
 0x12a   : > { %v4301_v16 = vpack.c.b16 %v992_v40, %v991_v7  ;;  %v761_v51 = vpack.c.bf16 %v593_v23, %v593_v23  ;;  %v2302_v4 = vunpack.c.l.b16 %v889_v35  ;;  %v625_v40 = vrot.slane %v593_v23, 7 }
 0x12b   : > { %v4326_v5 = vpack.c.b16 %v2316_v61, %v2315_v39  ;;  %v649_v52 = vrot.slane %v4321_v63, 7  ;;  %v786_v7 = vrot.slane %v593_v23, 1  ;;  %v842_v8 = vsel %vm811_vm5, %v809_v60, %v793_v38 }
 0x12c   : > { %v4329_v12 = vpack.c.b16 %v2302_v4, %v2301_v53  ;;  %v1617_v11 = vunpack.c.l.b16 %v761_v51  ;;  %v826_v17 = vsel %vm811_vm5, %v793_v38, %v809_v60  ;;  %v873_v21 = vsel %vm617_vm3, 0.0, %v842_v8 }
 0x12d   : > { %3460 = vmatmul.msk.bf16.gmra.mxu1 %vm1027_vm2, %v4301_v16  ;;  %3477 = vmatmul.msk.bf16.gmra.mxu2 %vm1027_vm2, %v4301_v16  ;;  %v536_v29 = vpop.f32.mrf.mxu0  ;;  %5361 = vst [vmem:[#allocation15_spill] sm:$0xff] %v4326_v5  ;;  %v682_v43 = vsel %vm650_vm4, %v649_v52, %v633_v44 }
 0x12e   : > { %v537_v54 = vadd.f32 %v4034_v20, %v536_v29  ;;  %v666_v29 = vsel %vm650_vm4, %v633_v44, %v649_v52  ;;  %v713_v38 = vsel %vm614_vm6, 0.0, %v682_v43 }
 0x12f   : > { %v745_v53 = vpack.c.bf16 %v713_v38, %v713_v38  ;;  %v810_v38 = vrot.slane %v4321_v63, 1 }
 0x130   : > { %v594_v62 = vmax.f32 %v537_v54, 0.0  ;;  %v746_v54 = vpack.c.bf16 %v666_v29, %v666_v29  ;;  %v794_v29 = vrot.slane %v4307_v41, 1 }
 0x132   : > { %v641_v9 = vrot.slane %v594_v62, 7  ;;  %v762_v10 = vpack.c.bf16 %v594_v62, %v594_v62  ;;  %v802_v14 = vrot.slane %v594_v62, 1  ;;  %v1009_v62 = vunpack.c.l.b16 %v745_v53 }
 0x133   : > { %v1010_v44 = vunpack.c.l.b16 %v746_v54 }
 0x134   : > { %v1618_v26 = vunpack.c.l.b16 %v762_v10  ;;  %v658_v27 = vsel %vm650_vm4, %v625_v40, %v641_v9  ;;  %v674_v23 = vsel %vm650_vm4, %v641_v9, %v625_v40  ;;  %v819_v61 = vsel %vm811_vm5, %v786_v7, %v802_v14 }
 0x135   : > { %v539_v45 = vpop.f32.mrf.mxu0  ;;  %v697_v46 = vsel %vm614_vm6, 0.0, %v674_v23  ;;  %v730_v47 = vpack.c.bf16 %v658_v27, %v658_v27  ;;  %v835_v51 = vsel %vm811_vm5, %v802_v14, %v786_v7  ;;  %v890_v52 = vpack.c.bf16 %v819_v61, %v819_v61  ;;  %v1309_v14 = vpop.f32.mrf.mxu2 }
 0x136   : > { %v540_v30 = vadd.f32 %v4034_v20, %v539_v45  ;;  %v729_v35 = vpack.c.bf16 %v697_v46, %v697_v46  ;;  %v4350_v39 = vpack.c.b16 %v1618_v26, %v1617_v11  ;;  %v859_v40 = vsel %vm617_vm3, 0.0, %v835_v51 }
 0x137   : > { %v994_v60 = vunpack.c.l.b16 %v730_v47  ;;  %v904_v9 = vpack.c.bf16 %v826_v17, %v826_v17  ;;  %v905_v10 = vpack.c.bf16 %v873_v21, %v873_v21  ;;  %v4362_v26 = vpack.c.b16 %v1010_v44, %v1009_v62 }
 0x138   : > { %3506 = vmatmul.msk.bf16.gmra.mxu0 %vm1027_vm2, %v4135_v32  ;;  %v993_v4 = vunpack.c.l.b16 %v729_v35  ;;  %v595_v8 = vmax.f32 %v540_v30, 0.0  ;;  %v891_v27 = vpack.c.bf16 %v859_v40, %v859_v40  ;;  %v2303_v23 = vunpack.c.l.b16 %v890_v52 }
 0x139   : > { %5362 = vst [vmem:[#allocation16_spill] sm:$0xff] %v4362_v26  ;;  %v2317_v7 = vunpack.c.l.b16 %v904_v9  ;;  %v2318_v43 = vunpack.c.l.b16 %v905_v10  ;;  %v777_v17 = vpack.c.bf16 %v4307_v41, %v4307_v41  ;;  %v778_v21 = vpack.c.bf16 %v4321_v63, %v4321_v63  ;;  %3469 = vmatmul.msk.bf16.gmra.mxu3 %vm1027_vm2, %v4362_v26 }
 0x13a   : > { %v4360_v11 = vpack.c.b16 %v994_v60, %v993_v4  ;;  %v2304_v46 = vunpack.c.l.b16 %v891_v27  ;;  %v763_v35 = vpack.c.bf16 %v595_v8, %v595_v8  ;;  %v626_v60 = vrot.slane %v595_v8, 7 }
 0x13b   : > { %v4377_v30 = vpack.c.b16 %v2318_v43, %v2317_v7  ;;  %v787_v61 = vrot.slane %v595_v8, 1  ;;  %v1885_v51 = vunpack.c.l.b16 %v777_v17  ;;  %v1886_v4 = vunpack.c.l.b16 %v778_v21 }
 0x13c   : > { %v4379_v53 = vpack.c.b16 %v2304_v46, %v2303_v23  ;;  %v843_v41 = vsel %vm811_vm5, %v810_v38, %v794_v29  ;;  %v1619_v63 = vunpack.c.l.b16 %v763_v35  ;;  %v827_v52 = vsel %vm811_vm5, %v794_v29, %v810_v38 }
 0x13d   : > { %3461 = vmatmul.msk.bf16.gmra.mxu1 %vm1027_vm2, %v4360_v11  ;;  %3478 = vmatmul.msk.bf16.gmra.mxu2 %vm1027_vm2, %v4360_v11  ;;  %v541_v45 = vpop.f32.mrf.mxu0  ;;  %5363 = vst [vmem:[#allocation17_spill] sm:$0xff] %v4377_v30  ;;  %v875_v9 = vsel %vm617_vm3, 0.0, %v843_v41  ;;  %v4395_v17 = vpack.c.b16 %v1886_v4, %v1885_v51 }
 0x13e   : > { %v542_v47 = vadd.f32 %v4034_v20, %v541_v45  ;;  %5364 = vst [vmem:[#allocation18_spill] sm:$0xff] %v4379_v53  ;;  %v907_v4 = vpack.c.bf16 %v875_v9, %v875_v9 }
 0x140   : > { %v596_v54 = vmax.f32 %v542_v47, 0.0  ;;  %v1311_v47 = vpop.f32.mrf.mxu2 }
 0x142   : > { %v642_v62 = vrot.slane %v596_v54, 7  ;;  %v764_v44 = vpack.c.bf16 %v596_v54, %v596_v54  ;;  %v803_v40 = vrot.slane %v596_v54, 1 }
 0x144   : > { %v1620_v10 = vunpack.c.l.b16 %v764_v44  ;;  %v659_v27 = vsel %vm650_vm4, %v626_v60, %v642_v62  ;;  %v675_v8 = vsel %vm650_vm4, %v642_v62, %v626_v60  ;;  %v820_v23 = vsel %vm811_vm5, %v787_v61, %v803_v40 }
 0x145   : > { %v544_v7 = vpop.f32.mrf.mxu0  ;;  %v699_v43 = vsel %vm614_vm6, 0.0, %v675_v8  ;;  %v732_v45 = vpack.c.bf16 %v659_v27, %v659_v27  ;;  %v836_v21 = vsel %vm811_vm5, %v803_v40, %v787_v61  ;;  %v892_v60 = vpack.c.bf16 %v820_v23, %v820_v23 }
 0x146   : > { %v545_v46 = vadd.f32 %v4034_v20, %v544_v7  ;;  %v731_v29 = vpack.c.bf16 %v699_v43, %v699_v43  ;;  %v4400_v38 = vpack.c.b16 %v1620_v10, %v1619_v63  ;;  %v861_v35 = vsel %vm617_vm3, 0.0, %v836_v21 }
 0x147   : > { %v996_v54 = vunpack.c.l.b16 %v732_v45  ;;  %v893_v62 = vpack.c.bf16 %v861_v35, %v861_v35  ;;  %v906_v44 = vpack.c.bf16 %v827_v52, %v827_v52  ;;  %v2305_v41 = vunpack.c.l.b16 %v892_v60 }
 0x148   : > { %3507 = vmatmul.msk.bf16.gmra.mxu0 %vm1027_vm2, %v4175_v22  ;;  %v995_v51 = vunpack.c.l.b16 %v731_v29  ;;  %v597_v63 = vmax.f32 %v545_v46, 0.0  ;;  %v2572_v43 = vunpack.c.l.b16 %v907_v4 }
 0x149   : > { %v2306_v61 = vunpack.c.l.b16 %v893_v62  ;;  %v2571_v40 = vunpack.c.l.b16 %v906_v44 }
 0x14a   : > { %v1089_v27 = vpop.f32.mrf.mxu1  ;;  %v4406_v8 = vpack.c.b16 %v996_v54, %v995_v51  ;;  %v765_v45 = vpack.c.bf16 %v597_v63, %v597_v63  ;;  %v627_v46 = vrot.slane %v597_v63, 7 }
 0x14b   : > { %v4408_v10 = vadd.f32 %v1309_v14, %v1089_v27  ;;  %v4410_v7 = vpack.c.b16 %v2306_v61, %v2305_v41  ;;  %v4416_v9 = vpack.c.b16 %v2572_v43, %v2571_v40  ;;  %v788_v14 = vrot.slane %v597_v63, 1 }
 0x14c   : > { %v1621_v44 = vunpack.c.l.b16 %v765_v45 }
 0x14d   : > { %5365 = vst [vmem:[#allocation19_spill] sm:$0xff] %v4410_v7  ;;  %3462 = vmatmul.msk.bf16.gmra.mxu1 %vm1027_vm2, %v4406_v8  ;;  %3479 = vmatmul.msk.bf16.gmra.mxu2 %vm1027_vm2, %v4406_v8  ;;  %v546_v52 = vpop.f32.mrf.mxu0 }
 0x14e   : > { %5366 = vst [vmem:[#allocation20_spill] sm:$0xff] %v4416_v9  ;;  %v547_v23 = vadd.f32 %v4034_v20, %v546_v52 }
 0x150   : > { %v598_v21 = vmax.f32 %v547_v23, 0.0  ;;  %v1314_v29 = vpop.f32.mrf.mxu2 }
 0x152   : > { %v643_v35 = vrot.slane %v598_v21, 7  ;;  %v766_v54 = vpack.c.bf16 %v598_v21, %v598_v21  ;;  %v804_v60 = vrot.slane %v598_v21, 1  ;;  %v1091_v62 = vpop.f32.mrf.mxu1 }
 0x153   : > { %v4419_v51 = vadd.f32 %v1311_v47, %v1091_v62 }
 0x154   : > { %v1622_v4 = vunpack.c.l.b16 %v766_v54  ;;  %v660_v41 = vsel %vm650_vm4, %v627_v46, %v643_v35  ;;  %v676_v61 = vsel %vm650_vm4, %v643_v35, %v627_v46  ;;  %v821_v40 = vsel %vm811_vm5, %v788_v14, %v804_v60 }
 0x155   : > { %v549_v27 = vpop.f32.mrf.mxu0  ;;  %v701_v63 = vsel %vm614_vm6, 0.0, %v676_v61  ;;  %v734_v43 = vpack.c.bf16 %v660_v41, %v660_v41  ;;  %v837_v52 = vsel %vm811_vm5, %v804_v60, %v788_v14  ;;  %v894_v47 = vpack.c.bf16 %v821_v40, %v821_v40  ;;  %v2076_v61 = vld [vmem:[#allocation5 + $0xe] sm:$0x3] }
 0x156   : > { %v733_v23 = vpack.c.bf16 %v701_v63, %v701_v63  ;;  %v4431_v45 = vpack.c.b16 %v1622_v4, %v1621_v44  ;;  %v863_v21 = vsel %vm617_vm3, 0.0, %v837_v52  ;;  %v550_v46 = vadd.f32 %v4034_v20, %v549_v27  ;;  %v1390_v52 = vld [vmem:[#allocation5 + $0xc] sm:$0x3] }
 0x157   : > { %v998_v35 = vunpack.c.l.b16 %v734_v43  ;;  %v895_v54 = vpack.c.bf16 %v863_v21, %v863_v21  ;;  %v2307_v62 = vunpack.c.l.b16 %v894_v47  ;;  %v2094_v14 = vsel %vm1076_vm1, %v2076_v61, 0 }
 0x158   : > { %v1316_v9 = vpop.f32.mrf.mxu2  ;;  %3508 = vmatmul.msk.bf16.gmra.mxu0 %vm1027_vm2, %v4231_v36  ;;  %v997_v41 = vunpack.c.l.b16 %v733_v23  ;;  %2103 = vmatpush.bf16.msrb.mxu2 %v2094_v14  ;;  %v599_v4 = vmax.f32 %v550_v46, 0.0  ;;  %v1408_v23 = vsel %vm1076_vm1, %v1390_v52, 0 }
 0x159   : > { %v2308_v60 = vunpack.c.l.b16 %v895_v54  ;;  %1417 = vmatpush.bf16.msrb.mxu3 %v1408_v23 }
 0x15a   : > { %v1094_v40 = vpop.f32.mrf.mxu1  ;;  %v4439_v44 = vpack.c.b16 %v998_v35, %v997_v41  ;;  %v767_v21 = vpack.c.bf16 %v599_v4, %v599_v4  ;;  %v789_v54 = vrot.slane %v599_v4, 1 }
 0x15b   : > { %v4441_v63 = vadd.f32 %v1314_v29, %v1094_v40  ;;  %v4443_v27 = vpack.c.b16 %v2308_v60, %v2307_v62  ;;  %v628_v29 = vrot.slane %v599_v4, 7 }
 0x15c   : > { %v1623_v60 = vunpack.c.l.b16 %v767_v21 }
 0x15d   : > { %5367 = vst [vmem:[#allocation21_spill] sm:$0xff] %v4443_v27  ;;  %3463 = vmatmul.msk.bf16.gmra.mxu1 %vm1027_vm2, %v4439_v44  ;;  %3480 = vmatmul.msk.bf16.gmra.mxu2 %vm1027_vm2, %v4439_v44  ;;  %v551_v43 = vpop.f32.mrf.mxu0 }
 0x15e   : > { %v552_v47 = vadd.f32 %v4034_v20, %v551_v43 }
 0x160   : > { %v600_v35 = vmax.f32 %v552_v47, 0.0  ;;  %v1319_v46 = vpop.f32.mrf.mxu2 }
 0x162   : > { %v644_v62 = vrot.slane %v600_v35, 7  ;;  %v768_v41 = vpack.c.bf16 %v600_v35, %v600_v35  ;;  %v805_v61 = vrot.slane %v600_v35, 1  ;;  %v1096_v14 = vpop.f32.mrf.mxu1 }
 0x163   : > { %v4451_v40 = vadd.f32 %v1316_v9, %v1096_v14 }
 0x164   : > { %v1624_v30 = vunpack.c.l.b16 %v768_v41  ;;  %v661_v5 = vsel %vm650_vm4, %v628_v29, %v644_v62  ;;  %v677_v20 = vsel %vm650_vm4, %v644_v62, %v628_v29  ;;  %v822_v43 = vsel %vm811_vm5, %v789_v54, %v805_v61  ;;  %v3708_v29 = vld [vmem:[%s5329_s2] ss:$0 sm:$0xff] }
 0x165   : > { %v554_v52 = vpop.f32.mrf.mxu0  ;;  %v703_v4 = vsel %vm614_vm6, 0.0, %v677_v20  ;;  %v736_v47 = vpack.c.bf16 %v661_v5, %v661_v5  ;;  %v838_v23 = vsel %vm811_vm5, %v805_v61, %v789_v54  ;;  %v896_v9 = vpack.c.bf16 %v822_v43, %v822_v43 }
 0x166   : > { %v735_v21 = vpack.c.bf16 %v703_v4, %v703_v4  ;;  %v4463_v35 = vpack.c.b16 %v1624_v30, %v1623_v60  ;;  %v865_v41 = vsel %vm617_vm3, 0.0, %v838_v23  ;;  %v555_v62 = vadd.f32 %v3708_v29, %v554_v52 }
 0x167   : > { %v1000_v14 = vunpack.c.l.b16 %v736_v47  ;;  %v897_v18 = vpack.c.bf16 %v865_v41, %v865_v41  ;;  %v2309_v26 = vunpack.c.l.b16 %v896_v9 }
 0x168   : > { %v1321_v20 = vpop.f32.mrf.mxu2  ;;  %3509 = vmatmul.msk.bf16.gmra.mxu0 %vm1027_vm2, %v4292_v6  ;;  %v999_v5 = vunpack.c.l.b16 %v735_v21  ;;  %v601_v60 = vmax.f32 %v555_v62, 0.0 }
 0x169   : > { %v2310_v54 = vunpack.c.l.b16 %v897_v18 }
 0x16a   : > { %v1099_v61 = vpop.f32.mrf.mxu1  ;;  %v4472_v30 = vpack.c.b16 %v1000_v14, %v999_v5  ;;  %v769_v23 = vpack.c.bf16 %v601_v60, %v601_v60  ;;  %v629_v18 = vrot.slane %v601_v60, 7  ;;  %v790_v41 = vrot.slane %v601_v60, 1 }
 0x16b   : > { %v4474_v43 = vadd.f32 %v1319_v46, %v1099_v61  ;;  %v4476_v4 = vpack.c.b16 %v2310_v54, %v2309_v26 }
 0x16c   : > { %v1625_v61 = vunpack.c.l.b16 %v769_v23 }
 0x16d   : > { %5368 = vst [vmem:[#allocation22_spill] sm:$0xff] %v4476_v4  ;;  %3464 = vmatmul.msk.bf16.gmra.mxu1 %vm1027_vm2, %v4472_v30  ;;  %3481 = vmatmul.msk.bf16.gmra.mxu2 %vm1027_vm2, %v4472_v30  ;;  %v556_v52 = vpop.f32.mrf.mxu0 }
 0x16e   : > { %v557_v47 = vadd.f32 %v3708_v29, %v556_v52 }
 0x170   : > { %v602_v9 = vmax.f32 %v557_v47, 0.0  ;;  %v1324_v21 = vpop.f32.mrf.mxu2 }
 0x172   : > { %v645_v14 = vrot.slane %v602_v9, 7  ;;  %v770_v5 = vpack.c.bf16 %v602_v9, %v602_v9  ;;  %v806_v62 = vrot.slane %v602_v9, 1  ;;  %v1101_v46 = vpop.f32.mrf.mxu1 }
 0x173   : > { %v4482_v26 = vadd.f32 %v1321_v20, %v1101_v46 }
 0x174   : > { %v1626_v54 = vunpack.c.l.b16 %v770_v5  ;;  %v662_v4 = vsel %vm650_vm4, %v629_v18, %v645_v14  ;;  %v678_v27 = vsel %vm650_vm4, %v645_v14, %v629_v18  ;;  %v823_v29 = vsel %vm811_vm5, %v790_v41, %v806_v62 }
 0x175   : > { %5369 = vst [vmem:[#allocation23_spill] sm:$0xff] %v4482_v26  ;;  %v4490_v52 = vpop.f32.mrf.mxu0  ;;  %v705_v60 = vsel %vm614_vm6, 0.0, %v678_v27  ;;  %v738_v47 = vpack.c.bf16 %v662_v4, %v662_v4  ;;  %v839_v20 = vsel %vm811_vm5, %v806_v62, %v790_v41  ;;  %v898_v23 = vpack.c.bf16 %v823_v29, %v823_v29 }
 0x176   : > { %v737_v9 = vpack.c.bf16 %v705_v60, %v705_v60  ;;  %v4496_v5 = vpack.c.b16 %v1626_v54, %v1625_v61  ;;  %v867_v46 = vsel %vm617_vm3, 0.0, %v839_v20 }
 0x177   : > { %v1002_v18 = vunpack.c.l.b16 %v738_v47  ;;  %v899_v14 = vpack.c.bf16 %v867_v46, %v867_v46  ;;  %v2311_v7 = vunpack.c.l.b16 %v898_v23 }
 0x178   : > { %v1326_v15 = vpop.f32.mrf.mxu2  ;;  %3510 = vmatmul.msk.bf16.gmra.mxu0 %vm1027_vm2, %v4350_v39  ;;  %v1001_v53 = vunpack.c.l.b16 %v737_v9 }
 0x179   : > { %v2312_v27 = vunpack.c.l.b16 %v899_v14  ;;  %v2254_v14 = vld [vmem:[#allocation5 + $0x4] sm:$0x3] }
 0x17a   : > { %v1104_v4 = vpop.f32.mrf.mxu1  ;;  %v4502_v26 = vpack.c.b16 %v1002_v18, %v1001_v53 }
 0x17b   : > { %v4504_v25 = vadd.f32 %v1324_v21, %v1104_v4  ;;  %v4506_v41 = vpack.c.b16 %v2312_v27, %v2311_v7  ;;  %v2384_v27 = vsel %vm1076_vm1, %v2254_v14, 0 }
 0x17c   : > { %3482 = vmatmul.msk.bf16.vlgmr.msra.gmra.mxu3 %vm1027_vm2, %v4502_v26 }
 0x17d   : > { %5370 = vst [vmem:[#allocation24_spill] sm:$0xff] %v4506_v41  ;;  %3465 = vmatmul.msk.bf16.gmra.mxu1 %vm1027_vm2, %v4502_v26  ;;  %3534 = vmatmul.msk.bf16.vlgmr.msrb.gmra.mxu2 %vm1027_vm2, %v4083_v19  ;;  %v4514_v28 = vpop.f32.mrf.mxu0 }
 0x17e   : > { %2393 = vmatpush.bf16.msra.mxu3 %v2384_v27 }
 0x180   : > { %v1329_v62 = vpop.f32.mrf.mxu2 }
 0x182   : > { %v1106_v61 = vpop.f32.mrf.mxu1 }
 0x183   : > { %v4516_v54 = vadd.f32 %v1326_v15, %v1106_v61 }
 0x185   : > { %v4518_v53 = vpop.f32.mrf.mxu0 }
 0x188   : > { %v1331_v21 = vpop.f32.mrf.mxu2  ;;  %3511 = vmatmul.msk.bf16.gmra.mxu0 %vm1027_vm2, %v4400_v38 }
 0x18a   : > { %v1109_v7 = vpop.f32.mrf.mxu1 }
 0x18b   : > { %v4522_v29 = vadd.f32 %v1329_v62, %v1109_v7 }
 0x18c   : > { %3483 = vmatmul.msk.bf16.gmra.mxu3 %vm1027_vm2, %v4185_v37 }
 0x18d   : > { %3518 = vmatmul.msk.bf16.vlgmr.msrb.gmra.mxu1 %vm1027_vm2, %v4062_v50  ;;  %3535 = vmatmul.msk.bf16.gmra.mxu2 %vm1027_vm2, %v4109_v56  ;;  %v4530_v15 = vpop.f32.mrf.mxu0 }
 0x190   : > { %v1334_v60 = vpop.f32.mrf.mxu2 }
 0x192   : > { %v1111_v47 = vpop.f32.mrf.mxu1 }
 0x193   : > { %v4532_v20 = vadd.f32 %v1331_v21, %v1111_v47  ;;  %v2508_v21 = vld [vmem:[#allocation5 + $0xa] sm:$0x3] }
 0x194   : > { %v2638_v7 = vsel %vm1076_vm1, %v2508_v21, 0  ;;  %v4567_v21 = vpop.f32.mrf.mxu3 }
 0x195   : > { %v4534_v23 = vpop.f32.mrf.mxu0  ;;  %2647 = vmatpush.bf16.msra.mxu0 %v2638_v7  ;;  %5372 = vst [vmem:[#allocation26_spill] sm:$0xff] %v4567_v21 }
 0x198   : > { %v1336_v9 = vpop.f32.mrf.mxu2  ;;  %3512 = vmatmul.msk.bf16.gmra.mxu0 %vm1027_vm2, %v4431_v45 }
 0x19a   : > { %v1114_v46 = vpop.f32.mrf.mxu1 }
 0x19b   : > { %v4538_v18 = vadd.f32 %v1334_v60, %v1114_v46 }
 0x19c   : > { %3484 = vmatmul.msk.bf16.gmra.mxu3 %vm1027_vm2, %v4244_v55  ;;  %v4575_v41 = vpop.f32.mrf.mxu3 }
 0x19d   : > { %3519 = vmatmul.msk.bf16.gmra.mxu1 %vm1027_vm2, %v4083_v19  ;;  %3536 = vmatmul.msk.bf16.gmra.mxu2 %vm1027_vm2, %v4135_v32  ;;  %v4546_v50 = vpop.f32.mrf.mxu0  ;;  %v2762_v19 = vld [vmem:[#allocation5 + $0x10] sm:$0x3]  ;;  %5374 = vst [vmem:[#allocation28_spill] sm:$0xff] %v4575_v41 }
 0x19e   : > { %v2780_v47 = vsel %vm1076_vm1, %v2762_v19, 0 }
 0x19f   : > { %2789 = vmatpush.bf16.msra.mxu1 %v2780_v47 }
 0x1a0   : > { %v1339_v4 = vpop.f32.mrf.mxu2 }
 0x1a2   : > { %v1116_v62 = vpop.f32.mrf.mxu1 }
 0x1a3   : > { %v4549_v61 = vadd.f32 %v1336_v9, %v1116_v62 }
 0x1a5   : > { %v4552_v60 = vpop.f32.mrf.mxu0 }
 0x1a8   : > { %v1341_v46 = vpop.f32.mrf.mxu2  ;;  %3513 = vmatmul.msk.bf16.gmra.mxu0 %vm1027_vm2, %v4463_v35 }
 0x1aa   : > { %v1119_v14 = vpop.f32.mrf.mxu1 }
 0x1ab   : > { %v4557_v27 = vadd.f32 %v1339_v4, %v1119_v14 }
 0x1ac   : > { %3485 = vmatmul.msk.bf16.gmra.mxu3 %vm1027_vm2, %v4303_v58 }
 0x1ad   : > { %5371 = vst [vmem:[#allocation25_spill] sm:$0xff] %v4557_v27  ;;  %3520 = vmatmul.msk.bf16.gmra.mxu1 %vm1027_vm2, %v4109_v56  ;;  %3537 = vmatmul.msk.bf16.gmra.mxu2 %vm1027_vm2, %v4175_v22  ;;  %v4565_v9 = vpop.f32.mrf.mxu0  ;;  %v4589_v27 = vpop.f32.mrf.mxu3 }
 0x1ae   : > { %5377 = vst [vmem:[#allocation31_spill] sm:$0xff] %v4589_v27 }
 0x1b0   : > { %v1344_v62 = vpop.f32.mrf.mxu2 }
 0x1b2   : > { %v1121_v7 = vpop.f32.mrf.mxu1 }
 0x1b3   : > { %v4569_v19 = vadd.f32 %v1341_v46, %v1121_v7 }
 0x1b5   : > { %5373 = vst [vmem:[#allocation27_spill] sm:$0xff] %v4569_v19  ;;  %v4571_v47 = vpop.f32.mrf.mxu0 }
 0x1b8   : > { %v1346_v4 = vpop.f32.mrf.mxu2  ;;  %3514 = vmatmul.msk.bf16.gmra.mxu0 %vm1027_vm2, %v4496_v5 }
 0x1ba   : > { %v1124_v14 = vpop.f32.mrf.mxu1 }
 0x1bb   : > { %v4577_v56 = vadd.f32 %v1344_v62, %v1124_v14 }
 0x1bc   : > { %3486 = vmatmul.msk.bf16.vlgmr.msrb.gmra.mxu3 %vm1027_vm2, %v4089_v31 }
 0x1bd   : > { %5375 = vst [vmem:[#allocation29_spill] sm:$0xff] %v4577_v56  ;;  %3521 = vmatmul.msk.bf16.gmra.mxu1 %vm1027_vm2, %v4135_v32  ;;  %3538 = vmatmul.msk.bf16.gmra.mxu2 %vm1027_vm2, %v4231_v36  ;;  %v4585_v46 = vpop.f32.mrf.mxu0  ;;  %v4603_v32 = vpop.f32.mrf.mxu3 }
 0x1be   : > { %5379 = vst [vmem:[#allocation33_spill] sm:$0xff] %v4603_v32 }
 0x1c0   : > { %v1349_v7 = vpop.f32.mrf.mxu2 }
 0x1c2   : > { %v1126_v21 = vpop.f32.mrf.mxu1 }
 0x1c3   : > { %v4587_v19 = vadd.f32 %v1346_v4, %v1126_v21 }
 0x1c5   : > { %5376 = vst [vmem:[#allocation30_spill] sm:$0xff] %v4587_v19  ;;  %v4591_v41 = vpop.f32.mrf.mxu0 }
 0x1c8   : > { %v1351_v62 = vpop.f32.mrf.mxu2  ;;  %3515 = vmatmul.msk.bf16.gmra.mxu0 %vm1027_vm2, %v4205_v59 }
 0x1ca   : > { %v1129_v31 = vpop.f32.mrf.mxu1 }
 0x1cb   : > { %v4595_v14 = vadd.f32 %v1349_v7, %v1129_v31  ;;  %v4611_v7 = vpop.f32.mrf.mxu3 }
 0x1cc   : > { %3487 = vmatmul.msk.bf16.gmra.mxu3 %vm1027_vm2, %v4115_v1  ;;  %5381 = vst [vmem:[#allocation35_spill] sm:$0xff] %v4611_v7 }
 0x1cd   : > { %5378 = vst [vmem:[#allocation32_spill] sm:$0xff] %v4595_v14  ;;  %3522 = vmatmul.msk.bf16.gmra.mxu1 %vm1027_vm2, %v4175_v22  ;;  %3539 = vmatmul.msk.bf16.gmra.mxu2 %vm1027_vm2, %v4292_v6  ;;  %v4605_v21 = vpop.f32.mrf.mxu0 }
 0x1d0   : > { %v1354_v4 = vpop.f32.mrf.mxu2 }
 0x1d2   : > { %v1131_v27 = vpop.f32.mrf.mxu1 }
 0x1d3   : > { %v4607_v19 = vadd.f32 %v1351_v62, %v1131_v27  ;;  %v4623_v32 = vpop.f32.mrf.mxu3 }
 0x1d4   : > { %5383 = vst [vmem:[#allocation37_spill] sm:$0xff] %v4623_v32 }
 0x1d5   : > { %5380 = vst [vmem:[#allocation34_spill] sm:$0xff] %v4607_v19  ;;  %v4613_v1 = vpop.f32.mrf.mxu0 }
 0x1d8   : > { %v1356_v56 = vpop.f32.mrf.mxu2  ;;  %3516 = vmatmul.msk.bf16.gmra.mxu0 %vm1027_vm2, %v4263_v13 }
 0x1da   : > { %v1134_v22 = vpop.f32.mrf.mxu1 }
 0x1db   : > { %v4615_v31 = vadd.f32 %v1354_v4, %v1134_v22 }
 0x1dc   : > { %3488 = vmatmul.msk.bf16.gmra.mxu3 %vm1027_vm2, %v4143_v42 }
 0x1dd   : > { %5382 = vst [vmem:[#allocation36_spill] sm:$0xff] %v4615_v31  ;;  %3523 = vmatmul.msk.bf16.gmra.mxu1 %vm1027_vm2, %v4231_v36  ;;  %3540 = vmatmul.msk.bf16.gmra.mxu2 %vm1027_vm2, %v4350_v39  ;;  %v4627_v7 = vpop.f32.mrf.mxu0  ;;  %v4635_v36 = vpop.f32.mrf.mxu3 }
 0x1de   : > { %5386 = vst [vmem:[#allocation40_spill] sm:$0xff] %v4635_v36 }
 0x1e0   : > { %v1359_v27 = vpop.f32.mrf.mxu2 }
 0x1e2   : > { %v1136_v62 = vpop.f32.mrf.mxu1 }
 0x1e3   : > { %v4625_v19 = vadd.f32 %v1356_v56, %v1136_v62 }
 0x1e5   : > { %5384 = vst [vmem:[#allocation38_spill] sm:$0xff] %v4625_v19  ;;  %v4641_v56 = vpop.f32.mrf.mxu0  ;;  %v1166_v31 = vpop.f32.mrf.mxu3 }
 0x1e6   : > { %5387 = vst [vmem:[#allocation41_spill] sm:$0xff] %v4641_v56 }
 0x1e8   : > { %3517 = vmatmul.msk.bf16.gmra.mxu0 %vm1027_vm2, %v4323_v0  ;;  %v1361_v22 = vpop.f32.mrf.mxu2 }
 0x1ea   : > { %v1139_v4 = vpop.f32.mrf.mxu1 }
 0x1eb   : > { %v4631_v42 = vadd.f32 %v1359_v27, %v1139_v4 }
 0x1ec   : > { %3489 = vmatmul.msk.bf16.gmra.mxu3 %vm1027_vm2, %v4183_v34 }
 0x1ed   : > { %5385 = vst [vmem:[#allocation39_spill] sm:$0xff] %v4631_v42  ;;  %3524 = vmatmul.msk.bf16.gmra.mxu1 %vm1027_vm2, %v4292_v6  ;;  %3541 = vmatmul.msk.bf16.gmra.mxu2 %vm1027_vm2, %v4400_v38  ;;  %v4645_v27 = vpop.f32.mrf.mxu0 }
 0x1ee   : > { %5389 = vst [vmem:[#allocation43_spill] sm:$0xff] %v4645_v27 }
 0x1f0   : > { %v1364_v19 = vpop.f32.mrf.mxu2 }
 0x1f2   : > { %v1141_v62 = vpop.f32.mrf.mxu1 }
 0x1f3   : > { %v4643_v32 = vadd.f32 %v1361_v22, %v1141_v62 }
 0x1f5   : > { %5388 = vst [vmem:[#allocation42_spill] sm:$0xff] %v4643_v32  ;;  %v4659_v62 = vpop.f32.mrf.mxu0 }
 0x1f6   : > { %5392 = vst [vmem:[#allocation46_spill] sm:$0xff] %v4659_v62 }
 0x1f8   : > { %3566 = vmatmul.msk.bf16.vlgmr.msra.gmra.mxu0 %vm1027_vm2, %v4066_v57  ;;  %v1366_v6 = vpop.f32.mrf.mxu2 }
 0x1fa   : > { %v1144_v34 = vpop.f32.mrf.mxu1 }
 0x1fb   : > { %v4649_v4 = vadd.f32 %v1364_v19, %v1144_v34 }
 0x1fc   : > { %3490 = vmatmul.msk.bf16.gmra.mxu3 %vm1027_vm2, %v4241_v48 }
 0x1fd   : > { %5390 = vst [vmem:[#allocation44_spill] sm:$0xff] %v4649_v4  ;;  %3525 = vmatmul.msk.bf16.gmra.mxu1 %vm1027_vm2, %v4350_v39  ;;  %3542 = vmatmul.msk.bf16.gmra.mxu2 %vm1027_vm2, %v4431_v45  ;;  %v4667_v34 = vpop.f32.mrf.mxu0 }
 0x1fe   : > { %5395 = vst [vmem:[#allocation49_spill] sm:$0xff] %v4667_v34 }
 0x1ff   : > { %v4657_v22 = vpop.f32.mrf.mxu3 }
 0x200   : > { %5391 = vst [vmem:[#allocation45_spill] sm:$0xff] %v4657_v22  ;;  %v2105_v48 = vpop.f32.mrf.mxu2 }
 0x202   : > { %v1146_v36 = vpop.f32.mrf.mxu1 }
 0x203   : > { %v4661_v32 = vadd.f32 %v1366_v6, %v1146_v36 }
 0x205   : > { %5393 = vst [vmem:[#allocation47_spill] sm:$0xff] %v4661_v32 }
 0x207   : > { %v4663_v42 = vpop.f32.mrf.mxu3 }
 0x208   : > { %5394 = vst [vmem:[#allocation48_spill] sm:$0xff] %v4663_v42  ;;  %3567 = vmatmul.msk.bf16.gmra.mxu0 %vm1027_vm2, %v4091_v33  ;;  %v2107_v6 = vpop.f32.mrf.mxu2  ;;  %v4677_v42 = vpop.f32.mrf.mxu0 }
 0x209   : > { %5397 = vst [vmem:[#allocation51_spill] sm:$0xff] %v4677_v42 }
 0x20a   : > { %v1963_v19 = vpop.f32.mrf.mxu1 }
 0x20c   : > { %3491 = vmatmul.msk.bf16.gmra.mxu3 %vm1027_vm2, %v4301_v16 }
 0x20d   : > { %3526 = vmatmul.msk.bf16.gmra.mxu1 %vm1027_vm2, %v4400_v38  ;;  %3543 = vmatmul.msk.bf16.gmra.mxu2 %vm1027_vm2, %v4463_v35 }
 0x20f   : > { %v4675_v39 = vpop.f32.mrf.mxu3 }
 0x210   : > { %5396 = vst [vmem:[#allocation50_spill] sm:$0xff] %v4675_v39  ;;  %v2110_v16 = vpop.f32.mrf.mxu2  ;;  %v4691_v39 = vpop.f32.mrf.mxu0 }
 0x211   : > { %5400 = vst [vmem:[#allocation54_spill] sm:$0xff] %v4691_v39 }
 0x212   : > { %v1965_v36 = vpop.f32.mrf.mxu1 }
 0x217   : > { %v4679_v22 = vpop.f32.mrf.mxu3 }
 0x218   : > { %5398 = vst [vmem:[#allocation52_spill] sm:$0xff] %v4679_v22  ;;  %3568 = vmatmul.msk.bf16.gmra.mxu0 %vm1027_vm2, %v4117_v3  ;;  %v2112_v22 = vpop.f32.mrf.mxu2  ;;  %v4697_v57 = vpop.f32.mrf.mxu0 }
 0x219   : > { %5402 = vst [vmem:[#allocation56_spill] sm:$0xff] %v4697_v57  ;;  %v2987_v57 = vld [vmem:[%s5332_s5] sm:$0x3] }
 0x21a   : > { %v1968_v32 = vpop.f32.mrf.mxu1  ;;  %v3041_v39 = vsel %vm1076_vm1, %v2987_v57, 0 }
 0x21b   : > { %3050 = vmatpush.bf16.msra.mxu2 %v3041_v39 }
 0x21c   : > { %3492 = vmatmul.msk.bf16.gmra.mxu3 %vm1027_vm2, %v4360_v11 }
 0x21d   : > { %3527 = vmatmul.msk.bf16.gmra.mxu1 %vm1027_vm2, %v4431_v45  ;;  %3544 = vmatmul.msk.bf16.gmra.mxu2 %vm1027_vm2, %v4496_v5 }
 0x21f   : > { %v4689_v38 = vpop.f32.mrf.mxu3 }
 0x220   : > { %5399 = vst [vmem:[#allocation53_spill] sm:$0xff] %v4689_v38  ;;  %v2115_v38 = vpop.f32.mrf.mxu2  ;;  %v4715_v34 = vpop.f32.mrf.mxu0 }
 0x221   : > { %5404 = vst [vmem:[#allocation58_spill] sm:$0xff] %v4715_v34 }
 0x222   : > { %v1970_v4 = vpop.f32.mrf.mxu1 }
 0x227   : > { %v4693_v42 = vpop.f32.mrf.mxu3 }
 0x228   : > { %5401 = vst [vmem:[#allocation55_spill] sm:$0xff] %v4693_v42  ;;  %3569 = vmatmul.msk.bf16.gmra.mxu0 %vm1027_vm2, %v4152_v49  ;;  %v4729_v57 = vpop.f32.mrf.mxu0 }
 0x229   : > { %5406 = vst [vmem:[#allocation60_spill] sm:$0xff] %v4729_v57 }
 0x22a   : > { %v4699_v11 = vpop.f32.mrf.mxu1 }
 0x22c   : > { %3493 = vmatmul.msk.bf16.gmra.mxu3 %vm1027_vm2, %v4406_v8 }
 0x22d   : > { %3528 = vmatmul.msk.bf16.gmra.mxu1 %vm1027_vm2, %v4463_v35  ;;  %3545 = vmatmul.msk.bf16.gmra.mxu2 %vm1027_vm2, %v4205_v59 }
 0x22f   : > { %v4707_v45 = vpop.f32.mrf.mxu3 }
 0x230   : > { %5403 = vst [vmem:[#allocation57_spill] sm:$0xff] %v4707_v45  ;;  %v2117_v45 = vpop.f32.mrf.mxu2  ;;  %v4737_v27 = vpop.f32.mrf.mxu0 }
 0x232   : > { %v4709_v42 = vpop.f32.mrf.mxu1 }
 0x237   : > { %v1386_v8 = vpop.f32.mrf.mxu3 }
 0x238   : > { %v4717_v62 = vadd.f32 %v1386_v8, %v1166_v31  ;;  %3570 = vmatmul.msk.bf16.gmra.mxu0 %vm1027_vm2, %v4209_v2  ;;  %v2120_v14 = vpop.f32.mrf.mxu2 }
 0x23a   : > { %5405 = vst [vmem:[#allocation59_spill] sm:$0xff] %v4717_v62  ;;  %v4721_v35 = vpop.f32.mrf.mxu1 }
 0x23c   : > { %3494 = vmatmul.msk.bf16.gmra.mxu3 %vm1027_vm2, %v4439_v44 }
 0x23d   : > { %3529 = vmatmul.msk.bf16.gmra.mxu1 %vm1027_vm2, %v4496_v5  ;;  %3546 = vmatmul.msk.bf16.gmra.mxu2 %vm1027_vm2, %v4263_v13 }
 0x23f   : > { %v1419_v39 = vpop.f32.mrf.mxu3 }
 0x240   : > { %v1499_v31 = vadd.f32 %v1419_v39, %v4408_v10 }
 0x242   : > { %v1789_v8 = vadd.f32 %v4490_v52, %v1499_v31  ;;  %v4733_v62 = vpop.f32.mrf.mxu1 }
 0x244   : > { %v2043_v34 = vadd.f32 %v1963_v19, %v1789_v8 }
 0x246   : > { %v4735_v2 = vadd.f32 %v2105_v48, %v2043_v34  ;;  %v4754_v34 = vpop.f32.mrf.mxu0 }
 0x247   : > { %v1421_v44 = vpop.f32.mrf.mxu3 }
 0x248   : > { %v1500_v5 = vadd.f32 %v1421_v44, %v4419_v51  ;;  %3571 = vmatmul.msk.bf16.gmra.mxu0 %vm1027_vm2, %v4269_v24  ;;  %v2122_v51 = vpop.f32.mrf.mxu2 }
 0x24a   : > { %v1790_v57 = vadd.f32 %v4514_v28, %v1500_v5  ;;  %v4743_v56 = vpop.f32.mrf.mxu1 }
 0x24c   : > { %3495 = vmatmul.msk.bf16.gmra.mxu3 %vm1027_vm2, %v4472_v30  ;;  %v2044_v10 = vadd.f32 %v1965_v36, %v1790_v57 }
 0x24d   : > { %3530 = vmatmul.msk.bf16.gmra.mxu1 %vm1027_vm2, %v4205_v59  ;;  %3547 = vmatmul.msk.bf16.gmra.mxu2 %vm1027_vm2, %v4323_v0 }
 0x24e   : > { %v4751_v52 = vadd.f32 %v2107_v6, %v2044_v10 }
 0x24f   : > { %v1424_v48 = vpop.f32.mrf.mxu3 }
 0x250   : > { %v1501_v19 = vadd.f32 %v1424_v48, %v4441_v63  ;;  %v2125_v6 = vpop.f32.mrf.mxu2  ;;  %v4767_v63 = vpop.f32.mrf.mxu0  ;;  %v5408_v48 = vld [vmem:[#allocation23_spill] sm:$0xff] }
 0x252   : > { %v1791_v28 = vadd.f32 %v4518_v53, %v1501_v19  ;;  %v4757_v39 = vpop.f32.mrf.mxu1 }
 0x254   : > { %v2045_v30 = vadd.f32 %v1968_v32, %v1791_v28 }
 0x256   : > { %v4759_v36 = vadd.f32 %v2110_v16, %v2045_v30 }
 0x257   : > { %v1426_v57 = vpop.f32.mrf.mxu3 }
 0x258   : > { %v1502_v59 = vadd.f32 %v1426_v57, %v4451_v40  ;;  %3572 = vmatmul.msk.bf16.gmra.mxu0 %vm1027_vm2, %v4329_v12  ;;  %v4781_v5 = vpop.f32.mrf.mxu2 }
 0x259   : > { %5407 = vst [vmem:[#allocation61_spill] sm:$0xff] %v4781_v5 }
 0x25a   : > { %v1792_v31 = vadd.f32 %v4530_v15, %v1502_v59  ;;  %v4765_v8 = vpop.f32.mrf.mxu1 }
 0x25c   : > { %3496 = vmatmul.msk.bf16.gmra.mxu3 %vm1027_vm2, %v4502_v26  ;;  %v2046_v53 = vadd.f32 %v1970_v4, %v1792_v31  ;;  %v4784_v4 = vpop.f32.mrf.mxu0 }
 0x25d   : > { %3531 = vmatmul.msk.bf16.gmra.mxu1 %vm1027_vm2, %v4263_v13  ;;  %3548 = vmatmul.msk.bf16.gmra.mxu2 %vm1027_vm2, %v4395_v17 }
 0x25e   : > { %v4775_v40 = vadd.f32 %v2112_v22, %v2046_v53  ;;  %v5409_v22 = vld [vmem:[#allocation18_spill] sm:$0xff] }
 0x25f   : > { %v1429_v32 = vpop.f32.mrf.mxu3 }
 0x260   : > { %v1503_v16 = vadd.f32 %v1429_v32, %v4474_v43 }
 0x262   : > { %v1793_v15 = vadd.f32 %v4534_v23, %v1503_v16  ;;  %v4779_v44 = vpop.f32.mrf.mxu1 }
 0x264   : > { %v2047_v26 = vadd.f32 %v4699_v11, %v1793_v15  ;;  %v2130_v11 = vpop.f32.mrf.mxu2  ;;  %v4803_v59 = vpop.f32.mrf.mxu0 }
 0x266   : > { %v4786_v10 = vadd.f32 %v2115_v38, %v2047_v26  ;;  %v5410_v38 = vld [vmem:[#allocation11_spill] sm:$0xff] }
 0x267   : > { %v1431_v13 = vpop.f32.mrf.mxu3 }
 0x268   : > { %v1504_v19 = vadd.f32 %v1431_v13, %v5408_v48  ;;  %3573 = vmatmul.msk.bf16.gmra.mxu0 %vm1027_vm2, %v5409_v22 }
 0x26a   : > { %v1794_v43 = vadd.f32 %v4546_v50, %v1504_v19  ;;  %v4792_v28 = vpop.f32.mrf.mxu1 }
 0x26c   : > { %3497 = vmatmul.msk.bf16.gmra.mxu3 %vm1027_vm2, %v4185_v37  ;;  %v2048_v23 = vadd.f32 %v4709_v42, %v1794_v43  ;;  %v4812_v32 = vpop.f32.mrf.mxu2  ;;  %v4817_v15 = vpop.f32.mrf.mxu0 }
 0x26d   : > { %3532 = vmatmul.msk.bf16.gmra.mxu1 %vm1027_vm2, %v4323_v0  ;;  %3549 = vmatmul.msk.bf16.gmra.mxu2 %vm1027_vm2, %v5410_v38  ;;  %5411 = vst [vmem:[#allocation23_spill] sm:$0xff] %v4812_v32 }
 0x26e   : > { %v4801_v30 = vadd.f32 %v2117_v45, %v2048_v23  ;;  %v5412_v45 = vld [vmem:[#allocation19_spill] sm:$0xff] }
 0x26f   : > { %v1434_v57 = vpop.f32.mrf.mxu3 }
 0x270   : > { %v1505_v50 = vadd.f32 %v1434_v57, %v4504_v25  ;;  %v5413_v57 = vld [vmem:[#allocation21_spill] sm:$0xff] }
 0x272   : > { %v1795_v31 = vadd.f32 %v4552_v60, %v1505_v50  ;;  %v4807_v53 = vpop.f32.mrf.mxu1 }
 0x274   : > { %v2049_v37 = vadd.f32 %v4721_v35, %v1795_v31  ;;  %v2135_v13 = vpop.f32.mrf.mxu2  ;;  %v4829_v43 = vpop.f32.mrf.mxu0 }
 0x276   : > { %v4810_v42 = vadd.f32 %v2120_v14, %v2049_v37 }
 0x277   : > { %v1436_v0 = vpop.f32.mrf.mxu3 }
 0x278   : > { %v1506_v16 = vadd.f32 %v1436_v0, %v4516_v54  ;;  %3574 = vmatmul.msk.bf16.gmra.mxu0 %vm1027_vm2, %v5412_v45 }
 0x27a   : > { %v1796_v25 = vadd.f32 %v4565_v9, %v1506_v16  ;;  %v1998_v26 = vpop.f32.mrf.mxu1 }
 0x27c   : > { %3498 = vmatmul.msk.bf16.gmra.mxu3 %vm1027_vm2, %v4244_v55  ;;  %v2050_v60 = vadd.f32 %v4733_v62, %v1796_v25  ;;  %v5417_v25 = vld [vmem:[#allocation22_spill] sm:$0xff] }
 0x27d   : > { %3533 = vmatmul.msk.bf16.gmra.mxu1 %vm1027_vm2, %v4395_v17 }
 0x27e   : > { %v4825_v14 = vadd.f32 %v2122_v51, %v2050_v60 }
 0x27f   : > { %v1439_v35 = vpop.f32.mrf.mxu3 }
 0x280   : > { %v1507_v54 = vadd.f32 %v1439_v35, %v4522_v29  ;;  %v4838_v29 = vpop.f32.mrf.mxu2  ;;  %v5418_v35 = vld [vmem:[#allocation16_spill] sm:$0xff] }
 0x281   : > { %5414 = vst [vmem:[#allocation18_spill] sm:$0xff] %v4838_v29 }
 0x282   : > { %v1797_v48 = vadd.f32 %v4571_v47, %v1507_v54  ;;  %v2000_v19 = vpop.f32.mrf.mxu1  ;;  %v5421_v54 = vld [vmem:[#allocation25_spill] sm:$0xff] }
 0x284   : > { %v2051_v9 = vadd.f32 %v4743_v56, %v1797_v48  ;;  %v4847_v56 = vpop.f32.mrf.mxu0 }
 0x286   : > { %v4832_v23 = vadd.f32 %v2125_v6, %v2051_v9 }
 0x287   : > { %v1441_v55 = vpop.f32.mrf.mxu3 }
 0x288   : > { %v1508_v62 = vadd.f32 %v1441_v55, %v4532_v20  ;;  %3575 = vmatmul.msk.bf16.gmra.mxu0 %vm1027_vm2, %v5413_v57  ;;  %v2140_v37 = vpop.f32.mrf.mxu2 }
 0x28a   : > { %v1798_v17 = vadd.f32 %v4585_v46, %v1508_v62  ;;  %v2003_v51 = vpop.f32.mrf.mxu1 }
 0x28c   : > { %3499 = vmatmul.msk.bf16.gmra.mxu3 %vm1027_vm2, %v4303_v58  ;;  %v4843_v47 = vadd.f32 %v4757_v39, %v1798_v17  ;;  %v4856_v39 = vpop.f32.mrf.mxu0 }
 0x28d   : > { %3582 = vmatmul.msk.bf16.vlgmr.msra.gmra.mxu1 %vm1027_vm2, %v4091_v33 }
 0x28e   : > { %5415 = vst [vmem:[#allocation11_spill] sm:$0xff] %v4843_v47 }
 0x28f   : > { %v1444_v20 = vpop.f32.mrf.mxu3 }
 0x290   : > { %v1509_v6 = vadd.f32 %v1444_v20, %v4538_v18 }
 0x292   : > { %v1799_v50 = vadd.f32 %v4591_v41, %v1509_v6  ;;  %v4851_v46 = vpop.f32.mrf.mxu1  ;;  %v5424_v6 = vld [vmem:[#allocation24_spill] sm:$0xff] }
 0x294   : > { %v2053_v31 = vadd.f32 %v4765_v8, %v1799_v50  ;;  %v4869_v8 = vpop.f32.mrf.mxu2  ;;  %v4872_v48 = vpop.f32.mrf.mxu0 }
 0x295   : > { %5420 = vst [vmem:[#allocation22_spill] sm:$0xff] %v4869_v8 }
 0x296   : > { %v4854_v0 = vadd.f32 %v2130_v11, %v2053_v31 }
 0x297   : > { %v1446_v58 = vpop.f32.mrf.mxu3 }
 0x298   : > { %5416 = vst [vmem:[#allocation19_spill] sm:$0xff] %v4854_v0  ;;  %v1510_v16 = vadd.f32 %v1446_v58, %v4549_v61  ;;  %3576 = vmatmul.msk.bf16.gmra.mxu0 %vm1027_vm2, %v5417_v25 }
 0x29a   : > { %v1800_v60 = vadd.f32 %v4605_v21, %v1510_v16  ;;  %v2008_v18 = vpop.f32.mrf.mxu1 }
 0x29c   : > { %3500 = vmatmul.msk.bf16.gmra.mxu3 %vm1027_vm2, %v5418_v35  ;;  %v4865_v41 = vadd.f32 %v4779_v44, %v1800_v60  ;;  %v5423_v44 = vld [vmem:[#allocation27_spill] sm:$0xff]  ;;  %v2145_v50 = vpop.f32.mrf.mxu2  ;;  %v4882_v16 = vpop.f32.mrf.mxu0  ;;  %v5427_v35 = vld [vmem:[#allocation41_spill] sm:$0xff] }
 0x29d   : > { %3583 = vmatmul.msk.bf16.gmra.mxu1 %vm1027_vm2, %v4117_v3 }
 0x29e   : > { %5419 = vst [vmem:[#allocation21_spill] sm:$0xff] %v4865_v41 }
 0x29f   : > { %v1449_v11 = vpop.f32.mrf.mxu3 }
 0x2a0   : > { %v1511_v61 = vadd.f32 %v1449_v11, %v5421_v54 }
 0x2a2   : > { %v1801_v9 = vadd.f32 %v4613_v1, %v1511_v61  ;;  %v2010_v21 = vpop.f32.mrf.mxu1 }
 0x2a4   : > { %v2055_v55 = vadd.f32 %v4792_v28, %v1801_v9  ;;  %v4897_v9 = vpop.f32.mrf.mxu0 }
 0x2a6   : > { %v4876_v62 = vadd.f32 %v2135_v13, %v2055_v55  ;;  %v5426_v13 = vld [vmem:[#allocation29_spill] sm:$0xff] }
 0x2a7   : > { %v1451_v17 = vpop.f32.mrf.mxu3 }
 0x2a8   : > { %5422 = vst [vmem:[#allocation16_spill] sm:$0xff] %v4876_v62  ;;  %v1512_v20 = vadd.f32 %v1451_v17, %v5423_v44  ;;  %3577 = vmatmul.msk.bf16.gmra.mxu0 %vm1027_vm2, %v5424_v6  ;;  %v5441_v62 = vld [vmem:[#allocation49_spill] sm:$0xff] }
 0x2aa   : > { %v1802_v31 = vadd.f32 %v4627_v7, %v1512_v20  ;;  %v2013_v58 = vpop.f32.mrf.mxu1  ;;  %v4895_v7 = vpop.f32.mrf.mxu2  ;;  %v5431_v20 = vld [vmem:[#allocation14_spill] sm:$0xff] }
 0x2ab   : > { %5428 = vst [vmem:[#allocation27_spill] sm:$0xff] %v4895_v7 }
 0x2ac   : > { %3501 = vmatmul.msk.bf16.gmra.mxu3 %vm1027_vm2, %v5410_v38  ;;  %v4887_v1 = vadd.f32 %v4807_v53, %v1802_v31  ;;  %v5430_v53 = vld [vmem:[#allocation30_spill] sm:$0xff]  ;;  %v5432_v31 = vld [vmem:[#allocation43_spill] sm:$0xff] }
 0x2ad   : > { %3584 = vmatmul.msk.bf16.gmra.mxu1 %vm1027_vm2, %v4152_v49 }
 0x2ae   : > { %5425 = vst [vmem:[#allocation25_spill] sm:$0xff] %v4887_v1 }
 0x2af   : > { %v1454_v28 = vpop.f32.mrf.mxu3 }
 0x2b0   : > { %v1513_v60 = vadd.f32 %v1454_v28, %v5426_v13 }
 0x2b2   : > { %v1803_v11 = vadd.f32 %v5427_v35, %v1513_v60  ;;  %v4893_v54 = vpop.f32.mrf.mxu1  ;;  %v2150_v60 = vpop.f32.mrf.mxu2 }
 0x2b3   : > { %v4911_v35 = vpop.f32.mrf.mxu0 }
 0x2b4   : > { %v2057_v61 = vadd.f32 %v1998_v26, %v1803_v11  ;;  %v5434_v26 = vld [vmem:[#allocation13_spill] sm:$0xff]  ;;  %v5435_v11 = vld [vmem:[#allocation32_spill] sm:$0xff] }
 0x2b6   : > { %v4899_v55 = vadd.f32 %v2140_v37, %v2057_v61 }
 0x2b7   : > { %v1456_v17 = vpop.f32.mrf.mxu3 }
 0x2b8   : > { %5429 = vst [vmem:[#allocation24_spill] sm:$0xff] %v4899_v55  ;;  %v1514_v44 = vadd.f32 %v1456_v17, %v5430_v53  ;;  %3578 = vmatmul.msk.bf16.gmra.mxu0 %vm1027_vm2, %v5431_v20  ;;  %v5436_v17 = vld [vmem:[#allocation46_spill] sm:$0xff] }
 0x2ba   : > { %v1804_v8 = vadd.f32 %v5432_v31, %v1514_v44  ;;  %v2018_v28 = vpop.f32.mrf.mxu1  ;;  %v4917_v31 = vpop.f32.mrf.mxu2 }
 0x2bb   : > { %5438 = vst [vmem:[#allocation30_spill] sm:$0xff] %v4917_v31  ;;  %v4922_v1 = vpop.f32.mrf.mxu0 }
 0x2bc   : > { %3550 = vmatmul.msk.bf16.vlgmr.msra.gmra.mxu3 %vm1027_vm2, %v5410_v38  ;;  %v4907_v13 = vadd.f32 %v2000_v19, %v1804_v8  ;;  %v5439_v19 = vld [vmem:[#allocation34_spill] sm:$0xff] }
 0x2bd   : > { %3585 = vmatmul.msk.bf16.gmra.mxu1 %vm1027_vm2, %v5434_v26 }
 0x2be   : > { %5433 = vst [vmem:[#allocation29_spill] sm:$0xff] %v4907_v13  ;;  %v5440_v13 = vld [vmem:[#allocation15_spill] sm:$0xff] }
 0x2bf   : > { %v1459_v37 = vpop.f32.mrf.mxu3 }
 0x2c0   : > { %v1515_v61 = vadd.f32 %v1459_v37, %v5435_v11  ;;  %v5442_v37 = vld [vmem:[#allocation12_spill] sm:$0xff] }
 0x2c2   : > { %v1805_v53 = vadd.f32 %v5436_v17, %v1515_v61  ;;  %v2020_v7 = vpop.f32.mrf.mxu1  ;;  %v2155_v11 = vpop.f32.mrf.mxu2  ;;  %v5445_v61 = vld [vmem:[#allocation51_spill] sm:$0xff] }
 0x2c4   : > { %v2059_v55 = vadd.f32 %v2003_v51, %v1805_v53 }
 0x2c6   : > { %v4915_v44 = vadd.f32 %v2145_v50, %v2059_v55  ;;  %v5444_v55 = vld [vmem:[#allocation36_spill] sm:$0xff] }
 0x2c7   : > { %v1461_v29 = vpop.f32.mrf.mxu3 }
 0x2c8   : > { %5437 = vst [vmem:[#allocation41_spill] sm:$0xff] %v4915_v44  ;;  %v1516_v8 = vadd.f32 %v1461_v29, %v5439_v19  ;;  %3579 = vmatmul.msk.bf16.gmra.mxu0 %vm1027_vm2, %v5440_v13  ;;  %v4934_v19 = vpop.f32.mrf.mxu0 }
 0x2ca   : > { %v1806_v32 = vadd.f32 %v5441_v62, %v1516_v8  ;;  %v2023_v41 = vpop.f32.mrf.mxu1  ;;  %v4942_v5 = vpop.f32.mrf.mxu2 }
 0x2cb   : > { %5450 = vst [vmem:[#allocation13_spill] sm:$0xff] %v4942_v5 }
 0x2cc   : > { %3551 = vmatmul.msk.bf16.gmra.mxu3 %vm1027_vm2, %v5442_v37  ;;  %v4928_v51 = vadd.f32 %v4851_v46, %v1806_v32  ;;  %v5447_v37 = vld [vmem:[#allocation38_spill] sm:$0xff]  ;;  %v5448_v32 = vld [vmem:[#allocation17_spill] sm:$0xff] }
 0x2cd   : > { %3586 = vmatmul.msk.bf16.gmra.mxu1 %vm1027_vm2, %v4269_v24  ;;  %v5449_v46 = vld [vmem:[#allocation54_spill] sm:$0xff] }
 0x2ce   : > { %5443 = vst [vmem:[#allocation14_spill] sm:$0xff] %v4928_v51 }
 0x2cf   : > { %v1464_v50 = vpop.f32.mrf.mxu3 }
 0x2d0   : > { %v1517_v29 = vadd.f32 %v1464_v50, %v5444_v55 }
 0x2d2   : > { %v1807_v17 = vadd.f32 %v5445_v61, %v1517_v29  ;;  %v2025_v53 = vpop.f32.mrf.mxu1  ;;  %v5453_v29 = vld [vmem:[#allocation56_spill] sm:$0xff] }
 0x2d4   : > { %v2061_v62 = vadd.f32 %v2008_v18, %v1807_v17  ;;  %v4950_v18 = vpop.f32.mrf.mxu0 }
 0x2d6   : > { %v4936_v8 = vadd.f32 %v2150_v60, %v2061_v62  ;;  %v2160_v62 = vpop.f32.mrf.mxu2 }
 0x2d7   : > { %v1466_v31 = vpop.f32.mrf.mxu3 }
 0x2d8   : > { %5446 = vst [vmem:[#allocation43_spill] sm:$0xff] %v4936_v8  ;;  %v1518_v44 = vadd.f32 %v1466_v31, %v5447_v37  ;;  %3580 = vmatmul.msk.bf16.gmra.mxu0 %vm1027_vm2, %v5448_v32  ;;  %v5452_v31 = vld [vmem:[#allocation39_spill] sm:$0xff] }
 0x2da   : > { %v1808_v51 = vadd.f32 %v5449_v46, %v1518_v44  ;;  %v2028_v0 = vpop.f32.mrf.mxu1 }
 0x2dc   : > { %3552 = vmatmul.msk.bf16.gmra.mxu3 %vm1027_vm2, %v4091_v33  ;;  %v4946_v50 = vadd.f32 %v2010_v21, %v1808_v51  ;;  %v4956_v5 = vpop.f32.mrf.mxu0  ;;  %v5455_v33 = vld [vmem:[#allocation42_spill] sm:$0xff]  ;;  %v5456_v51 = vld [vmem:[#allocation20_spill] sm:$0xff] }
 0x2dd   : > { %3587 = vmatmul.msk.bf16.gmra.mxu1 %vm1027_vm2, %v4329_v12 }
 0x2de   : > { %5451 = vst [vmem:[#allocation32_spill] sm:$0xff] %v4946_v50  ;;  %v5457_v50 = vld [vmem:[#allocation58_spill] sm:$0xff] }
 0x2df   : > { %v1469_v60 = vpop.f32.mrf.mxu3 }
 0x2e0   : > { %v1519_v55 = vadd.f32 %v1469_v60, %v5452_v31  ;;  %v5459_v31 = vld [vmem:[#allocation44_spill] sm:$0xff] }
 0x2e2   : > { %v1809_v61 = vadd.f32 %v5453_v29, %v1519_v55  ;;  %v2030_v17 = vpop.f32.mrf.mxu1  ;;  %v5460_v29 = vld [vmem:[#allocation60_spill] sm:$0xff] }
 0x2e4   : > { %v2063_v44 = vadd.f32 %v2013_v58, %v1809_v61  ;;  %v4969_v58 = vpop.f32.mrf.mxu2 }
 0x2e5   : > { %5458 = vst [vmem:[#allocation34_spill] sm:$0xff] %v4969_v58 }
 0x2e6   : > { %v4954_v37 = vadd.f32 %v2155_v11, %v2063_v44 }
 0x2e7   : > { %v1471_v46 = vpop.f32.mrf.mxu3 }
 0x2e8   : > { %5454 = vst [vmem:[#allocation46_spill] sm:$0xff] %v4954_v37  ;;  %v1520_v21 = vadd.f32 %v1471_v46, %v5455_v33  ;;  %3581 = vmatmul.msk.bf16.gmra.mxu0 %vm1027_vm2, %v5456_v51 }
 0x2ea   : > { %v1810_v8 = vadd.f32 %v5457_v50, %v1520_v21  ;;  %v2033_v47 = vpop.f32.mrf.mxu1  ;;  %v5462_v21 = vld [vmem:[#allocation47_spill] sm:$0xff] }
 0x2ec   : > { %3553 = vmatmul.msk.bf16.gmra.mxu3 %vm1027_vm2, %v4117_v3  ;;  %v4965_v60 = vadd.f32 %v4893_v54, %v1810_v8  ;;  %v2165_v37 = vpop.f32.mrf.mxu2 }
 0x2ed   : > { %3588 = vmatmul.msk.bf16.gmra.mxu1 %vm1027_vm2, %v5409_v22 }
 0x2ef   : > { %v1474_v11 = vpop.f32.mrf.mxu3 }
 0x2f0   : > { %v1521_v55 = vadd.f32 %v1474_v11, %v5459_v31  ;;  %v5464_v11 = vld [vmem:[#allocation26_spill] sm:$0xff]  ;;  %v5465_v31 = vld [vmem:[#allocation45_spill] sm:$0xff] }
 0x2f2   : > { %v1811_v61 = vadd.f32 %v5460_v29, %v1521_v55  ;;  %v2035_v44 = vpop.f32.mrf.mxu1 }
 0x2f4   : > { %v2065_v46 = vadd.f32 %v2018_v28, %v1811_v61  ;;  %v1370_v28 = vadd.f32 %v5465_v31, %v5464_v11  ;;  %v5469_v31 = vld [vmem:[#allocation50_spill] sm:$0xff] }
 0x2f6   : > { %v4973_v50 = vadd.f32 %v2160_v62, %v2065_v46  ;;  %v4986_v46 = vpop.f32.mrf.mxu2 }
 0x2f7   : > { %v1476_v33 = vpop.f32.mrf.mxu3 }
 0x2f8   : > { %5461 = vst [vmem:[#allocation15_spill] sm:$0xff] %v4973_v50  ;;  %v1522_v3 = vadd.f32 %v1476_v33, %v5462_v21  ;;  %v5466_v33 = vld [vmem:[#allocation28_spill] sm:$0xff] }
 0x2f9   : > { %v5467_v21 = vld [vmem:[#allocation48_spill] sm:$0xff] }
 0x2fa   : > { %v1812_v54 = vadd.f32 %v4737_v27, %v1522_v3  ;;  %v2038_v8 = vpop.f32.mrf.mxu1  ;;  %v1372_v3 = vadd.f32 %v5467_v21, %v5466_v33  ;;  %v5471_v33 = vld [vmem:[#allocation52_spill] sm:$0xff] }
 0x2fc   : > { %3554 = vmatmul.msk.bf16.gmra.mxu3 %vm1027_vm2, %v4152_v49  ;;  %v4979_v58 = vadd.f32 %v2020_v7, %v1812_v54 }
 0x2fd   : > { %3589 = vmatmul.msk.bf16.gmra.mxu1 %vm1027_vm2, %v5412_v45 }
 0x2fe   : > { %5463 = vst [vmem:[#allocation49_spill] sm:$0xff] %v4979_v58 }
 0x2ff   : > { %v1479_v62 = vpop.f32.mrf.mxu3 }
 0x300   : > { %v1523_v55 = vadd.f32 %v1479_v62, %v1370_v28 }
 0x302   : > { %v1813_v29 = vadd.f32 %v4754_v34, %v1523_v55  ;;  %v2040_v61 = vpop.f32.mrf.mxu1  ;;  %v2170_v34 = vpop.f32.mrf.mxu2 }
 0x304   : > { %v2067_v27 = vadd.f32 %v2023_v41, %v1813_v29  ;;  %v5468_v41 = vld [vmem:[#allocation31_spill] sm:$0xff] }
 0x305   : > { %v1375_v28 = vadd.f32 %v5469_v31, %v5468_v41 }
 0x306   : > { %v4990_v49 = vadd.f32 %v2165_v37, %v2067_v27 }
 0x307   : > { %v1481_v7 = vpop.f32.mrf.mxu3 }
 0x308   : > { %v1524_v54 = vadd.f32 %v1481_v7, %v1372_v3 }
 0x30a   : > { %v1814_v58 = vadd.f32 %v4767_v63, %v1524_v54  ;;  %v2791_v50 = vpop.f32.mrf.mxu1  ;;  %v5470_v63 = vld [vmem:[#allocation33_spill] sm:$0xff] }
 0x30b   : > { %v1377_v21 = vadd.f32 %v5471_v33, %v5470_v63  ;;  %v5475_v63 = vld [vmem:[#allocation55_spill] sm:$0xff] }
 0x30c   : > { %3555 = vmatmul.msk.bf16.gmra.mxu3 %vm1027_vm2, %v5434_v26  ;;  %v4995_v11 = vadd.f32 %v2025_v53, %v1814_v58  ;;  %v5006_v26 = vpop.f32.mrf.mxu2 }
 0x30d   : > { %3590 = vmatmul.msk.bf16.gmra.mxu1 %vm1027_vm2, %v5413_v57 }
 0x30f   : > { %v1484_v62 = vpop.f32.mrf.mxu3 }
 0x310   : > { %v1525_v37 = vadd.f32 %v1484_v62, %v1375_v28 }
 0x312   : > { %v1815_v55 = vadd.f32 %v4784_v4, %v1525_v37  ;;  %v2793_v29 = vpop.f32.mrf.mxu1  ;;  %v5472_v4 = vld [vmem:[#allocation35_spill] sm:$0xff] }
 0x314   : > { %v2069_v27 = vadd.f32 %v2028_v0, %v1815_v55  ;;  %v5473_v0 = vld [vmem:[#allocation53_spill] sm:$0xff]  ;;  %v2175_v62 = vpop.f32.mrf.mxu2 }
 0x315   : > { %v1380_v31 = vadd.f32 %v5473_v0, %v5472_v4 }
 0x316   : > { %v5004_v3 = vadd.f32 %v2170_v34, %v2069_v27 }
 0x317   : > { %v1486_v53 = vpop.f32.mrf.mxu3 }
 0x318   : > { %v1526_v58 = vadd.f32 %v1486_v53, %v1377_v21 }
 0x31a   : > { %v1816_v7 = vadd.f32 %v4803_v59, %v1526_v58  ;;  %v2796_v54 = vpop.f32.mrf.mxu1  ;;  %v5474_v59 = vld [vmem:[#allocation37_spill] sm:$0xff] }
 0x31b   : > { %v1382_v33 = vadd.f32 %v5475_v63, %v5474_v59 }
 0x31c   : > { %3556 = vmatmul.msk.bf16.gmra.mxu3 %vm1027_vm2, %v4269_v24  ;;  %v5011_v41 = vadd.f32 %v2030_v17, %v1816_v7  ;;  %v5023_v58 = vpop.f32.mrf.mxu2 }
 0x31d   : > { %3591 = vmatmul.msk.bf16.gmra.mxu1 %vm1027_vm2, %v5417_v25 }
 0x31f   : > { %v1489_v34 = vpop.f32.mrf.mxu3 }
 0x320   : > { %v1527_v28 = vadd.f32 %v1489_v34, %v1380_v31 }
 0x322   : > { %v1817_v37 = vadd.f32 %v4817_v15, %v1527_v28  ;;  %v2798_v55 = vpop.f32.mrf.mxu1  ;;  %v5476_v15 = vld [vmem:[#allocation40_spill] sm:$0xff] }
 0x324   : > { %v2071_v27 = vadd.f32 %v2033_v47, %v1817_v37  ;;  %v5477_v47 = vld [vmem:[#allocation57_spill] sm:$0xff] }
 0x325   : > { %v1385_v4 = vadd.f32 %v5477_v47, %v5476_v15 }
 0x326   : > { %v5020_v21 = vadd.f32 %v2175_v62, %v2071_v27  ;;  %v2180_v62 = vpop.f32.mrf.mxu2 }
 0x327   : > { %v1491_v24 = vpop.f32.mrf.mxu3 }
 0x328   : > { %v1528_v17 = vadd.f32 %v1491_v24, %v1382_v33 }
 0x32a   : > { %v1818_v53 = vadd.f32 %v4829_v43, %v1528_v17  ;;  %v2801_v0 = vpop.f32.mrf.mxu1 }
 0x32c   : > { %3557 = vmatmul.msk.bf16.gmra.mxu3 %vm1027_vm2, %v4329_v12  ;;  %v5027_v7 = vadd.f32 %v2035_v44, %v1818_v53  ;;  %v5478_v12 = vld [vmem:[#allocation59_spill] sm:$0xff] }
 0x32d   : > { %3592 = vmatmul.msk.bf16.gmra.mxu1 %vm1027_vm2, %v5424_v6 }
 0x32f   : > { %v1494_v31 = vpop.f32.mrf.mxu3 }
 0x330   : > { %v1529_v34 = vadd.f32 %v1494_v31, %v1385_v4 }
 0x332   : > { %v1819_v28 = vadd.f32 %v4847_v56, %v1529_v34  ;;  %v2803_v59 = vpop.f32.mrf.mxu1 }
 0x334   : > { %v2073_v43 = vadd.f32 %v2038_v8, %v1819_v28 }
 0x336   : > { %v5034_v37 = vadd.f32 %v2180_v62, %v2073_v43 }
 0x337   : > { %v1496_v27 = vpop.f32.mrf.mxu3 }
 0x338   : > { %v1530_v44 = vadd.f32 %v1496_v27, %v5478_v12 }
 0x33a   : > { %v1820_v63 = vadd.f32 %v4856_v39, %v1530_v44  ;;  %v2806_v8 = vpop.f32.mrf.mxu1  ;;  %v5049_v39 = vld [vmem:[%s5331_s4] ss:$0 sm:$0xff] }
 0x33c   : > { %3558 = vmatmul.msk.bf16.gmra.mxu3 %vm1027_vm2, %v5409_v22  ;;  %v5040_v33 = vadd.f32 %v2040_v61, %v1820_v63 }
 0x33d   : > { %3593 = vmatmul.msk.bf16.gmra.mxu1 %vm1027_vm2, %v5431_v20 }
 0x33f   : > { %v2395_v24 = vpop.f32.mrf.mxu3 }
 0x340   : > { %v2475_v56 = vadd.f32 %v2395_v24, %v4735_v2 }
 0x342   : > { %v2729_v17 = vadd.f32 %v4872_v48, %v2475_v56  ;;  %v2808_v4 = vpop.f32.mrf.mxu1 }
 0x344   : > { %v2871_v15 = vadd.f32 %v2791_v50, %v2729_v17 }
 0x346   : > { %v2907_v47 = vadd.f32 %v5049_v39, %v2871_v15 }
 0x347   : > { %v2397_v53 = vpop.f32.mrf.mxu3 }
 0x348   : > { %v2476_v22 = vadd.f32 %v2397_v53, %v4751_v52  ;;  %v2939_v50 = vmax.f32 %v2907_v47, 0.0  ;;  %v2669_v52 = vpop.f32.mrf.mxu0 }
 0x34a   : > { %v2730_v61 = vadd.f32 %v4882_v16, %v2476_v22 }
 0x34c   : > { %v2872_v31 = vadd.f32 %v2793_v29, %v2730_v61  ;;  %3559 = vmatmul.msk.bf16.gmra.mxu3 %vm1027_vm2, %v5412_v45  ;;  %v2811_v29 = vpop.f32.mrf.mxu1 }
 0x34d   : > { %3594 = vmatmul.msk.bf16.gmra.mxu1 %vm1027_vm2, %v5440_v13 }
 0x34e   : > { %v2908_v2 = vadd.f32 %v5049_v39, %v2872_v31 }
 0x34f   : > { %v2400_v48 = vpop.f32.mrf.mxu3 }
 0x350   : > { %v2940_v34 = vmax.f32 %v2908_v2, 0.0  ;;  %v2477_v28 = vadd.f32 %v2400_v48, %v4759_v36  ;;  %v2671_v44 = vpop.f32.mrf.mxu0 }
 0x352   : > { %v2971_v62 = vpack.c.bf16 %v2940_v34, %v2939_v50  ;;  %v2731_v16 = vadd.f32 %v4897_v9, %v2477_v28 }
 0x354   : > { %3598 = vmatmul.msk.bf16.vlgmr.msra.gmra.mxu2 %vm1027_vm2, %v2971_v62  ;;  %v2873_v27 = vadd.f32 %v2796_v54, %v2731_v16  ;;  %v2813_v17 = vpop.f32.mrf.mxu1 }
 0x356   : > { %v2909_v63 = vadd.f32 %v5049_v39, %v2873_v27 }
 0x357   : > { %v2402_v43 = vpop.f32.mrf.mxu3 }
 0x358   : > { %v2478_v45 = vadd.f32 %v2402_v43, %v4775_v40  ;;  %v2941_v56 = vmax.f32 %v2909_v63, 0.0 }
 0x35a   : > { %v2732_v12 = vadd.f32 %v4911_v35, %v2478_v45 }
 0x35c   : > { %v2874_v24 = vadd.f32 %v2798_v55, %v2732_v12  ;;  %3560 = vmatmul.msk.bf16.gmra.mxu3 %vm1027_vm2, %v5413_v57  ;;  %v2674_v55 = vpop.f32.mrf.mxu0  ;;  %v2816_v61 = vpop.f32.mrf.mxu1 }
 0x35d   : > { %3595 = vmatmul.msk.bf16.gmra.mxu1 %vm1027_vm2, %v5448_v32 }
 0x35e   : > { %v2910_v36 = vadd.f32 %v5049_v39, %v2874_v24 }
 0x35f   : > { %v2405_v9 = vpop.f32.mrf.mxu3 }
 0x360   : > { %v2942_v54 = vmax.f32 %v2910_v36, 0.0  ;;  %v2479_v40 = vadd.f32 %v2405_v9, %v4786_v10  ;;  %v5480_v36 = vld [vmem:[#allocation61_spill] sm:$0xff] }
 0x362   : > { %v2972_v53 = vpack.c.bf16 %v2942_v54, %v2941_v56  ;;  %v2733_v35 = vadd.f32 %v4922_v1, %v2479_v40 }
 0x364   : > { %3599 = vmatmul.msk.bf16.gmra.mxu2 %vm1027_vm2, %v2972_v53  ;;  %v2875_v22 = vadd.f32 %v2801_v0, %v2733_v35  ;;  %v2676_v48 = vpop.f32.mrf.mxu0  ;;  %v2818_v28 = vpop.f32.mrf.mxu1 }
 0x366   : > { %v2911_v31 = vadd.f32 %v5049_v39, %v2875_v22 }
 0x367   : > { %v2407_v15 = vpop.f32.mrf.mxu3 }
 0x368   : > { %v2480_v57 = vadd.f32 %v2407_v15, %v4801_v30  ;;  %v2943_v50 = vmax.f32 %v2911_v31, 0.0 }
 0x36a   : > { %v2734_v47 = vadd.f32 %v4934_v19, %v2480_v57 }
 0x36c   : > { %v2876_v2 = vadd.f32 %v2803_v59, %v2734_v47  ;;  %3561 = vmatmul.msk.bf16.gmra.mxu3 %vm1027_vm2, %v5417_v25  ;;  %v2679_v16 = vpop.f32.mrf.mxu0  ;;  %v5481_v47 = vld [vmem:[#allocation19_spill] sm:$0xff] }
 0x36d   : > { %3596 = vmatmul.msk.bf16.gmra.mxu1 %vm1027_vm2, %v5456_v51 }
 0x36e   : > { %v2912_v10 = vadd.f32 %v5049_v39, %v2876_v2 }
 0x36f   : > { %v2410_v1 = vpop.f32.mrf.mxu3 }
 0x370   : > { %v2944_v0 = vmax.f32 %v2912_v10, 0.0  ;;  %v2481_v30 = vadd.f32 %v2410_v1, %v4810_v42  ;;  %v2821_v42 = vpop.f32.mrf.mxu1 }
 0x372   : > { %v2973_v34 = vpack.c.bf16 %v2944_v0, %v2943_v50  ;;  %v2735_v19 = vadd.f32 %v4950_v18, %v2481_v30 }
 0x374   : > { %3600 = vmatmul.msk.bf16.gmra.mxu2 %vm1027_vm2, %v2973_v34  ;;  %v2877_v62 = vadd.f32 %v2806_v8, %v2735_v19  ;;  %v2681_v24 = vpop.f32.mrf.mxu0 }
 0x376   : > { %v2913_v43 = vadd.f32 %v5049_v39, %v2877_v62 }
 0x377   : > { %v2412_v59 = vpop.f32.mrf.mxu3 }
 0x378   : > { %v2482_v25 = vadd.f32 %v2412_v59, %v4825_v14  ;;  %v2945_v12 = vmax.f32 %v2913_v43, 0.0  ;;  %v2823_v56 = vpop.f32.mrf.mxu1 }
 0x37a   : > { %v2736_v51 = vadd.f32 %v4956_v5, %v2482_v25 }
 0x37c   : > { %v2878_v27 = vadd.f32 %v2808_v4, %v2736_v51  ;;  %3562 = vmatmul.msk.bf16.gmra.mxu3 %vm1027_vm2, %v5424_v6  ;;  %v5479_v4 = vld [vmem:[#allocation11_spill] sm:$0xff] }
 0x37d   : > { %3597 = vmatmul.msk.bf16.gmra.mxu1 %vm1027_vm2, %v5410_v38  ;;  %v2194_v9 = vadd.f32 %v5480_v36, %v5479_v4 }
 0x37e   : > { %v2914_v18 = vadd.f32 %v5049_v39, %v2878_v27  ;;  %v5484_v27 = vld [vmem:[#allocation16_spill] sm:$0xff] }
 0x37f   : > { %v2415_v45 = vpop.f32.mrf.mxu3 }
 0x380   : > { %v2946_v8 = vmax.f32 %v2914_v18, 0.0  ;;  %v2483_v14 = vadd.f32 %v2415_v45, %v4832_v23  ;;  %v2684_v23 = vpop.f32.mrf.mxu0  ;;  %v2826_v2 = vpop.f32.mrf.mxu1 }
 0x382   : > { %v2974_v63 = vpack.c.bf16 %v2946_v8, %v2945_v12  ;;  %v2737_v5 = vadd.f32 %v2669_v52, %v2483_v14  ;;  %v5486_v14 = vld [vmem:[#allocation18_spill] sm:$0xff] }
 0x384   : > { %3601 = vmatmul.msk.bf16.gmra.mxu2 %vm1027_vm2, %v2974_v63  ;;  %v2879_v54 = vadd.f32 %v2811_v29, %v2737_v5  ;;  %v5482_v29 = vld [vmem:[#allocation21_spill] sm:$0xff] }
 0x386   : > { %v2915_v53 = vadd.f32 %v5049_v39, %v2879_v54 }
 0x387   : > { %v2417_v6 = vpop.f32.mrf.mxu3 }
 0x388   : > { %v2484_v38 = vadd.f32 %v2417_v6, %v2194_v9  ;;  %v2947_v22 = vmax.f32 %v2915_v53, 0.0  ;;  %v2686_v0 = vpop.f32.mrf.mxu0  ;;  %v2828_v19 = vpop.f32.mrf.mxu1 }
 0x38a   : > { %v2738_v40 = vadd.f32 %v2671_v44, %v2484_v38  ;;  %v5483_v44 = vld [vmem:[#allocation23_spill] sm:$0xff] }
 0x38b   : > { %v2196_v50 = vadd.f32 %v5483_v44, %v5482_v29 }
 0x38c   : > { %v2880_v35 = vadd.f32 %v2813_v17, %v2738_v40  ;;  %3563 = vmatmul.msk.bf16.gmra.mxu3 %vm1027_vm2, %v5431_v20 }
 0x38e   : > { %v2916_v15 = vadd.f32 %v5049_v39, %v2880_v35  ;;  %v5487_v35 = vld [vmem:[#allocation24_spill] sm:$0xff] }
 0x38f   : > { %v2420_v52 = vpop.f32.mrf.mxu3 }
 0x390   : > { %v2948_v57 = vmax.f32 %v2916_v15, 0.0  ;;  %v2485_v31 = vadd.f32 %v2420_v52, %v5481_v47  ;;  %v2689_v45 = vpop.f32.mrf.mxu0 }
 0x392   : > { %v2975_v10 = vpack.c.bf16 %v2948_v57, %v2947_v22  ;;  %v2739_v1 = vadd.f32 %v2674_v55, %v2485_v31  ;;  %v5489_v57 = vld [vmem:[#allocation22_spill] sm:$0xff] }
 0x394   : > { %3602 = vmatmul.msk.bf16.gmra.mxu2 %vm1027_vm2, %v2975_v10  ;;  %v2881_v30 = vadd.f32 %v2816_v61, %v2739_v1  ;;  %v2831_v61 = vpop.f32.mrf.mxu1 }
 0x396   : > { %v2917_v59 = vadd.f32 %v5049_v39, %v2881_v30 }
 0x397   : > { %v2422_v17 = vpop.f32.mrf.mxu3 }
 0x398   : > { %v2486_v20 = vadd.f32 %v2422_v17, %v2196_v50  ;;  %v2949_v51 = vmax.f32 %v2917_v59, 0.0  ;;  %v2691_v36 = vpop.f32.mrf.mxu0 }
 0x39a   : > { %v2740_v34 = vadd.f32 %v2676_v48, %v2486_v20  ;;  %v5485_v48 = vld [vmem:[#allocation25_spill] sm:$0xff] }
 0x39b   : > { %v2198_v63 = vadd.f32 %v5486_v14, %v5485_v48 }
 0x39c   : > { %v2882_v62 = vadd.f32 %v2818_v28, %v2740_v34  ;;  %3564 = vmatmul.msk.bf16.gmra.mxu3 %vm1027_vm2, %v5440_v13  ;;  %v2833_v38 = vpop.f32.mrf.mxu1  ;;  %v5490_v34 = vld [vmem:[#allocation41_spill] sm:$0xff] }
 0x39e   : > { %v2918_v25 = vadd.f32 %v5049_v39, %v2882_v62 }
 0x39f   : > { %v2425_v55 = vpop.f32.mrf.mxu3 }
 0x3a0   : > { %v2950_v43 = vmax.f32 %v2918_v25, 0.0  ;;  %v2487_v18 = vadd.f32 %v2425_v55, %v5484_v27 }
 0x3a2   : > { %v2976_v12 = vpack.c.bf16 %v2950_v43, %v2949_v51  ;;  %v2741_v8 = vadd.f32 %v2679_v16, %v2487_v18  ;;  %v5492_v51 = vld [vmem:[#allocation27_spill] sm:$0xff] }
 0x3a4   : > { %3603 = vmatmul.msk.bf16.gmra.mxu2 %vm1027_vm2, %v2976_v12  ;;  %v2883_v5 = vadd.f32 %v2821_v42, %v2741_v8  ;;  %v2694_v42 = vpop.f32.mrf.mxu0 }
 0x3a6   : > { %v2919_v9 = vadd.f32 %v5049_v39, %v2883_v5 }
 0x3a7   : > { %v2427_v28 = vpop.f32.mrf.mxu3 }
 0x3a8   : > { %v2488_v4 = vadd.f32 %v2427_v28, %v2198_v63  ;;  %v2951_v40 = vmax.f32 %v2919_v9, 0.0  ;;  %v5128_v28 = vpop.f32.mrf.mxu2 }
 0x3aa   : > { %v2742_v13 = vadd.f32 %v2681_v24, %v2488_v4  ;;  %v5488_v24 = vld [vmem:[#allocation29_spill] sm:$0xff] }
 0x3ab   : > { %v2200_v47 = vadd.f32 %v5489_v57, %v5488_v24 }
 0x3ac   : > { %v2884_v6 = vadd.f32 %v2823_v56, %v2742_v13  ;;  %3565 = vmatmul.msk.bf16.gmra.mxu3 %vm1027_vm2, %v5448_v32  ;;  %v2836_v32 = vpop.f32.mrf.mxu1  ;;  %v2696_v30 = vpop.f32.mrf.mxu0  ;;  %v5493_v13 = vld [vmem:[#allocation43_spill] sm:$0xff] }
 0x3ae   : > { %v2920_v54 = vadd.f32 %v5049_v39, %v2884_v6 }
 0x3af   : > { %v2430_v16 = vpop.f32.mrf.mxu3 }
 0x3b0   : > { %v2952_v53 = vmax.f32 %v2920_v54, 0.0  ;;  %v2489_v15 = vadd.f32 %v2430_v16, %v5487_v35  ;;  %v317_v54 = vld [vmem:[%s3988_s3] sm:$0xff]  }
 0x3b1   : > { %v3132_v35 = vunpack.c.l.bf16 %v317_v54 }
 0x3b2   : > { %v2977_v52 = vpack.c.bf16 %v2952_v53, %v2951_v40  ;;  %v2743_v22 = vadd.f32 %v2684_v23, %v2489_v15  ;;  %v5495_v40 = vld [vmem:[#allocation30_spill] sm:$0xff] }
 0x3b4   : > { %3604 = vmatmul.msk.bf16.gmra.mxu2 %vm1027_vm2, %v2977_v52  ;;  %v2885_v31 = vadd.f32 %v2826_v2, %v2743_v22  ;;  %v2838_v25 = vpop.f32.mrf.mxu1  ;;  %v5491_v2 = vld [vmem:[#allocation14_spill] sm:$0xff]  ;;  %v2699_v18 = vpop.f32.mrf.mxu0 }
 0x3b5   : > { %v2202_v43 = vadd.f32 %v5492_v51, %v5491_v2  ;;  %v319_v2 = vld [vmem:[%s3988_s3 + $0x8] sm:$0xff]  }
 0x3b6   : > { %v2921_v29 = vadd.f32 %v5049_v39, %v2885_v31 }
 0x3b7   : > { %v2432_v56 = vpop.f32.mrf.mxu3 }
 0x3b8   : > { %v2490_v10 = vadd.f32 %v2432_v56, %v2200_v47  ;;  %v2953_v20 = vmax.f32 %v2921_v29, 0.0 }
 0x3ba   : > { %v2744_v1 = vadd.f32 %v2686_v0, %v2490_v10 }
 0x3bc   : > { %v2886_v44 = vadd.f32 %v2828_v19, %v2744_v1  ;;  %v2841_v14 = vpop.f32.mrf.mxu1 }
 0x3be   : > { %v2922_v50 = vadd.f32 %v5049_v39, %v2886_v44 }
 0x3bf   : > { %v2435_v17 = vpop.f32.mrf.mxu3 }
 0x3c0   : > { %v2954_v23 = vmax.f32 %v2922_v50, 0.0  ;;  %v2491_v59 = vadd.f32 %v2435_v17, %v5490_v34 }
 0x3c2   : > { %v2978_v62 = vpack.c.bf16 %v2954_v23, %v2953_v20  ;;  %v2745_v55 = vadd.f32 %v2689_v45, %v2491_v59  ;;  %v5496_v23 = vld [vmem:[#allocation46_spill] sm:$0xff] }
 0x3c4   : > { %3605 = vmatmul.msk.bf16.gmra.mxu2 %vm1027_vm2, %v2978_v62  ;;  %v2887_v27 = vadd.f32 %v2831_v61, %v2745_v55  ;;  %v2701_v61 = vpop.f32.mrf.mxu0  ;;  %v2843_v22 = vpop.f32.mrf.mxu1 }
 0x3c6   : > { %v2923_v8 = vadd.f32 %v5049_v39, %v2887_v27 }
 0x3c7   : > { %v2437_v0 = vpop.f32.mrf.mxu3 }
 0x3c8   : > { %v2492_v19 = vadd.f32 %v2437_v0, %v2202_v43  ;;  %v2955_v5 = vmax.f32 %v2923_v8, 0.0  ;;  %v5497_v0 = vld [vmem:[#allocation13_spill] sm:$0xff] }
 0x3c9   : > { %v2206_v27 = vadd.f32 %v5497_v0, %v4965_v60  ;;  %v3135_v60 = vunpack.c.h.bf16 %v319_v2 }
 0x3ca   : > { %v2746_v12 = vadd.f32 %v2691_v36, %v2492_v19  ;;  %v5136_v36 = vld [vmem:[%s5333_s6] ss:$0 sm:$0xff]  ;;  %v3134_v19 = vunpack.c.l.bf16 %v319_v2 }
 0x3cc   : > { %v2888_v48 = vadd.f32 %v2833_v38, %v2746_v12  ;;  %v5494_v38 = vld [vmem:[#allocation32_spill] sm:$0xff]  ;;  %v2704_v29 = vpop.f32.mrf.mxu0  ;;  %v2846_v62 = vpop.f32.mrf.mxu1 }
 0x3cd   : > { %v2204_v53 = vadd.f32 %v5495_v40, %v5494_v38 }
 0x3ce   : > { %v2924_v63 = vadd.f32 %v5049_v39, %v2888_v48 }
 0x3cf   : > { %v2440_v45 = vpop.f32.mrf.mxu3 }
 0x3d0   : > { %v2956_v4 = vmax.f32 %v2924_v63, 0.0  ;;  %v2493_v9 = vadd.f32 %v2440_v45, %v5493_v13 }
 0x3d2   : > { %v2979_v6 = vpack.c.bf16 %v2956_v4, %v2955_v5  ;;  %v2747_v16 = vadd.f32 %v2694_v42, %v2493_v9 }
 0x3d4   : > { %3606 = vmatmul.msk.bf16.gmra.mxu2 %vm1027_vm2, %v2979_v6  ;;  %v2889_v24 = vadd.f32 %v2836_v32, %v2747_v16  ;;  %v3133_v32 = vunpack.c.h.bf16 %v317_v54  ;;  %v2706_v48 = vpop.f32.mrf.mxu0 }
 0x3d6   : > { %v2925_v31 = vadd.f32 %v5049_v39, %v2889_v24 }
 0x3d7   : > { %v2442_v15 = vpop.f32.mrf.mxu3  ;;  %v3052_v52 = vpop.f32.mrf.mxu2 }
 0x3d8   : > { %v2494_v57 = vadd.f32 %v2442_v15, %v2204_v53  ;;  %v3053_v47 = vadd.f32 %v5136_v36, %v3052_v52  ;;  %v2957_v20 = vmax.f32 %v2925_v31, 0.0  ;;  %v5499_v31 = vld [vmem:[#allocation49_spill] sm:$0xff] }
 0x3da   : > { %v2748_v42 = vadd.f32 %v2696_v30, %v2494_v57  ;;  %v3164_v56 = vadd.f32 %v3132_v35, %v3053_v47  ;;  %v5498_v35 = vld [vmem:[#allocation15_spill] sm:$0xff] }
 0x3db   : > { %v321_v47 = vld [vmem:[%s3988_s3 + $0x10] sm:$0xff]  }
 0x3dc   : > { %v2890_v10 = vadd.f32 %v2838_v25, %v2748_v42  ;;  %v3196_v1 = vmax.f32 %v3164_v56, 0.0  ;;  %v2709_v52 = vpop.f32.mrf.mxu0 }
 0x3de   : > { %v2926_v44 = vadd.f32 %v5049_v39, %v2890_v10  ;;  %3228 = vst.msk [vmem:[%s5144_s12] sm:$0xff] %vm441_vm0, %v3196_v1  ;;  %v5500_v10 = vld [vmem:[#allocation34_spill] sm:$0xff] }
 0x3df   : > { %v2445_v50 = vpop.f32.mrf.mxu3  ;;  %v3054_v17 = vpop.f32.mrf.mxu2  ;;  %v2208_v1 = vadd.f32 %v5500_v10, %v5499_v31  ;;  %v325_v10 = vld [vmem:[%s3988_s3 + $0x20] sm:$0xff]  }
 0x3e0   : > { %v2958_v30 = vmax.f32 %v2926_v44, 0.0  ;;  %v2495_v34 = vadd.f32 %v2445_v50, %v5496_v23  ;;  %v3055_v59 = vadd.f32 %v5136_v36, %v3054_v17  ;;  %v3136_v44 = vunpack.c.l.bf16 %v321_v47 }
 0x3e2   : > { %v3165_v25 = vadd.f32 %v3133_v32, %v3055_v59  ;;  %v2980_v55 = vpack.c.bf16 %v2958_v30, %v2957_v20  ;;  %v2749_v51 = vadd.f32 %v2699_v18, %v2495_v34  ;;  %v2848_v18 = vpop.f32.mrf.mxu1 }
 0x3e4   : > { %v3197_v43 = vmax.f32 %v3165_v25, 0.0  ;;  %3607 = vmatmul.msk.bf16.gmra.mxu2 %vm1027_vm2, %v2980_v55  ;;  %v2891_v63 = vadd.f32 %v2841_v14, %v2749_v51  ;;  %v3137_v51 = vunpack.c.h.bf16 %v321_v47 }
 0x3e6   : > { %3229 = vst.msk [vmem:[%s5144_s12 + $0x8] sm:$0xff] %vm441_vm0, %v3197_v43  ;;  %v2927_v9 = vadd.f32 %v5049_v39, %v2891_v63 }
 0x3e7   : > { %v2447_v12 = vpop.f32.mrf.mxu3  ;;  %v3057_v8 = vpop.f32.mrf.mxu2 }
 0x3e8   : > { %v2496_v45 = vadd.f32 %v2447_v12, %v2206_v27  ;;  %v3058_v5 = vadd.f32 %v5136_v36, %v3057_v8  ;;  %v2959_v14 = vmax.f32 %v2927_v9, 0.0 }
 0x3ea   : > { %v2750_v4 = vadd.f32 %v2701_v61, %v2496_v45  ;;  %v3166_v13 = vadd.f32 %v3134_v19, %v3058_v5  ;;  %v2851_v56 = vpop.f32.mrf.mxu1  ;;  %v323_v45 = vld [vmem:[%s3988_s3 + $0x18] sm:$0xff]  }
 0x3eb   : > { %v3138_v9 = vunpack.c.l.bf16 %v323_v45 }
 0x3ec   : > { %v2892_v6 = vadd.f32 %v2843_v22, %v2750_v4  ;;  %v3198_v54 = vmax.f32 %v3166_v13, 0.0 }
 0x3ee   : > { %v2928_v16 = vadd.f32 %v5049_v39, %v2892_v6  ;;  %3230 = vst.msk [vmem:[%s5144_s12 + $0x10] sm:$0xff] %vm441_vm0, %v3198_v54 }
 0x3ef   : > { %v2450_v38 = vpop.f32.mrf.mxu3  ;;  %v3059_v40 = vpop.f32.mrf.mxu2 }
 0x3f0   : > { %v2960_v53 = vmax.f32 %v2928_v16, 0.0  ;;  %v2497_v15 = vadd.f32 %v2450_v38, %v5498_v35  ;;  %v3060_v61 = vadd.f32 %v5136_v36, %v3059_v40 }
 0x3f2   : > { %v3167_v24 = vadd.f32 %v3135_v60, %v3060_v61  ;;  %v2981_v57 = vpack.c.bf16 %v2960_v53, %v2959_v14  ;;  %v2751_v22 = vadd.f32 %v2704_v29, %v2497_v15  ;;  %v2711_v29 = vpop.f32.mrf.mxu0 }
 0x3f4   : > { %v3199_v42 = vmax.f32 %v3167_v24, 0.0  ;;  %3608 = vmatmul.msk.bf16.gmra.mxu2 %vm1027_vm2, %v2981_v57  ;;  %v2893_v17 = vadd.f32 %v2846_v62, %v2751_v22  ;;  %v2853_v62 = vpop.f32.mrf.mxu1 }
 0x3f6   : > { %3231 = vst.msk [vmem:[%s5144_s12 + $0x18] sm:$0xff] %vm441_vm0, %v3199_v42  ;;  %v2929_v59 = vadd.f32 %v5049_v39, %v2893_v17  ;;  %v3140_v17 = vunpack.c.l.bf16 %v325_v10 }
 0x3f7   : > { %v2452_v32 = vpop.f32.mrf.mxu3  ;;  %v3062_v50 = vpop.f32.mrf.mxu2 }
 0x3f8   : > { %v2498_v20 = vadd.f32 %v2452_v32, %v2208_v1  ;;  %v3063_v30 = vadd.f32 %v5136_v36, %v3062_v50  ;;  %v2961_v27 = vmax.f32 %v2929_v59, 0.0  ;;  %v2212_v50 = vadd.f32 %v5006_v26, %v5011_v41 }
 0x3f9   : > { %v3141_v26 = vunpack.c.h.bf16 %v325_v10 }
 0x3fa   : > { %v2752_v23 = vadd.f32 %v2706_v48, %v2498_v20  ;;  %v3168_v34 = vadd.f32 %v3136_v44, %v3063_v30  ;;  %v2714_v13 = vpop.f32.mrf.mxu0 }
 0x3fc   : > { %v2894_v25 = vadd.f32 %v2848_v18, %v2752_v23  ;;  %v3200_v55 = vmax.f32 %v3168_v34, 0.0  ;;  %v2210_v18 = vadd.f32 %v4986_v46, %v4995_v11  ;;  %v2856_v38 = vpop.f32.mrf.mxu1  ;;  %v3139_v46 = vunpack.c.h.bf16 %v323_v45  ;;  %v327_v45 = vld [vmem:[%s3988_s3 + $0x28] sm:$0xff]  }
 0x3fe   : > { %v2930_v2 = vadd.f32 %v5049_v39, %v2894_v25  ;;  %3232 = vst.msk [vmem:[%s5144_s12 + $0x20] sm:$0xff] %vm441_vm0, %v3200_v55 }
 0x3ff   : > { %v2455_v43 = vpop.f32.mrf.mxu3  ;;  %v3064_v0 = vpop.f32.mrf.mxu2 }
 0x400   : > { %v2962_v19 = vmax.f32 %v2930_v2, 0.0  ;;  %v2499_v12 = vadd.f32 %v2455_v43, %v4990_v49  ;;  %v3065_v8 = vadd.f32 %v5136_v36, %v3064_v0 }
 0x402   : > { %v3169_v48 = vadd.f32 %v3137_v51, %v3065_v8  ;;  %v2982_v63 = vpack.c.bf16 %v2962_v19, %v2961_v27  ;;  %v2753_v5 = vadd.f32 %v2709_v52, %v2499_v12  ;;  %v2716_v24 = vpop.f32.mrf.mxu0 }
 0x404   : > { %v3201_v4 = vmax.f32 %v3169_v48, 0.0  ;;  %3609 = vmatmul.msk.bf16.gmra.mxu2 %vm1027_vm2, %v2982_v63  ;;  %v2895_v49 = vadd.f32 %v2851_v56, %v2753_v5  ;;  %v2858_v1 = vpop.f32.mrf.mxu1 }
 0x406   : > { %3233 = vst.msk [vmem:[%s5144_s12 + $0x28] sm:$0xff] %vm441_vm0, %v3201_v4  ;;  %v2931_v53 = vadd.f32 %v5049_v39, %v2895_v49 }
 0x407   : > { %v2457_v6 = vpop.f32.mrf.mxu3  ;;  %v3067_v54 = vpop.f32.mrf.mxu2 }
 0x408   : > { %v2500_v16 = vadd.f32 %v2457_v6, %v2210_v18  ;;  %v3068_v60 = vadd.f32 %v5136_v36, %v3067_v54  ;;  %v2963_v57 = vmax.f32 %v2931_v53, 0.0  ;;  %v2214_v18 = vadd.f32 %v5023_v58, %v5027_v7 }
 0x409   : > { %v3143_v58 = vunpack.c.h.bf16 %v327_v45 }
 0x40a   : > { %v2754_v40 = vadd.f32 %v2711_v29, %v2500_v16  ;;  %v3170_v14 = vadd.f32 %v3138_v9, %v3068_v60  ;;  %v2719_v29 = vpop.f32.mrf.mxu0  ;;  %v3142_v9 = vunpack.c.l.bf16 %v327_v45 }
 0x40c   : > { %v2896_v35 = vadd.f32 %v2853_v62, %v2754_v40  ;;  %v3202_v15 = vmax.f32 %v3170_v14, 0.0  ;;  %v2861_v43 = vpop.f32.mrf.mxu1 }
 0x40e   : > { %v2932_v61 = vadd.f32 %v5049_v39, %v2896_v35  ;;  %3234 = vst.msk [vmem:[%s5144_s12 + $0x30] sm:$0xff] %vm441_vm0, %v3202_v15 }
 0x40f   : > { %v2460_v11 = vpop.f32.mrf.mxu3  ;;  %v3069_v52 = vpop.f32.mrf.mxu2 }
 0x410   : > { %v2964_v47 = vmax.f32 %v2932_v61, 0.0  ;;  %v2501_v22 = vadd.f32 %v2460_v11, %v5004_v3  ;;  %v3070_v42 = vadd.f32 %v5136_v36, %v3069_v52 }
 0x412   : > { %v3171_v56 = vadd.f32 %v3139_v46, %v3070_v42  ;;  %v2983_v31 = vpack.c.bf16 %v2964_v47, %v2963_v57  ;;  %v2755_v44 = vadd.f32 %v2714_v13, %v2501_v22  ;;  %v2721_v5 = vpop.f32.mrf.mxu0 }
 0x414   : > { %v3203_v32 = vmax.f32 %v3171_v56, 0.0  ;;  %3610 = vmatmul.msk.bf16.gmra.mxu2 %vm1027_vm2, %v2983_v31  ;;  %v2897_v3 = vadd.f32 %v2856_v38, %v2755_v44  ;;  %v2863_v60 = vpop.f32.mrf.mxu1  ;;  %v329_v56 = vld [vmem:[%s3988_s3 + $0x30] sm:$0xff]  }
 0x415   : > { %v3144_v44 = vunpack.c.l.bf16 %v329_v56 }
 0x416   : > { %3235 = vst.msk [vmem:[%s5144_s12 + $0x38] sm:$0xff] %vm441_vm0, %v3203_v32  ;;  %v2933_v55 = vadd.f32 %v5049_v39, %v2897_v3 }
 0x417   : > { %v2462_v20 = vpop.f32.mrf.mxu3  ;;  %v3072_v30 = vpop.f32.mrf.mxu2 }
 0x418   : > { %v2502_v23 = vadd.f32 %v2462_v20, %v2212_v50  ;;  %v3073_v34 = vadd.f32 %v5136_v36, %v3072_v30  ;;  %v2965_v27 = vmax.f32 %v2933_v55, 0.0 }
 0x41a   : > { %v2756_v59 = vadd.f32 %v2716_v24, %v2502_v23  ;;  %v3172_v25 = vadd.f32 %v3140_v17, %v3073_v34  ;;  %v2724_v15 = vpop.f32.mrf.mxu0 }
 0x41c   : > { %v2898_v2 = vadd.f32 %v2858_v1, %v2756_v59  ;;  %v3204_v51 = vmax.f32 %v3172_v25, 0.0  ;;  %v2866_v47 = vpop.f32.mrf.mxu1  ;;  %v2216_v1 = vadd.f32 %v5128_v28, %v5040_v33  ;;  %v3145_v25 = vunpack.c.h.bf16 %v329_v56 }
 0x41e   : > { %v2934_v0 = vadd.f32 %v5049_v39, %v2898_v2  ;;  %3236 = vst.msk [vmem:[%s5144_s12 + $0x40] sm:$0xff] %vm441_vm0, %v3204_v51 }
 0x41f   : > { %v2465_v41 = vpop.f32.mrf.mxu3  ;;  %v3074_v62 = vpop.f32.mrf.mxu2 }
 0x420   : > { %v2966_v19 = vmax.f32 %v2934_v0, 0.0  ;;  %v2503_v12 = vadd.f32 %v2465_v41, %v5020_v21  ;;  %v3075_v8 = vadd.f32 %v5136_v36, %v3074_v62  ;;  %v331_v41 = vld [vmem:[%s3988_s3 + $0x38] sm:$0xff]  }
 0x422   : > { %v3173_v48 = vadd.f32 %v3141_v26, %v3075_v8  ;;  %v2984_v63 = vpack.c.bf16 %v2966_v19, %v2965_v27  ;;  %v2757_v4 = vadd.f32 %v2719_v29, %v2503_v12  ;;  %v2726_v30 = vpop.f32.mrf.mxu0 }
 0x424   : > { %v3205_v13 = vmax.f32 %v3173_v48, 0.0  ;;  %3611 = vmatmul.msk.bf16.gmra.mxu2 %vm1027_vm2, %v2984_v63  ;;  %v2899_v21 = vadd.f32 %v2861_v43, %v2757_v4  ;;  %v2868_v34 = vpop.f32.mrf.mxu1  ;;  %v3147_v48 = vunpack.c.h.bf16 %v331_v41  ;;  %v333_v4 = vld [vmem:[%s3988_s3 + $0x40] sm:$0xff]  }
 0x426   : > { %3237 = vst.msk [vmem:[%s5144_s12 + $0x48] sm:$0xff] %vm441_vm0, %v3205_v13  ;;  %v2935_v14 = vadd.f32 %v5049_v39, %v2899_v21 }
 0x427   : > { %v2467_v6 = vpop.f32.mrf.mxu3  ;;  %v3077_v54 = vpop.f32.mrf.mxu2 }
 0x428   : > { %v2504_v49 = vadd.f32 %v2467_v6, %v2214_v18  ;;  %v3078_v16 = vadd.f32 %v5136_v36, %v3077_v54  ;;  %v2967_v11 = vmax.f32 %v2935_v14, 0.0  ;;  %v3148_v18 = vunpack.c.l.bf16 %v333_v4 }
 0x42a   : > { %v2758_v38 = vadd.f32 %v2721_v5, %v2504_v49  ;;  %v3174_v40 = vadd.f32 %v3142_v9, %v3078_v16  ;;  %v3149_v49 = vunpack.c.h.bf16 %v333_v4 }
 0x42c   : > { %v2900_v53 = vadd.f32 %v2863_v60, %v2758_v38  ;;  %v3206_v35 = vmax.f32 %v3174_v40, 0.0  ;;  %v335_v40 = vld [vmem:[%s3988_s3 + $0x48] sm:$0xff]  }
 0x42e   : > { %v2936_v61 = vadd.f32 %v5049_v39, %v2900_v53  ;;  %3238 = vst.msk [vmem:[%s5144_s12 + $0x50] sm:$0xff] %vm441_vm0, %v3206_v35  ;;  %v3150_v53 = vunpack.c.l.bf16 %v335_v40 }
 0x42f   : > { %v2470_v7 = vpop.f32.mrf.mxu3  ;;  %v3079_v46 = vpop.f32.mrf.mxu2 }
 0x430   : > { %v2968_v52 = vmax.f32 %v2936_v61, 0.0  ;;  %v2505_v24 = vadd.f32 %v2470_v7, %v5034_v37  ;;  %v3080_v57 = vadd.f32 %v5136_v36, %v3079_v46  ;;  %v3151_v7 = vunpack.c.h.bf16 %v335_v40 }
 0x432   : > { %v3175_v22 = vadd.f32 %v3143_v58, %v3080_v57  ;;  %v2985_v42 = vpack.c.bf16 %v2968_v52, %v2967_v11  ;;  %v2759_v31 = vadd.f32 %v2724_v15, %v2505_v24  ;;  %v337_v24 = vld [vmem:[%s3988_s3 + $0x50] sm:$0xff]  }
 0x434   : > { %v3207_v10 = vmax.f32 %v3175_v22, 0.0  ;;  %3612 = vmatmul.msk.bf16.gmra.mxu2 %vm1027_vm2, %v2985_v42  ;;  %v2901_v37 = vadd.f32 %v2866_v47, %v2759_v31  ;;  %v3152_v47 = vunpack.c.l.bf16 %v337_v24 }
 0x436   : > { %3239 = vst.msk [vmem:[%s5144_s12 + $0x58] sm:$0xff] %vm441_vm0, %v3207_v10  ;;  %v2937_v29 = vadd.f32 %v5049_v39, %v2901_v37  ;;  %v3153_v10 = vunpack.c.h.bf16 %v337_v24 }
 0x437   : > { %v2472_v32 = vpop.f32.mrf.mxu3  ;;  %v3082_v50 = vpop.f32.mrf.mxu2 }
 0x438   : > { %v2506_v17 = vadd.f32 %v2472_v32, %v2216_v1  ;;  %v3083_v20 = vadd.f32 %v5136_v36, %v3082_v50  ;;  %v2969_v2 = vmax.f32 %v2937_v29, 0.0  ;;  %v339_v50 = vld [vmem:[%s3988_s3 + $0x58] sm:$0xff]  }
 0x43a   : > { %v2760_v3 = vadd.f32 %v2726_v30, %v2506_v17  ;;  %v3176_v23 = vadd.f32 %v3144_v44, %v3083_v20  ;;  %v3154_v17 = vunpack.c.l.bf16 %v339_v50 }
 0x43c   : > { %v2902_v59 = vadd.f32 %v2868_v34, %v2760_v3  ;;  %v3208_v33 = vmax.f32 %v3176_v23, 0.0  ;;  %v3155_v34 = vunpack.c.h.bf16 %v339_v50 }
 0x43e   : > { %v2938_v28 = vadd.f32 %v5049_v39, %v2902_v59  ;;  %3240 = vst.msk [vmem:[%s5144_s12 + $0x60] sm:$0xff] %vm441_vm0, %v3208_v33  ;;  %v3146_v39 = vunpack.c.l.bf16 %v331_v41 }
 0x43f   : > { %v3084_v55 = vpop.f32.mrf.mxu2 }
 0x440   : > { %v2970_v51 = vmax.f32 %v2938_v28, 0.0  ;;  %v3085_v43 = vadd.f32 %v5136_v36, %v3084_v55  ;;  %v341_v28 = vld [vmem:[%s3988_s3 + $0x60] sm:$0xff]  }
 0x441   : > { %v3156_v55 = vunpack.c.l.bf16 %v341_v28 }
 0x442   : > { %v3177_v0 = vadd.f32 %v3145_v25, %v3085_v43  ;;  %v2986_v26 = vpack.c.bf16 %v2970_v51, %v2969_v2 }
 0x444   : > { %v3209_v62 = vmax.f32 %v3177_v0, 0.0  ;;  %3613 = vmatmul.msk.bf16.gmra.mxu2 %vm1027_vm2, %v2986_v26  ;;  %v3157_v26 = vunpack.c.h.bf16 %v341_v28 }
 0x446   : > { %3241 = vst.msk [vmem:[%s5144_s12 + $0x68] sm:$0xff] %vm441_vm0, %v3209_v62 }
 0x447   : > { %v3087_v27 = vpop.f32.mrf.mxu2 }
 0x448   : > { %v3088_v19 = vadd.f32 %v5136_v36, %v3087_v27  ;;  %v343_v27 = vld [vmem:[%s3988_s3 + $0x68] sm:$0xff]  }
 0x44a   : > { %v3178_v12 = vadd.f32 %v3146_v39, %v3088_v19 }
 0x44c   : > { %v3210_v8 = vmax.f32 %v3178_v12, 0.0  ;;  %v3158_v12 = vunpack.c.l.bf16 %v343_v27 }
 0x44e   : > { %3242 = vst.msk [vmem:[%s5144_s12 + $0x70] sm:$0xff] %vm441_vm0, %v3210_v8 }
 0x44f   : > { %v3089_v63 = vpop.f32.mrf.mxu2 }
 0x450   : > { %v3090_v45 = vadd.f32 %v5136_v36, %v3089_v63 }
 0x452   : > { %v3179_v5 = vadd.f32 %v3147_v48, %v3090_v45 }
 0x454   : > { %v3211_v13 = vmax.f32 %v3179_v5, 0.0  ;;  %v3159_v5 = vunpack.c.h.bf16 %v343_v27 }
 0x456   : > { %3243 = vst.msk [vmem:[%s5144_s12 + $0x78] sm:$0xff] %vm441_vm0, %v3211_v13 }
 0x457   : > { %v3092_v9 = vpop.f32.mrf.mxu2 }
 0x458   : > { %v3093_v6 = vadd.f32 %v5136_v36, %v3092_v9  ;;  %v345_v9 = vld [vmem:[%s3988_s3 + $0x70] sm:$0xff]  }
 0x45a   : > { %v3180_v54 = vadd.f32 %v3148_v18, %v3093_v6 }
 0x45c   : > { %v3212_v21 = vmax.f32 %v3180_v54, 0.0  ;;  %v3160_v54 = vunpack.c.l.bf16 %v345_v9 }
 0x45e   : > { %3244 = vst.msk [vmem:[%s5144_s12 + $0x80] sm:$0xff] %vm441_vm0, %v3212_v21 }
 0x45f   : > { %v3094_v16 = vpop.f32.mrf.mxu2 }
 0x460   : > { %v3095_v60 = vadd.f32 %v5136_v36, %v3094_v16 }
 0x462   : > { %v3181_v38 = vadd.f32 %v3149_v49, %v3095_v60 }
 0x464   : > { %v3213_v14 = vmax.f32 %v3181_v38, 0.0  ;;  %v3161_v38 = vunpack.c.h.bf16 %v345_v9 }
 0x466   : > { %3245 = vst.msk [vmem:[%s5144_s12 + $0x88] sm:$0xff] %vm441_vm0, %v3213_v14 }
 0x467   : > { %v3097_v35 = vpop.f32.mrf.mxu2 }
 0x468   : > { %v3098_v15 = vadd.f32 %v5136_v36, %v3097_v35  ;;  %v347_v35 = vld [vmem:[%s3988_s3 + $0x78] sm:$0xff]   ;;  %s3273_s3 = sshll.u32 %s5144_s12, 4  ;;  %s3274_s3 = int_to_ptr.vmem [resolvable:$true] %s3273_s3 }
 0x46a   : > { %v3182_v61 = vadd.f32 %v3150_v53, %v3098_v15 }
 0x46c   : > { %v3214_v58 = vmax.f32 %v3182_v61, 0.0  ;;  %v3162_v61 = vunpack.c.l.bf16 %v347_v35 }
 0x46e   : > { %3246 = vst.msk [vmem:[%s5144_s12 + $0x90] sm:$0xff] %vm441_vm0, %v3214_v58 }
 0x46f   : > { %v3099_v46 = vpop.f32.mrf.mxu2 }
 0x470   : > { %v3100_v11 = vadd.f32 %v5136_v36, %v3099_v46 }
 0x472   : > { %v3183_v52 = vadd.f32 %v3151_v7, %v3100_v11 }
 0x474   : > { %v3215_v57 = vmax.f32 %v3183_v52, 0.0  ;;  %v3163_v52 = vunpack.c.h.bf16 %v347_v35 }
 0x476   : > { %3247 = vst.msk [vmem:[%s5144_s12 + $0x98] sm:$0xff] %vm441_vm0, %v3215_v57 }
 0x477   : > { %v3102_v22 = vpop.f32.mrf.mxu2 }
 0x478   : > { %v3103_v42 = vadd.f32 %v5136_v36, %v3102_v22 }
 0x47a   : > { %v3184_v56 = vadd.f32 %v3152_v47, %v3103_v42 }
 0x47c   : > { %v3216_v31 = vmax.f32 %v3184_v56, 0.0 }
 0x47e   : > { %3248 = vst.msk [vmem:[%s5144_s12 + $0xa0] sm:$0xff] %vm441_vm0, %v3216_v31 }
 0x47f   : > { %v3104_v1 = vpop.f32.mrf.mxu2 }
 0x480   : > { %v3105_v44 = vadd.f32 %v5136_v36, %v3104_v1 }
 0x482   : > { %v3185_v32 = vadd.f32 %v3153_v10, %v3105_v44 }
 0x484   : > { %v3217_v37 = vmax.f32 %v3185_v32, 0.0 }
 0x486   : > { %3249 = vst.msk [vmem:[%s5144_s12 + $0xa8] sm:$0xff] %vm441_vm0, %v3217_v37 }
 0x487   : > { %v3107_v20 = vpop.f32.mrf.mxu2 }
 0x488   : > { %v3108_v30 = vadd.f32 %v5136_v36, %v3107_v20 }
 0x48a   : > { %v3186_v3 = vadd.f32 %v3154_v17, %v3108_v30 }
 0x48c   : > { %v3218_v23 = vmax.f32 %v3186_v3, 0.0 }
 0x48e   : > { %3250 = vst.msk [vmem:[%s5144_s12 + $0xb0] sm:$0xff] %vm441_vm0, %v3218_v23 }
 0x48f   : > { %v3109_v29 = vpop.f32.mrf.mxu2 }
 0x490   : > { %v3110_v59 = vadd.f32 %v5136_v36, %v3109_v29 }
 0x492   : > { %v3187_v33 = vadd.f32 %v3155_v34, %v3110_v59 }
 0x494   : > { %v3219_v25 = vmax.f32 %v3187_v33, 0.0 }
 0x496   : > { %3251 = vst.msk [vmem:[%s5144_s12 + $0xb8] sm:$0xff] %vm441_vm0, %v3219_v25 }
 0x497   : > { %v3112_v2 = vpop.f32.mrf.mxu2 }
 0x498   : > { %v3113_v51 = vadd.f32 %v5136_v36, %v3112_v2 }
 0x49a   : > { %v3188_v43 = vadd.f32 %v3156_v55, %v3113_v51 }
 0x49c   : > { %v3220_v0 = vmax.f32 %v3188_v43, 0.0 }
 0x49e   : > { %3252 = vst.msk [vmem:[%s5144_s12 + $0xc0] sm:$0xff] %vm441_vm0, %v3220_v0 }
 0x49f   : > { %v3114_v41 = vpop.f32.mrf.mxu2 }
 0x4a0   : > { %v3115_v62 = vadd.f32 %v5136_v36, %v3114_v41 }
 0x4a2   : > { %v3189_v39 = vadd.f32 %v3157_v26, %v3115_v62 }
 0x4a4   : > { %v3221_v19 = vmax.f32 %v3189_v39, 0.0 }
 0x4a6   : > { %3253 = vst.msk [vmem:[%s5144_s12 + $0xc8] sm:$0xff] %vm441_vm0, %v3221_v19 }
 0x4a7   : > { %v3117_v8 = vpop.f32.mrf.mxu2 }
 0x4a8   : > { %v3118_v48 = vadd.f32 %v5136_v36, %v3117_v8 }
 0x4aa   : > { %v3190_v63 = vadd.f32 %v3158_v12, %v3118_v48 }
 0x4ac   : > { %v3222_v45 = vmax.f32 %v3190_v63, 0.0 }
 0x4ae   : > { %3254 = vst.msk [vmem:[%s5144_s12 + $0xd0] sm:$0xff] %vm441_vm0, %v3222_v45 }
 0x4af   : > { %v3119_v4 = vpop.f32.mrf.mxu2 }
 0x4b0   : > { %v3120_v13 = vadd.f32 %v5136_v36, %v3119_v4 }
 0x4b2   : > { %v3191_v18 = vadd.f32 %v3159_v5, %v3120_v13 }
 0x4b4   : > { %v3223_v6 = vmax.f32 %v3191_v18, 0.0 }
 0x4b6   : > { %3255 = vst.msk [vmem:[%s5144_s12 + $0xd8] sm:$0xff] %vm441_vm0, %v3223_v6 }
 0x4b7   : > { %v3122_v21 = vpop.f32.mrf.mxu2 }
 0x4b8   : > { %v3123_v49 = vadd.f32 %v5136_v36, %v3122_v21 }
 0x4ba   : > { %v3192_v16 = vadd.f32 %v3160_v54, %v3123_v49 }
 0x4bc   : > { %v3224_v60 = vmax.f32 %v3192_v16, 0.0 }
 0x4be   : > { %3256 = vst.msk [vmem:[%s5144_s12 + $0xe0] sm:$0xff] %vm441_vm0, %v3224_v60 }
 0x4bf   : > { %v3124_v40 = vpop.f32.mrf.mxu2 }
 0x4c0   : > { %v3125_v14 = vadd.f32 %v5136_v36, %v3124_v40 }
 0x4c2   : > { %v3193_v53 = vadd.f32 %v3161_v38, %v3125_v14 }
 0x4c4   : > { %v3225_v15 = vmax.f32 %v3193_v53, 0.0 }
 0x4c6   : > { %3257 = vst.msk [vmem:[%s5144_s12 + $0xe8] sm:$0xff] %vm441_vm0, %v3225_v15 }
 0x4c7   : > { %v3127_v58 = vpop.f32.mrf.mxu2 }
 0x4c8   : > { %v3128_v7 = vadd.f32 %v5136_v36, %v3127_v58 }
 0x4ca   : > { %v3194_v46 = vadd.f32 %v3162_v61, %v3128_v7 }
 0x4cc   : > { %v3226_v11 = vmax.f32 %v3194_v46, 0.0 }
 0x4ce   : > { %3258 = vst.msk [vmem:[%s5144_s12 + $0xf0] sm:$0xff] %vm441_vm0, %v3226_v11 }
 0x4cf   : > { %v3129_v24 = vpop.f32.mrf.mxu2 }
 0x4d0   : > { %v3130_v57 = vadd.f32 %v5136_v36, %v3129_v24 }
 0x4d2   : > { %v3195_v47 = vadd.f32 %v3163_v52, %v3130_v57 }
 0x4d4   : > { %v3227_v22 = vmax.f32 %v3195_v47, 0.0 }
 0x4d6   : > { %3259 = vst.msk [vmem:[%s5144_s12 + $0xf8] sm:$0xff] %vm441_vm0, %v3227_v22 }
 0x4d7   : > { %3796 = shalt.err (!%p3793_p10)
}
 0x4d8   : > { %s3847_s23 = smov 128   ;;  %s3848_s12 = smov 8  }
 0x4d9   : > { %3647 = dma.vmem_to_hbm [thread:$0]  (%p3956_p7), %s3274_s3, 4096, %s3276_s18, %s3261_s28, %s3847_s23, %s3847_s23, %s3848_s12  }
 0x4da PF: > { %s3290_s13 = sand.u32 1, %s3827_s24   ;;  %p5501_p12 = scmp.ge.s32.totalorder %s3839_s27, 2 }
 0x4db   : > { %s3291_s30 = scalar_lea.sflag [#allocation4], %s3290_s13 }
 0x4dc   : > { %p3658_p13 = pnand %p5501_p12, %p3924_p6 }
 0x4de   : > { %p3659_p0 = pneg %p3658_p13 }
 0x4e0   : > { %3822 = dma.done.wait (%p3659_p0), %s3291_s30, 4096  }
 0x4e1   : > { %3824 = vsyncadd (%p3659_p0), %s3291_s30, 4294963200  ;;  %p21_p3 = scmp.ge.s32.totalorder %s3942_s15, 4   ;;  %s5502_s24 = smov %s3831_s25 }
 0x4e2   : > { %s5503_s25 = smov %s3835_s26  ;;  %s5504_s26 = smov %s3952_s20 }
 0x4e3   : > { %s5505_s27 = smov %s3942_s15  ;;  %23 = sbr.rel (!%p21_p3) target bundleno = 8 (0x8), region = 105 }
 0x4e8   :  { %3297 = vsyncpa [#allocation3], 1 }
 0x4e9   :  { %3299 = vsyncpa [#allocation3 + $0x1], 1 }
 0x4ea   :  { %3300 = vsyncpa [#allocation6], 1 }
 0x4eb   :  { %3301 = vsyncpa [#allocation4], 1 }
 0x4ec   :  { %3303 = vsyncpa [#allocation4 + $0x1], 1 }

</bundles_post_ra>
